<compile_context>
chip_gen: v6e
topology: v6e:2x2x1
jax: 0.10.0
libtpu: 0.0.40
codegen_flags: <defaults>
</compile_context>

<pallas_src>
import numpy as np
import jax
import jax.numpy as jnp
from jax import lax
from jax.experimental import pallas as pl


CONV_CHANNELS = [(3, 8), (8, 16), (16, 32), (32, 64)]


# ----------------------------------------------------------------------------
# Static geometry + constant selection/placement matrices (built once).
# ----------------------------------------------------------------------------
def _conv_geometry(H, W):
    """Per-layer shapes for the 4 conv layers (k=3, s=2, p=1)."""
    geoms = []
    h, w = H, W
    for cin, cout in CONV_CHANNELS:
        hout = (h + 2 - 3) // 2 + 1
        wout = (w + 2 - 3) // 2 + 1
        geoms.append(dict(cin=cin, cout=cout, h=h, w=w, hout=hout, wout=wout))
        h, w = hout, wout
    return geoms


def _row_select(N, h_in, hout):
    """S[kh, n*hout+ho, n*h_in + (2*ho+kh-1)] = 1; taps in the padding -> zero row."""
    S = np.zeros((3, N * hout, N * h_in), np.float32)
    for kh in range(3):
        for n in range(N):
            for ho in range(hout):
                h = 2 * ho + kh - 1
                if 0 <= h < h_in:
                    S[kh, n * hout + ho, n * h_in + h] = 1.0
    return S


def _col_place(w_in, wout):
    """P[kw, 2*wo+kw-1, wo] = 1; taps in the padding are dropped."""
    P = np.zeros((3, w_in, wout), np.float32)
    for kw in range(3):
        for wo in range(wout):
            w = 2 * wo + kw - 1
            if 0 <= w < w_in:
                P[kw, w, wo] = 1.0
    return P


# ----------------------------------------------------------------------------
# Fused Pallas kernel: conv stack + MLP head, everything VMEM-resident.
# ----------------------------------------------------------------------------
def _make_fused_kernel(N, geoms):
    n_layers = len(geoms)

    def kernel(*refs):
        pos = 0
        x_ref = refs[pos]
        pos += 1
        conv_refs = []
        for _ in range(n_layers):
            conv_refs.append((refs[pos], refs[pos + 1], refs[pos + 2]))
            pos += 3
        w1_ref, b1_ref, w2_ref, b2_ref, w3_ref, b3_ref = refs[pos:pos + 6]
        pos += 6
        o_ref = refs[pos]

        # ---- conv stack: F <- relu( sum_kh (S_kh @ F) @ G_kh + bias_row )
        f = x_ref[...]                                        # (N*H, W*Cin)
        for li in range(n_layers):
            s_ref, g_ref, b_ref = conv_refs[li]
            acc = b_ref[...]                                  # (1, Wout*Cout)
            for kh in range(3):
                rows = jnp.dot(s_ref[kh], f,
                               preferred_element_type=jnp.float32)
                acc = acc + jnp.dot(rows, g_ref[kh],
                                    preferred_element_type=jnp.float32)
            f = jnp.maximum(acc, 0.0)                         # (N*Hout, Wout*Cout)

        # ---- MLP head (feature rows of image n are f[n*hout : (n+1)*hout, :])
        gl = geoms[-1]
        hout = gl["hout"]
        chunk = gl["wout"] * gl["cout"]
        w1 = w1_ref[...]
        b1 = b1_ref[...]
        w2 = w2_ref[...]
        b2 = b2_ref[...]
        w3 = w3_ref[...]
        b3 = b3_ref[...]
        for n in range(N):
            acc = b1                                          # (1, 64)
            for h in range(hout):
                r = n * hout + h
                acc = acc + jnp.dot(f[r:r + 1, :],
                                    w1[h * chunk:(h + 1) * chunk, :],
                                    preferred_element_type=jnp.float32)
            h1 = jnp.maximum(acc, 0.0)
            h2 = jnp.maximum(
                jnp.dot(h1, w2, preferred_element_type=jnp.float32) + b2, 0.0)
            o_ref[n:n + 1, :] = (
                jnp.dot(h2, w3, preferred_element_type=jnp.float32) + b3)

    return kernel


# ----------------------------------------------------------------------------
# One-time operand preparation (weight scattering / permutation) + forward.
# ----------------------------------------------------------------------------
def _prepare_operands(params, N, geoms):
    ops = []
    for geom, (w, b) in zip(geoms, params["convs"]):
        S = jnp.asarray(_row_select(N, geom["h"], geom["hout"]))
        P = _col_place(geom["w"], geom["wout"])
        # G[kh, w*Cin+ci, wo*Cout+co] = W[co, ci, kh, kw] where w = 2*wo+kw-1
        G = jnp.einsum("kwv,oiak->awivo", P, w).reshape(
            3, geom["w"] * geom["cin"], geom["wout"] * geom["cout"])
        brow = jnp.tile(b, geom["wout"]).reshape(1, geom["wout"] * geom["cout"])
        ops += [S, G, brow]

    gl = geoms[-1]
    (w1, b1), (w2, b2), (w3, b3) = params["linears"]  # PyTorch (out, in)
    d1 = w1.shape[0]
    # Permute w1's input features from NCHW-flatten order to (h, w, c) order.
    w1p = jnp.transpose(
        w1.reshape(d1, gl["cout"], gl["hout"], gl["wout"]), (2, 3, 1, 0)
    ).reshape(gl["hout"] * gl["wout"] * gl["cout"], d1)
    ops += [w1p, b1.reshape(1, -1), w2.T, b2.reshape(1, -1), w3.T, b3.reshape(1, -1)]
    return ops


def build_forward(params, input_shape):
    N, Cin, H, W = input_shape
    geoms = _conv_geometry(H, W)
    assert geoms[0]["cin"] == Cin
    operands = _prepare_operands(params, N, geoms)
    out_dim = params["linears"][-1][0].shape[0]

    # Single invocation (no grid): whole arrays as VMEM-resident blocks.
    call = pl.pallas_call(
        _make_fused_kernel(N, geoms),
        out_shape=jax.ShapeDtypeStruct((N, out_dim), jnp.float32),
    )

    @jax.jit
    def forward(x_nchw, ops):
        # Only per-forward glue: NCHW -> lane-dense (N*H, W*Cin) slab.
        x2d = jnp.transpose(x_nchw, (0, 2, 3, 1)).reshape(N * H, W * Cin)
        return call(x2d, *ops)

    return forward, operands


# ----------------------------------------------------------------------------
# Pure-JAX reference (mirrors the PyTorch module exactly) for validation.
# ----------------------------------------------------------------------------
def reference_forward(x_nchw, params):
    h = x_nchw
    for (w, b) in params["convs"]:
        h = lax.conv_general_dilated(
            h, w, window_strides=(2, 2), padding=((1, 1), (1, 1)),
            dimension_numbers=("NCHW", "OIHW", "NCHW"))
        h = jnp.maximum(h + b[None, :, None, None], 0.0)
    h = h.reshape(h.shape[0], -1)
    (w1, b1), (w2, b2), (w3, b3) = params["linears"]
    h = jnp.maximum(h @ w1.T + b1, 0.0)
    h = jnp.maximum(h @ w2.T + b2, 0.0)
    return h @ w3.T + b3


# ----------------------------------------------------------------------------
# Deterministic parameter init (synthetic weights, PyTorch layouts).
# ----------------------------------------------------------------------------
def init_params(key, flat_features, output_size=7):
    conv_shapes = [(8, 3, 3, 3), (16, 8, 3, 3), (32, 16, 3, 3), (64, 32, 3, 3)]
    lin_shapes = [(64, flat_features), (32, 64), (output_size, 32)]
    keys = jax.random.split(key, 2 * (len(conv_shapes) + len(lin_shapes)))
    ki = iter(keys)

    convs = []
    for (co, ci, kh, kw) in conv_shapes:
        fan_in = ci * kh * kw
        w = jax.random.normal(next(ki), (co, ci, kh, kw), jnp.float32) / jnp.sqrt(fan_in)
        b = 0.01 * jax.random.normal(next(ki), (co,), jnp.float32)
        convs.append((w, b))

    linears = []
    for (co, ci) in lin_shapes:
        w = jax.random.normal(next(ki), (co, ci), jnp.float32) / jnp.sqrt(ci)
        b = 0.01 * jax.random.normal(next(ki), (co,), jnp.float32)
        linears.append((w, b))

    return {"convs": convs, "linears": linears}


if __name__ == "__main__":
    key = jax.random.PRNGKey(0)
    k_x, k_p = jax.random.split(key)

    # Small input (batch=2, 3 channels, 48x64 spatial).
    x = jax.random.normal(k_x, (2, 3, 48, 64), jnp.float32)

    geoms = _conv_geometry(48, 64)
    gl = geoms[-1]
    flat_features = gl["cout"] * gl["hout"] * gl["wout"]  # 64*3*4 = 768
    params = init_params(k_p, flat_features, output_size=7)

    forward, ops = build_forward(params, x.shape)
    out = jax.block_until_ready(forward(x, ops))
    ref = jax.block_until_ready(reference_forward(x, params))

    assert out.shape == (2, 7), out.shape
    assert out.dtype == jnp.float32
    if not jnp.allclose(out, ref, rtol=1e-2, atol=1e-2):
        raise AssertionError(
            f"mismatch vs reference: max abs err = {jnp.max(jnp.abs(out - ref))}")

    print("KERNEL_OK")
</pallas_src>

<mosaic_0001>
module attributes {stable_mosaic.version = 11 : i64} {
  func.func @kernel(%arg0: memref<96x192xf32, #tpu.memory_space<vmem>>, %arg1: memref<3x48x96xf32, #tpu.memory_space<vmem>>, %arg2: memref<3x192x256xf32, #tpu.memory_space<vmem>>, %arg3: memref<1x256xf32, #tpu.memory_space<vmem>>, %arg4: memref<3x24x48xf32, #tpu.memory_space<vmem>>, %arg5: memref<3x256x256xf32, #tpu.memory_space<vmem>>, %arg6: memref<1x256xf32, #tpu.memory_space<vmem>>, %arg7: memref<3x12x24xf32, #tpu.memory_space<vmem>>, %arg8: memref<3x256x256xf32, #tpu.memory_space<vmem>>, %arg9: memref<1x256xf32, #tpu.memory_space<vmem>>, %arg10: memref<3x6x12xf32, #tpu.memory_space<vmem>>, %arg11: memref<3x256x256xf32, #tpu.memory_space<vmem>>, %arg12: memref<1x256xf32, #tpu.memory_space<vmem>>, %arg13: memref<768x64xf32, #tpu.memory_space<vmem>>, %arg14: memref<1x64xf32, #tpu.memory_space<vmem>>, %arg15: memref<64x32xf32, #tpu.memory_space<vmem>>, %arg16: memref<1x32xf32, #tpu.memory_space<vmem>>, %arg17: memref<32x7xf32, #tpu.memory_space<vmem>>, %arg18: memref<1x7xf32, #tpu.memory_space<vmem>>, %arg19: memref<2x7xf32, #tpu.memory_space<vmem>>) attributes {dimension_semantics = [], scalar_prefetch = 0 : i64, scratch_operands = 0 : i64, tpu.core_type = #tpu.core_type<tc>} {
    %c0 = arith.constant 0 : index
    %c0_0 = arith.constant 0 : index
    %0 = vector.load %arg0[%c0, %c0_0] : memref<96x192xf32, #tpu.memory_space<vmem>>, vector<96x192xf32>
    %c0_1 = arith.constant 0 : index
    %c0_2 = arith.constant 0 : index
    %1 = vector.load %arg3[%c0_1, %c0_2] : memref<1x256xf32, #tpu.memory_space<vmem>>, vector<1x256xf32>
    %c0_3 = arith.constant 0 : index
    %c0_4 = arith.constant 0 : index
    %c0_5 = arith.constant 0 : index
    %2 = vector.load %arg1[%c0_3, %c0_4, %c0_5] : memref<3x48x96xf32, #tpu.memory_space<vmem>>, vector<1x48x96xf32>
    %3 = vector.shape_cast %2 : vector<1x48x96xf32> to vector<48x96xf32>
    %cst = arith.constant dense<0.000000e+00> : vector<48x192xf32>
    %4 = tpu.matmul %3, %0, %cst {dimension_numbers = #tpu.dot_dimension_numbers<[1], [0], [0], [1], [0, 0, 1, 1], [], []>} : vector<48x96xf32>, vector<96x192xf32>, vector<48x192xf32> -> vector<48x192xf32>
    %c0_6 = arith.constant 0 : index
    %c0_7 = arith.constant 0 : index
    %c0_8 = arith.constant 0 : index
    %5 = vector.load %arg2[%c0_6, %c0_7, %c0_8] : memref<3x192x256xf32, #tpu.memory_space<vmem>>, vector<1x192x256xf32>
    %6 = vector.shape_cast %5 : vector<1x192x256xf32> to vector<192x256xf32>
    %cst_9 = arith.constant dense<0.000000e+00> : vector<48x256xf32>
    %7 = tpu.matmul %4, %6, %cst_9 {dimension_numbers = #tpu.dot_dimension_numbers<[1], [0], [0], [1], [0, 0, 1, 1], [], []>} : vector<48x192xf32>, vector<192x256xf32>, vector<48x256xf32> -> vector<48x256xf32>
    %8 = vector.broadcast %1 : vector<1x256xf32> to vector<48x256xf32>
    %9 = arith.addf %8, %7 : vector<48x256xf32>
    %c1 = arith.constant 1 : index
    %c0_10 = arith.constant 0 : index
    %c0_11 = arith.constant 0 : index
    %10 = vector.load %arg1[%c1, %c0_10, %c0_11] : memref<3x48x96xf32, #tpu.memory_space<vmem>>, vector<1x48x96xf32>
    %11 = vector.shape_cast %10 : vector<1x48x96xf32> to vector<48x96xf32>
    %cst_12 = arith.constant dense<0.000000e+00> : vector<48x192xf32>
    %12 = tpu.matmul %11, %0, %cst_12 {dimension_numbers = #tpu.dot_dimension_numbers<[1], [0], [0], [1], [0, 0, 1, 1], [], []>} : vector<48x96xf32>, vector<96x192xf32>, vector<48x192xf32> -> vector<48x192xf32>
    %c1_13 = arith.constant 1 : index
    %c0_14 = arith.constant 0 : index
    %c0_15 = arith.constant 0 : index
    %13 = vector.load %arg2[%c1_13, %c0_14, %c0_15] : memref<3x192x256xf32, #tpu.memory_space<vmem>>, vector<1x192x256xf32>
    %14 = vector.shape_cast %13 : vector<1x192x256xf32> to vector<192x256xf32>
    %cst_16 = arith.constant dense<0.000000e+00> : vector<48x256xf32>
    %15 = tpu.matmul %12, %14, %cst_16 {dimension_numbers = #tpu.dot_dimension_numbers<[1], [0], [0], [1], [0, 0, 1, 1], [], []>} : vector<48x192xf32>, vector<192x256xf32>, vector<48x256xf32> -> vector<48x256xf32>
    %16 = arith.addf %9, %15 : vector<48x256xf32>
    %c2 = arith.constant 2 : index
    %c0_17 = arith.constant 0 : index
    %c0_18 = arith.constant 0 : index
    %17 = vector.load %arg1[%c2, %c0_17, %c0_18] : memref<3x48x96xf32, #tpu.memory_space<vmem>>, vector<1x48x96xf32>
    %18 = vector.shape_cast %17 : vector<1x48x96xf32> to vector<48x96xf32>
    %cst_19 = arith.constant dense<0.000000e+00> : vector<48x192xf32>
    %19 = tpu.matmul %18, %0, %cst_19 {dimension_numbers = #tpu.dot_dimension_numbers<[1], [0], [0], [1], [0, 0, 1, 1], [], []>} : vector<48x96xf32>, vector<96x192xf32>, vector<48x192xf32> -> vector<48x192xf32>
    %c2_20 = arith.constant 2 : index
    %c0_21 = arith.constant 0 : index
    %c0_22 = arith.constant 0 : index
    %20 = vector.load %arg2[%c2_20, %c0_21, %c0_22] : memref<3x192x256xf32, #tpu.memory_space<vmem>>, vector<1x192x256xf32>
    %21 = vector.shape_cast %20 : vector<1x192x256xf32> to vector<192x256xf32>
    %cst_23 = arith.constant dense<0.000000e+00> : vector<48x256xf32>
    %22 = tpu.matmul %19, %21, %cst_23 {dimension_numbers = #tpu.dot_dimension_numbers<[1], [0], [0], [1], [0, 0, 1, 1], [], []>} : vector<48x192xf32>, vector<192x256xf32>, vector<48x256xf32> -> vector<48x256xf32>
    %23 = arith.addf %16, %22 : vector<48x256xf32>
    %cst_24 = arith.constant 0.000000e+00 : f32
    %24 = vector.broadcast %cst_24 : f32 to vector<48x256xf32>
    %25 = arith.maximumf %23, %24 : vector<48x256xf32>
    %c0_25 = arith.constant 0 : index
    %c0_26 = arith.constant 0 : index
    %26 = vector.load %arg6[%c0_25, %c0_26] : memref<1x256xf32, #tpu.memory_space<vmem>>, vector<1x256xf32>
    %c0_27 = arith.constant 0 : index
    %c0_28 = arith.constant 0 : index
    %c0_29 = arith.constant 0 : index
    %27 = vector.load %arg4[%c0_27, %c0_28, %c0_29] : memref<3x24x48xf32, #tpu.memory_space<vmem>>, vector<1x24x48xf32>
    %28 = vector.shape_cast %27 : vector<1x24x48xf32> to vector<24x48xf32>
    %cst_30 = arith.constant dense<0.000000e+00> : vector<24x256xf32>
    %29 = tpu.matmul %28, %25, %cst_30 {dimension_numbers = #tpu.dot_dimension_numbers<[1], [0], [0], [1], [0, 0, 1, 1], [], []>} : vector<24x48xf32>, vector<48x256xf32>, vector<24x256xf32> -> vector<24x256xf32>
    %c0_31 = arith.constant 0 : index
    %c0_32 = arith.constant 0 : index
    %c0_33 = arith.constant 0 : index
    %30 = vector.load %arg5[%c0_31, %c0_32, %c0_33] : memref<3x256x256xf32, #tpu.memory_space<vmem>>, vector<1x256x256xf32>
    %31 = vector.shape_cast %30 : vector<1x256x256xf32> to vector<256x256xf32>
    %cst_34 = arith.constant dense<0.000000e+00> : vector<24x256xf32>
    %32 = tpu.matmul %29, %31, %cst_34 {dimension_numbers = #tpu.dot_dimension_numbers<[1], [0], [0], [1], [0, 0, 1, 1], [], []>} : vector<24x256xf32>, vector<256x256xf32>, vector<24x256xf32> -> vector<24x256xf32>
    %33 = vector.broadcast %26 : vector<1x256xf32> to vector<24x256xf32>
    %34 = arith.addf %33, %32 : vector<24x256xf32>
    %c1_35 = arith.constant 1 : index
    %c0_36 = arith.constant 0 : index
    %c0_37 = arith.constant 0 : index
    %35 = vector.load %arg4[%c1_35, %c0_36, %c0_37] : memref<3x24x48xf32, #tpu.memory_space<vmem>>, vector<1x24x48xf32>
    %36 = vector.shape_cast %35 : vector<1x24x48xf32> to vector<24x48xf32>
    %cst_38 = arith.constant dense<0.000000e+00> : vector<24x256xf32>
    %37 = tpu.matmul %36, %25, %cst_38 {dimension_numbers = #tpu.dot_dimension_numbers<[1], [0], [0], [1], [0, 0, 1, 1], [], []>} : vector<24x48xf32>, vector<48x256xf32>, vector<24x256xf32> -> vector<24x256xf32>
    %c1_39 = arith.constant 1 : index
    %c0_40 = arith.constant 0 : index
    %c0_41 = arith.constant 0 : index
    %38 = vector.load %arg5[%c1_39, %c0_40, %c0_41] : memref<3x256x256xf32, #tpu.memory_space<vmem>>, vector<1x256x256xf32>
    %39 = vector.shape_cast %38 : vector<1x256x256xf32> to vector<256x256xf32>
    %cst_42 = arith.constant dense<0.000000e+00> : vector<24x256xf32>
    %40 = tpu.matmul %37, %39, %cst_42 {dimension_numbers = #tpu.dot_dimension_numbers<[1], [0], [0], [1], [0, 0, 1, 1], [], []>} : vector<24x256xf32>, vector<256x256xf32>, vector<24x256xf32> -> vector<24x256xf32>
    %41 = arith.addf %34, %40 : vector<24x256xf32>
    %c2_43 = arith.constant 2 : index
    %c0_44 = arith.constant 0 : index
    %c0_45 = arith.constant 0 : index
    %42 = vector.load %arg4[%c2_43, %c0_44, %c0_45] : memref<3x24x48xf32, #tpu.memory_space<vmem>>, vector<1x24x48xf32>
    %43 = vector.shape_cast %42 : vector<1x24x48xf32> to vector<24x48xf32>
    %cst_46 = arith.constant dense<0.000000e+00> : vector<24x256xf32>
    %44 = tpu.matmul %43, %25, %cst_46 {dimension_numbers = #tpu.dot_dimension_numbers<[1], [0], [0], [1], [0, 0, 1, 1], [], []>} : vector<24x48xf32>, vector<48x256xf32>, vector<24x256xf32> -> vector<24x256xf32>
    %c2_47 = arith.constant 2 : index
    %c0_48 = arith.constant 0 : index
    %c0_49 = arith.constant 0 : index
    %45 = vector.load %arg5[%c2_47, %c0_48, %c0_49] : memref<3x256x256xf32, #tpu.memory_space<vmem>>, vector<1x256x256xf32>
    %46 = vector.shape_cast %45 : vector<1x256x256xf32> to vector<256x256xf32>
    %cst_50 = arith.constant dense<0.000000e+00> : vector<24x256xf32>
    %47 = tpu.matmul %44, %46, %cst_50 {dimension_numbers = #tpu.dot_dimension_numbers<[1], [0], [0], [1], [0, 0, 1, 1], [], []>} : vector<24x256xf32>, vector<256x256xf32>, vector<24x256xf32> -> vector<24x256xf32>
    %48 = arith.addf %41, %47 : vector<24x256xf32>
    %cst_51 = arith.constant 0.000000e+00 : f32
    %49 = vector.broadcast %cst_51 : f32 to vector<24x256xf32>
    %50 = arith.maximumf %48, %49 : vector<24x256xf32>
    %c0_52 = arith.constant 0 : index
    %c0_53 = arith.constant 0 : index
    %51 = vector.load %arg9[%c0_52, %c0_53] : memref<1x256xf32, #tpu.memory_space<vmem>>, vector<1x256xf32>
    %c0_54 = arith.constant 0 : index
    %c0_55 = arith.constant 0 : index
    %c0_56 = arith.constant 0 : index
    %52 = vector.load %arg7[%c0_54, %c0_55, %c0_56] : memref<3x12x24xf32, #tpu.memory_space<vmem>>, vector<1x12x24xf32>
    %53 = vector.shape_cast %52 : vector<1x12x24xf32> to vector<12x24xf32>
    %cst_57 = arith.constant dense<0.000000e+00> : vector<12x256xf32>
    %54 = tpu.matmul %53, %50, %cst_57 {dimension_numbers = #tpu.dot_dimension_numbers<[1], [0], [0], [1], [0, 0, 1, 1], [], []>} : vector<12x24xf32>, vector<24x256xf32>, vector<12x256xf32> -> vector<12x256xf32>
    %c0_58 = arith.constant 0 : index
    %c0_59 = arith.constant 0 : index
    %c0_60 = arith.constant 0 : index
    %55 = vector.load %arg8[%c0_58, %c0_59, %c0_60] : memref<3x256x256xf32, #tpu.memory_space<vmem>>, vector<1x256x256xf32>
    %56 = vector.shape_cast %55 : vector<1x256x256xf32> to vector<256x256xf32>
    %cst_61 = arith.constant dense<0.000000e+00> : vector<12x256xf32>
    %57 = tpu.matmul %54, %56, %cst_61 {dimension_numbers = #tpu.dot_dimension_numbers<[1], [0], [0], [1], [0, 0, 1, 1], [], []>} : vector<12x256xf32>, vector<256x256xf32>, vector<12x256xf32> -> vector<12x256xf32>
    %58 = vector.broadcast %51 : vector<1x256xf32> to vector<12x256xf32>
    %59 = arith.addf %58, %57 : vector<12x256xf32>
    %c1_62 = arith.constant 1 : index
    %c0_63 = arith.constant 0 : index
    %c0_64 = arith.constant 0 : index
    %60 = vector.load %arg7[%c1_62, %c0_63, %c0_64] : memref<3x12x24xf32, #tpu.memory_space<vmem>>, vector<1x12x24xf32>
    %61 = vector.shape_cast %60 : vector<1x12x24xf32> to vector<12x24xf32>
    %cst_65 = arith.constant dense<0.000000e+00> : vector<12x256xf32>
    %62 = tpu.matmul %61, %50, %cst_65 {dimension_numbers = #tpu.dot_dimension_numbers<[1], [0], [0], [1], [0, 0, 1, 1], [], []>} : vector<12x24xf32>, vector<24x256xf32>, vector<12x256xf32> -> vector<12x256xf32>
    %c1_66 = arith.constant 1 : index
    %c0_67 = arith.constant 0 : index
    %c0_68 = arith.constant 0 : index
    %63 = vector.load %arg8[%c1_66, %c0_67, %c0_68] : memref<3x256x256xf32, #tpu.memory_space<vmem>>, vector<1x256x256xf32>
    %64 = vector.shape_cast %63 : vector<1x256x256xf32> to vector<256x256xf32>
    %cst_69 = arith.constant dense<0.000000e+00> : vector<12x256xf32>
    %65 = tpu.matmul %62, %64, %cst_69 {dimension_numbers = #tpu.dot_dimension_numbers<[1], [0], [0], [1], [0, 0, 1, 1], [], []>} : vector<12x256xf32>, vector<256x256xf32>, vector<12x256xf32> -> vector<12x256xf32>
    %66 = arith.addf %59, %65 : vector<12x256xf32>
    %c2_70 = arith.constant 2 : index
    %c0_71 = arith.constant 0 : index
    %c0_72 = arith.constant 0 : index
    %67 = vector.load %arg7[%c2_70, %c0_71, %c0_72] : memref<3x12x24xf32, #tpu.memory_space<vmem>>, vector<1x12x24xf32>
    %68 = vector.shape_cast %67 : vector<1x12x24xf32> to vector<12x24xf32>
    %cst_73 = arith.constant dense<0.000000e+00> : vector<12x256xf32>
    %69 = tpu.matmul %68, %50, %cst_73 {dimension_numbers = #tpu.dot_dimension_numbers<[1], [0], [0], [1], [0, 0, 1, 1], [], []>} : vector<12x24xf32>, vector<24x256xf32>, vector<12x256xf32> -> vector<12x256xf32>
    %c2_74 = arith.constant 2 : index
    %c0_75 = arith.constant 0 : index
    %c0_76 = arith.constant 0 : index
    %70 = vector.load %arg8[%c2_74, %c0_75, %c0_76] : memref<3x256x256xf32, #tpu.memory_space<vmem>>, vector<1x256x256xf32>
    %71 = vector.shape_cast %70 : vector<1x256x256xf32> to vector<256x256xf32>
    %cst_77 = arith.constant dense<0.000000e+00> : vector<12x256xf32>
    %72 = tpu.matmul %69, %71, %cst_77 {dimension_numbers = #tpu.dot_dimension_numbers<[1], [0], [0], [1], [0, 0, 1, 1], [], []>} : vector<12x256xf32>, vector<256x256xf32>, vector<12x256xf32> -> vector<12x256xf32>
    %73 = arith.addf %66, %72 : vector<12x256xf32>
    %cst_78 = arith.constant 0.000000e+00 : f32
    %74 = vector.broadcast %cst_78 : f32 to vector<12x256xf32>
    %75 = arith.maximumf %73, %74 : vector<12x256xf32>
    %c0_79 = arith.constant 0 : index
    %c0_80 = arith.constant 0 : index
    %76 = vector.load %arg12[%c0_79, %c0_80] : memref<1x256xf32, #tpu.memory_space<vmem>>, vector<1x256xf32>
    %c0_81 = arith.constant 0 : index
    %c0_82 = arith.constant 0 : index
    %c0_83 = arith.constant 0 : index
    %77 = vector.load %arg10[%c0_81, %c0_82, %c0_83] : memref<3x6x12xf32, #tpu.memory_space<vmem>>, vector<1x6x12xf32>
    %78 = vector.shape_cast %77 : vector<1x6x12xf32> to vector<6x12xf32>
    %cst_84 = arith.constant dense<0.000000e+00> : vector<6x256xf32>
    %79 = tpu.matmul %78, %75, %cst_84 {dimension_numbers = #tpu.dot_dimension_numbers<[1], [0], [0], [1], [0, 0, 1, 1], [], []>} : vector<6x12xf32>, vector<12x256xf32>, vector<6x256xf32> -> vector<6x256xf32>
    %c0_85 = arith.constant 0 : index
    %c0_86 = arith.constant 0 : index
    %c0_87 = arith.constant 0 : index
    %80 = vector.load %arg11[%c0_85, %c0_86, %c0_87] : memref<3x256x256xf32, #tpu.memory_space<vmem>>, vector<1x256x256xf32>
    %81 = vector.shape_cast %80 : vector<1x256x256xf32> to vector<256x256xf32>
    %cst_88 = arith.constant dense<0.000000e+00> : vector<6x256xf32>
    %82 = tpu.matmul %79, %81, %cst_88 {dimension_numbers = #tpu.dot_dimension_numbers<[1], [0], [0], [1], [0, 0, 1, 1], [], []>} : vector<6x256xf32>, vector<256x256xf32>, vector<6x256xf32> -> vector<6x256xf32>
    %83 = vector.broadcast %76 : vector<1x256xf32> to vector<6x256xf32>
    %84 = arith.addf %83, %82 : vector<6x256xf32>
    %c1_89 = arith.constant 1 : index
    %c0_90 = arith.constant 0 : index
    %c0_91 = arith.constant 0 : index
    %85 = vector.load %arg10[%c1_89, %c0_90, %c0_91] : memref<3x6x12xf32, #tpu.memory_space<vmem>>, vector<1x6x12xf32>
    %86 = vector.shape_cast %85 : vector<1x6x12xf32> to vector<6x12xf32>
    %cst_92 = arith.constant dense<0.000000e+00> : vector<6x256xf32>
    %87 = tpu.matmul %86, %75, %cst_92 {dimension_numbers = #tpu.dot_dimension_numbers<[1], [0], [0], [1], [0, 0, 1, 1], [], []>} : vector<6x12xf32>, vector<12x256xf32>, vector<6x256xf32> -> vector<6x256xf32>
    %c1_93 = arith.constant 1 : index
    %c0_94 = arith.constant 0 : index
    %c0_95 = arith.constant 0 : index
    %88 = vector.load %arg11[%c1_93, %c0_94, %c0_95] : memref<3x256x256xf32, #tpu.memory_space<vmem>>, vector<1x256x256xf32>
    %89 = vector.shape_cast %88 : vector<1x256x256xf32> to vector<256x256xf32>
    %cst_96 = arith.constant dense<0.000000e+00> : vector<6x256xf32>
    %90 = tpu.matmul %87, %89, %cst_96 {dimension_numbers = #tpu.dot_dimension_numbers<[1], [0], [0], [1], [0, 0, 1, 1], [], []>} : vector<6x256xf32>, vector<256x256xf32>, vector<6x256xf32> -> vector<6x256xf32>
    %91 = arith.addf %84, %90 : vector<6x256xf32>
    %c2_97 = arith.constant 2 : index
    %c0_98 = arith.constant 0 : index
    %c0_99 = arith.constant 0 : index
    %92 = vector.load %arg10[%c2_97, %c0_98, %c0_99] : memref<3x6x12xf32, #tpu.memory_space<vmem>>, vector<1x6x12xf32>
    %93 = vector.shape_cast %92 : vector<1x6x12xf32> to vector<6x12xf32>
    %cst_100 = arith.constant dense<0.000000e+00> : vector<6x256xf32>
    %94 = tpu.matmul %93, %75, %cst_100 {dimension_numbers = #tpu.dot_dimension_numbers<[1], [0], [0], [1], [0, 0, 1, 1], [], []>} : vector<6x12xf32>, vector<12x256xf32>, vector<6x256xf32> -> vector<6x256xf32>
    %c2_101 = arith.constant 2 : index
    %c0_102 = arith.constant 0 : index
    %c0_103 = arith.constant 0 : index
    %95 = vector.load %arg11[%c2_101, %c0_102, %c0_103] : memref<3x256x256xf32, #tpu.memory_space<vmem>>, vector<1x256x256xf32>
    %96 = vector.shape_cast %95 : vector<1x256x256xf32> to vector<256x256xf32>
    %cst_104 = arith.constant dense<0.000000e+00> : vector<6x256xf32>
    %97 = tpu.matmul %94, %96, %cst_104 {dimension_numbers = #tpu.dot_dimension_numbers<[1], [0], [0], [1], [0, 0, 1, 1], [], []>} : vector<6x256xf32>, vector<256x256xf32>, vector<6x256xf32> -> vector<6x256xf32>
    %98 = arith.addf %91, %97 : vector<6x256xf32>
    %cst_105 = arith.constant 0.000000e+00 : f32
    %99 = vector.broadcast %cst_105 : f32 to vector<6x256xf32>
    %100 = arith.maximumf %98, %99 : vector<6x256xf32>
    %c0_106 = arith.constant 0 : index
    %c0_107 = arith.constant 0 : index
    %101 = vector.load %arg13[%c0_106, %c0_107] : memref<768x64xf32, #tpu.memory_space<vmem>>, vector<768x64xf32>
    %c0_108 = arith.constant 0 : index
    %c0_109 = arith.constant 0 : index
    %102 = vector.load %arg14[%c0_108, %c0_109] : memref<1x64xf32, #tpu.memory_space<vmem>>, vector<1x64xf32>
    %c0_110 = arith.constant 0 : index
    %c0_111 = arith.constant 0 : index
    %103 = vector.load %arg15[%c0_110, %c0_111] : memref<64x32xf32, #tpu.memory_space<vmem>>, vector<64x32xf32>
    %c0_112 = arith.constant 0 : index
    %c0_113 = arith.constant 0 : index
    %104 = vector.load %arg16[%c0_112, %c0_113] : memref<1x32xf32, #tpu.memory_space<vmem>>, vector<1x32xf32>
    %c0_114 = arith.constant 0 : index
    %c0_115 = arith.constant 0 : index
    %105 = vector.load %arg17[%c0_114, %c0_115] : memref<32x7xf32, #tpu.memory_space<vmem>>, vector<32x7xf32>
    %c0_116 = arith.constant 0 : index
    %c0_117 = arith.constant 0 : index
    %106 = vector.load %arg18[%c0_116, %c0_117] : memref<1x7xf32, #tpu.memory_space<vmem>>, vector<1x7xf32>
    %107 = vector.extract_strided_slice %100 {offsets = [0, 0], sizes = [1, 256], strides = [1, 1]} : vector<6x256xf32> to vector<1x256xf32>
    %108 = vector.extract_strided_slice %101 {offsets = [0, 0], sizes = [256, 64], strides = [1, 1]} : vector<768x64xf32> to vector<256x64xf32>
    %cst_118 = arith.constant dense<0.000000e+00> : vector<1x64xf32>
    %109 = tpu.matmul %107, %108, %cst_118 {dimension_numbers = #tpu.dot_dimension_numbers<[1], [0], [0], [1], [0, 0, 1, 1], [], []>} : vector<1x256xf32>, vector<256x64xf32>, vector<1x64xf32> -> vector<1x64xf32>
    %110 = arith.addf %102, %109 : vector<1x64xf32>
    %111 = vector.extract_strided_slice %100 {offsets = [1, 0], sizes = [1, 256], strides = [1, 1]} : vector<6x256xf32> to vector<1x256xf32>
    %112 = vector.extract_strided_slice %101 {offsets = [256, 0], sizes = [256, 64], strides = [1, 1]} : vector<768x64xf32> to vector<256x64xf32>
    %cst_119 = arith.constant dense<0.000000e+00> : vector<1x64xf32>
    %113 = tpu.matmul %111, %112, %cst_119 {dimension_numbers = #tpu.dot_dimension_numbers<[1], [0], [0], [1], [0, 0, 1, 1], [], []>} : vector<1x256xf32>, vector<256x64xf32>, vector<1x64xf32> -> vector<1x64xf32>
    %114 = arith.addf %110, %113 : vector<1x64xf32>
    %115 = vector.extract_strided_slice %100 {offsets = [2, 0], sizes = [1, 256], strides = [1, 1]} : vector<6x256xf32> to vector<1x256xf32>
    %116 = vector.extract_strided_slice %101 {offsets = [512, 0], sizes = [256, 64], strides = [1, 1]} : vector<768x64xf32> to vector<256x64xf32>
    %cst_120 = arith.constant dense<0.000000e+00> : vector<1x64xf32>
    %117 = tpu.matmul %115, %116, %cst_120 {dimension_numbers = #tpu.dot_dimension_numbers<[1], [0], [0], [1], [0, 0, 1, 1], [], []>} : vector<1x256xf32>, vector<256x64xf32>, vector<1x64xf32> -> vector<1x64xf32>
    %118 = arith.addf %114, %117 : vector<1x64xf32>
    %cst_121 = arith.constant 0.000000e+00 : f32
    %119 = vector.broadcast %cst_121 : f32 to vector<1x64xf32>
    %120 = arith.maximumf %118, %119 : vector<1x64xf32>
    %cst_122 = arith.constant dense<0.000000e+00> : vector<1x32xf32>
    %121 = tpu.matmul %120, %103, %cst_122 {dimension_numbers = #tpu.dot_dimension_numbers<[1], [0], [0], [1], [0, 0, 1, 1], [], []>} : vector<1x64xf32>, vector<64x32xf32>, vector<1x32xf32> -> vector<1x32xf32>
    %122 = arith.addf %121, %104 : vector<1x32xf32>
    %cst_123 = arith.constant 0.000000e+00 : f32
    %123 = vector.broadcast %cst_123 : f32 to vector<1x32xf32>
    %124 = arith.maximumf %122, %123 : vector<1x32xf32>
    %cst_124 = arith.constant dense<0.000000e+00> : vector<1x7xf32>
    %125 = tpu.matmul %124, %105, %cst_124 {dimension_numbers = #tpu.dot_dimension_numbers<[1], [0], [0], [1], [0, 0, 1, 1], [], []>} : vector<1x32xf32>, vector<32x7xf32>, vector<1x7xf32> -> vector<1x7xf32>
    %126 = arith.addf %125, %106 : vector<1x7xf32>
    %c0_125 = arith.constant 0 : index
    %c0_126 = arith.constant 0 : index
    %127 = vector.load %arg19[%c0_125, %c0_126] : memref<2x7xf32, #tpu.memory_space<vmem>>, vector<1x7xf32>
    tpu.vector_store %arg19[%c0_125, %c0_126], %126 {strides = array<i32>} : memref<2x7xf32, #tpu.memory_space<vmem>>, vector<1x7xf32>,
    %128 = vector.extract_strided_slice %100 {offsets = [3, 0], sizes = [1, 256], strides = [1, 1]} : vector<6x256xf32> to vector<1x256xf32>
    %129 = vector.extract_strided_slice %101 {offsets = [0, 0], sizes = [256, 64], strides = [1, 1]} : vector<768x64xf32> to vector<256x64xf32>
    %cst_127 = arith.constant dense<0.000000e+00> : vector<1x64xf32>
    %130 = tpu.matmul %128, %129, %cst_127 {dimension_numbers = #tpu.dot_dimension_numbers<[1], [0], [0], [1], [0, 0, 1, 1], [], []>} : vector<1x256xf32>, vector<256x64xf32>, vector<1x64xf32> -> vector<1x64xf32>
    %131 = arith.addf %102, %130 : vector<1x64xf32>
    %132 = vector.extract_strided_slice %100 {offsets = [4, 0], sizes = [1, 256], strides = [1, 1]} : vector<6x256xf32> to vector<1x256xf32>
    %133 = vector.extract_strided_slice %101 {offsets = [256, 0], sizes = [256, 64], strides = [1, 1]} : vector<768x64xf32> to vector<256x64xf32>
    %cst_128 = arith.constant dense<0.000000e+00> : vector<1x64xf32>
    %134 = tpu.matmul %132, %133, %cst_128 {dimension_numbers = #tpu.dot_dimension_numbers<[1], [0], [0], [1], [0, 0, 1, 1], [], []>} : vector<1x256xf32>, vector<256x64xf32>, vector<1x64xf32> -> vector<1x64xf32>
    %135 = arith.addf %131, %134 : vector<1x64xf32>
    %136 = vector.extract_strided_slice %100 {offsets = [5, 0], sizes = [1, 256], strides = [1, 1]} : vector<6x256xf32> to vector<1x256xf32>
    %137 = vector.extract_strided_slice %101 {offsets = [512, 0], sizes = [256, 64], strides = [1, 1]} : vector<768x64xf32> to vector<256x64xf32>
    %cst_129 = arith.constant dense<0.000000e+00> : vector<1x64xf32>
    %138 = tpu.matmul %136, %137, %cst_129 {dimension_numbers = #tpu.dot_dimension_numbers<[1], [0], [0], [1], [0, 0, 1, 1], [], []>} : vector<1x256xf32>, vector<256x64xf32>, vector<1x64xf32> -> vector<1x64xf32>
    %139 = arith.addf %135, %138 : vector<1x64xf32>
    %cst_130 = arith.constant 0.000000e+00 : f32
    %140 = vector.broadcast %cst_130 : f32 to vector<1x64xf32>
    %141 = arith.maximumf %139, %140 : vector<1x64xf32>
    %cst_131 = arith.constant dense<0.000000e+00> : vector<1x32xf32>
    %142 = tpu.matmul %141, %103, %cst_131 {dimension_numbers = #tpu.dot_dimension_numbers<[1], [0], [0], [1], [0, 0, 1, 1], [], []>} : vector<1x64xf32>, vector<64x32xf32>, vector<1x32xf32> -> vector<1x32xf32>
    %143 = arith.addf %142, %104 : vector<1x32xf32>
    %cst_132 = arith.constant 0.000000e+00 : f32
    %144 = vector.broadcast %cst_132 : f32 to vector<1x32xf32>
    %145 = arith.maximumf %143, %144 : vector<1x32xf32>
    %cst_133 = arith.constant dense<0.000000e+00> : vector<1x7xf32>
    %146 = tpu.matmul %145, %105, %cst_133 {dimension_numbers = #tpu.dot_dimension_numbers<[1], [0], [0], [1], [0, 0, 1, 1], [], []>} : vector<1x32xf32>, vector<32x7xf32>, vector<1x7xf32> -> vector<1x7xf32>
    %147 = arith.addf %146, %106 : vector<1x7xf32>
    %c1_134 = arith.constant 1 : index
    %c0_135 = arith.constant 0 : index
    %148 = vector.load %arg19[%c1_134, %c0_135] : memref<2x7xf32, #tpu.memory_space<vmem>>, vector<1x7xf32>
    tpu.vector_store %arg19[%c1_134, %c0_135], %147 {strides = array<i32>} : memref<2x7xf32, #tpu.memory_space<vmem>>, vector<1x7xf32>,
    return
  }
}

</mosaic_0001>

<bundles_post_ra>
// kernel: forward.1
= control target key start
LH: loop header
LB: loop body
LE: loop exit
PB: predicated region body
PF: predicated region fallthrough
CT: control target
= control target key end

     0   :  { %s7478_s0 = inlined_call_operand.vmem [shape: f32[96,192], index: 0, kind: input, shape index: {}]   ;;  %s7479_s1 = inlined_call_operand.vmem [shape: f32[3,48,96], index: 1, kind: input, shape index: {}]   ;;  %s7480_s2 = inlined_call_operand.vmem [shape: f32[3,192,256], index: 2, kind: input, shape index: {}]   ;;  %s7481_s3 = inlined_call_operand.hbm [shape: f32[1,256], index: 3, kind: input, shape index: {}]   ;;  %s7482_s4 = inlined_call_operand.vmem [shape: f32[3,24,48], index: 4, kind: input, shape index: {}]   ;;  %s7483_s5 = inlined_call_operand.vmem [shape: f32[3,256,256], index: 5, kind: input, shape index: {}]   ;;  %s7484_s6 = inlined_call_operand.hbm [shape: f32[1,256], index: 6, kind: input, shape index: {}]   ;;  %s7485_s7 = inlined_call_operand.hbm [shape: f32[3,12,24], index: 7, kind: input, shape index: {}]   ;;  %s7486_s8 = inlined_call_operand.hbm [shape: f32[3,256,256], index: 8, kind: input, shape index: {}]   ;;  %s7487_s9 = inlined_call_operand.hbm [shape: f32[1,256], index: 9, kind: input, shape index: {}]   ;;  %s7488_s10 = inlined_call_operand.hbm [shape: f32[3,6,12], index: 10, kind: input, shape index: {}]   ;;  %s7489_s11 = inlined_call_operand.hbm [shape: f32[3,256,256], index: 11, kind: input, shape index: {}]   ;;  %s7490_s12 = inlined_call_operand.hbm [shape: f32[1,256], index: 12, kind: input, shape index: {}]   ;;  %s7491_s13 = inlined_call_operand.vmem [shape: f32[768,64], index: 13, kind: input, shape index: {}]   ;;  %s7492_s14 = inlined_call_operand.vmem [shape: f32[1,64], index: 14, kind: input, shape index: {}]   ;;  %s7493_s15 = inlined_call_operand.vmem [shape: f32[64,32], index: 15, kind: input, shape index: {}]   ;;  %s7494_s16 = inlined_call_operand.vmem [shape: f32[1,32], index: 16, kind: input, shape index: {}]   ;;  %s7495_s17 = inlined_call_operand.vmem [shape: f32[32,7], index: 17, kind: input, shape index: {}]   ;;  %s7496_s18 = inlined_call_operand.vmem [shape: f32[1,7], index: 18, kind: input, shape index: {}]   ;;  %s7497_s19 = inlined_call_operand.hbm [shape: f32[2,7], index: 19, kind: output, shape index: {}]  }
   0x1   :  { %7562 = sst [smem:[#allocation82_spill]] %s7478_s0 }
   0x2   :  { %7563 = sst [smem:[#allocation83_spill]] %s7479_s1 }
   0x3   :  { %7564 = sst [smem:[#allocation84_spill]] %s7480_s2 }
   0x4   :  { %7565 = sst [smem:[#allocation85_spill]] %s7481_s3 }
   0x5   :  { %24 = vsyncpa [#allocation3], 0 }
   0x6   :  { %25 = vsyncpa [#allocation6], 0 }
   0x7   :  { %26 = vsyncpa [#allocation9], 0 }
   0x8   :  { %27 = vsyncpa [#allocation12], 0 }
   0x9   :  { %28 = vsyncpa [#allocation15], 0 }
   0xa   :  { %29 = vsyncpa [#allocation4], 0  ;;  %s4959_s0 = smov [#allocation5]   ;;  %s4960_s20 = smov [#allocation8]  }
   0xb   :  { %s56_s30 = sshll.u32 %s4959_s0, 4  ;;  %s77_s21 = sshll.u32 %s4960_s20, 4  ;;  %s57_s30 = int_to_ptr.vmem [resolvable:$true] %s56_s30  ;;  %s78_s21 = int_to_ptr.vmem [resolvable:$true] %s77_s21 }
   0xc   :  { %s4775_s1 = scalar_lea.vmem %s57_s30, 32  ;;  %p4780_p1 = scmp.lt.s32.totalorder %s57_s30, %s57_s30 }
   0xd   :  { %p4776_p0 = scmp.ne.s32.totalorder %s57_s30, %s4775_s1  ;;  %p4781_p2 = scmp.lt.s32.totalorder %s4775_s1, %s4775_s1 }
   0xf   :  { %p4782_p3 = por %p4781_p2, %p4780_p1 }
  0x11   :  { %p4783_p4 = pnand %p4782_p3, %p4776_p0 }
  0x13   :  { %4786 = shalt.err (!%p4783_p4)
}
  0x14   :  { %59 = dma.hbm_to_vmem [thread:$0]  %s7484_s6, 32, %s57_s30, [#allocation6]  }
  0x15   :  { %s4795_s23 = scalar_lea.vmem %s78_s21, 24576  ;;  %p4800_p6 = scmp.lt.s32.totalorder %s78_s21, %s78_s21 }
  0x16   :  { %p4796_p5 = scmp.ne.s32.totalorder %s78_s21, %s4795_s23  ;;  %p4801_p7 = scmp.lt.s32.totalorder %s4795_s23, %s4795_s23 }
  0x18   :  { %p4802_p8 = por %p4801_p7, %p4800_p6 }
  0x1a   :  { %p4803_p9 = pnand %p4802_p8, %p4796_p5 }
  0x1c   :  { %4806 = shalt.err (!%p4803_p9)
}
  0x1d   :  { %s4961_s24 = smov 256   ;;  %s4962_s25 = smov 16  }
  0x1e   :  { %83 = dma.hbm_to_vmem [thread:$0]  %s7486_s8, 24576, %s78_s21, [#allocation9], %s4961_s24, %s4961_s24, %s4962_s25  }
  0x1f   :  { %s4963_s27 = smov [#allocation11]   ;;  %s4964_s29 = smov [#allocation2]  }
  0x20   :  { %s99_s28 = sshll.u32 %s4963_s27, 4  ;;  %s42_s6 = sshll.u32 %s4964_s29, 4  ;;  %s100_s28 = int_to_ptr.vmem [resolvable:$true] %s99_s28  ;;  %s43_s6 = int_to_ptr.vmem [resolvable:$true] %s42_s6 }
  0x21   :  { %s4815_s0 = scalar_lea.vmem %s100_s28, 384  ;;  %p4820_p11 = scmp.lt.s32.totalorder %s100_s28, %s100_s28 }
  0x22   :  { %p4816_p10 = scmp.ne.s32.totalorder %s100_s28, %s4815_s0  ;;  %p4821_p12 = scmp.lt.s32.totalorder %s4815_s0, %s4815_s0 }
  0x24   :  { %p4822_p13 = por %p4821_p12, %p4820_p11 }
  0x26   :  { %p4823_p0 = pnand %p4822_p13, %p4816_p10 }
  0x28   :  { %4826 = shalt.err (!%p4823_p0)
}
  0x29   :  { %s4965_s30 = smov 128   ;;  %s4966_s20 = smov 8  }
  0x2a   :  { %105 = dma.hbm_to_vmem [thread:$0]  %s7488_s10, 384, %s100_s28, [#allocation12], %s4965_s30, %s4965_s30, %s4966_s20  }
  0x2b   :  { %s4835_s8 = scalar_lea.vmem %s43_s6, 32  ;;  %p4840_p2 = scmp.lt.s32.totalorder %s43_s6, %s43_s6 }
  0x2c   :  { %p4836_p1 = scmp.ne.s32.totalorder %s43_s6, %s4835_s8  ;;  %p4841_p3 = scmp.lt.s32.totalorder %s4835_s8, %s4835_s8 }
  0x2e   :  { %p4842_p4 = por %p4841_p3, %p4840_p2 }
  0x30   :  { %p4843_p5 = pnand %p4842_p4, %p4836_p1 }
  0x32   :  { %4846 = shalt.err (!%p4843_p5)
}
  0x33   :  { %s7566_s23 = sld [smem:[#allocation85_spill]]  ;;  %s4967_s3 = smov [#allocation7]  }
  0x34   :  { %s65_s26 = sshll.u32 %s4967_s3, 4  ;;  %s4968_s27 = smov [#allocation10]   ;;  %s66_s26 = int_to_ptr.vmem [resolvable:$true] %s65_s26 }
  0x35   :  { %s90_s29 = sshll.u32 %s4968_s27, 4  ;;  %s4855_s0 = scalar_lea.vmem %s66_s26, 768  ;;  %s91_s29 = int_to_ptr.vmem [resolvable:$true] %s90_s29 }
  0x36   :  { %p4856_p6 = scmp.ne.s32.totalorder %s66_s26, %s4855_s0  ;;  %p4860_p7 = scmp.lt.s32.totalorder %s66_s26, %s66_s26 }
  0x37   :  { %p4861_p8 = scmp.lt.s32.totalorder %s4855_s0, %s4855_s0 }
  0x39   :  { %45 = dma.hbm_to_vmem [thread:$0]  %s7566_s23, 32, %s43_s6, [#allocation3]  }
  0x3a   :  { %p4862_p9 = por %p4861_p8, %p4860_p7 }
  0x3c   :  { %p4863_p10 = pnand %p4862_p9, %p4856_p6 }
  0x3e   :  { %4866 = shalt.err (!%p4863_p10)
}
  0x3f   :  { %71 = dma.hbm_to_vmem [thread:$0]  %s7485_s7, 768, %s66_s26, [#allocation6], %s4965_s30, %s4965_s30, %s4966_s20  }
  0x40   :  { %s4875_s1 = scalar_lea.vmem %s91_s29, 32  ;;  %p4880_p12 = scmp.lt.s32.totalorder %s91_s29, %s91_s29 }
  0x41   :  { %p4876_p11 = scmp.ne.s32.totalorder %s91_s29, %s4875_s1  ;;  %p4881_p13 = scmp.lt.s32.totalorder %s4875_s1, %s4875_s1 }
  0x43   :  { %p4882_p0 = por %p4881_p13, %p4880_p12 }
  0x45   :  { %p4883_p1 = pnand %p4882_p0, %p4876_p11 }
  0x47   :  { %4886 = shalt.err (!%p4883_p1)
}
  0x48   :  { %93 = dma.hbm_to_vmem [thread:$0]  %s7487_s9, 32, %s91_s29, [#allocation9]  }
  0x49   :  { %s4969_s8 = smov [#allocation13]   ;;  %s4970_s2 = smov [#allocation14]  }
  0x4a   :  { %s111_s21 = sshll.u32 %s4969_s8, 4  ;;  %s124_s23 = sshll.u32 %s4970_s2, 4  ;;  %s112_s21 = int_to_ptr.vmem [resolvable:$true] %s111_s21  ;;  %s125_s23 = int_to_ptr.vmem [resolvable:$true] %s124_s23 }
  0x4b   :  { %s4895_s3 = scalar_lea.vmem %s112_s21, 24576  ;;  %p4900_p3 = scmp.lt.s32.totalorder %s112_s21, %s112_s21 }
  0x4c   :  { %p4896_p2 = scmp.ne.s32.totalorder %s112_s21, %s4895_s3  ;;  %p4901_p4 = scmp.lt.s32.totalorder %s4895_s3, %s4895_s3 }
  0x4e   :  { %p4902_p5 = por %p4901_p4, %p4900_p3 }
  0x50   :  { %p4903_p6 = pnand %p4902_p5, %p4896_p2 }
  0x52   :  { %4906 = shalt.err (!%p4903_p6)
}
  0x53   :  { %117 = dma.hbm_to_vmem [thread:$0]  %s7489_s11, 24576, %s112_s21, [#allocation12], %s4961_s24, %s4961_s24, %s4962_s25  }
  0x54   :  { %s4915_s9 = scalar_lea.vmem %s125_s23, 32  ;;  %p4920_p8 = scmp.lt.s32.totalorder %s125_s23, %s125_s23 }
  0x55   :  { %p4916_p7 = scmp.ne.s32.totalorder %s125_s23, %s4915_s9  ;;  %p4921_p9 = scmp.lt.s32.totalorder %s4915_s9, %s4915_s9 }
  0x57   :  { %p4922_p10 = por %p4921_p9, %p4920_p8 }
  0x59   :  { %p4923_p11 = pnand %p4922_p10, %p4916_p7 }
  0x5b   :  { %4926 = shalt.err (!%p4923_p11)
}
  0x5c   :  { %127 = dma.hbm_to_vmem [thread:$0]  %s7490_s12, 32, %s125_s23, [#allocation15]  }
  0x5d   :  { %4947 = dma.done.wait [#allocation3], 32  }
  0x5e   :  { %4948 = vsyncadd [#allocation3], 4294967264 }
  0x5f   :  { %4949 = dma.done.wait [#allocation6], 800  }
  0x60   :  { %4950 = vsyncadd [#allocation6], 4294966496 }
  0x61   :  { %4951 = dma.done.wait [#allocation9], 24608  }
  0x62   :  { %4952 = vsyncadd [#allocation9], 4294942688 }
  0x63   :  { %4953 = dma.done.wait [#allocation12], 24960  }
  0x64   :  { %4954 = vsyncadd [#allocation12], 4294942336 }
  0x65   :  { %4955 = dma.done.wait [#allocation15], 32  }
  0x66   :  { %4956 = vsyncadd [#allocation15], 4294967264  ;;  %v7501_v0 = vmov 0.0   ;;  %s7567_s25 = sld [smem:[#allocation82_spill]]  ;;  %vm195_vm0 = vcmask 785408   ;;  %vm363_vm1 = vcmask 523264  }
  0x67   :  { %278 = vmatprep.mubr.f32.mxu0 %v7501_v0  ;;  %s7568_s8 = sld [smem:[#allocation84_spill]]  ;;  %vm1134_vm2 = vcmask 392192   ;;  %vm1900_vm3 = vcmask 195584   ;;  %vm2614_vm4 = vcmask 1043456   ;;  %vm2610_vm5 = vcmask 97280  }
  0x68   :  { %s7569_s23 = sld [smem:[#allocation83_spill]]  ;;  %vm4972_vm6 = vmmov 0   ;;  %vm3679_vm7 = vcmask 261120   ;;  %vm3753_vm8 = vcmask 49152  }
  0x6c   :  { %v5108_v1 = vld [vmem:[%s7567_s25 + $0xb8] sm:$0xff]  ;;  %v5113_v2 = vld [vmem:[%s7567_s25 + $0xb0] sm:$0xff]  ;;  %v5118_v3 = vld [vmem:[%s7567_s25 + $0xa8] sm:$0xff] }
  0x6d   :  { %222 = vmatprep.subr.mxu0 %v5108_v1  ;;  %v5124_v4 = vld [vmem:[%s7567_s25 + $0xa0] sm:$0xff]  ;;  %v5130_v5 = vld [vmem:[%s7567_s25 + $0x98] sm:$0xff]  ;;  %v5136_v6 = vld [vmem:[%s7567_s25 + $0x90] sm:$0xff] }
  0x6e   :  { %223 = vmatpush1.msra.mxu0 %v5113_v2  ;;  %v5142_v7 = vld [vmem:[%s7567_s25 + $0x88] sm:$0xff]  ;;  %v5148_v8 = vld [vmem:[%s7567_s25 + $0x80] sm:$0xff]  ;;  %v5154_v9 = vld [vmem:[%s7567_s25 + $0x78] sm:$0xff] }
  0x6f   :  { %224 = vmatprep.subr.mxu0 %v5118_v3  ;;  %v5160_v10 = vld [vmem:[%s7567_s25 + $0x70] sm:$0xff]  ;;  %v5166_v11 = vld [vmem:[%s7567_s25 + $0x68] sm:$0xff]  ;;  %v5172_v12 = vld [vmem:[%s7567_s25 + $0x60] sm:$0xff] }
  0x70   :  { %225 = vmatpush1.msra.mxu0 %v5124_v4  ;;  %v5178_v13 = vld [vmem:[%s7567_s25 + $0x58] sm:$0xff]  ;;  %v5184_v14 = vld [vmem:[%s7567_s25 + $0x50] sm:$0xff]  ;;  %v5189_v15 = vld [vmem:[%s7567_s25 + $0x48] sm:$0xff] }
  0x71   :  { %226 = vmatprep.subr.mxu0 %v5130_v5  ;;  %v346_v16 = vld [vmem:[%s7568_s8 + $0xf8] sm:$0xff]  ;;  %v345_v17 = vld [vmem:[%s7568_s8 + $0xf0] sm:$0xff]  ;;  %v344_v18 = vld [vmem:[%s7568_s8 + $0xe8] sm:$0xff] }
  0x72   :  { %227 = vmatpush1.msra.mxu0 %v5136_v6  ;;  %v5205_v19 = vld [vmem:[%s7567_s25 + $0x40] sm:$0xff]  ;;  %382 = vmatprep.subr.mxu1 %v346_v16  ;;  %v5214_v21 = vld [vmem:[%s7567_s25 + $0x38] sm:$0xff]  ;;  %v5223_v23 = vld [vmem:[%s7567_s25 + $0x30] sm:$0xff] }
  0x73   :  { %228 = vmatprep.subr.mxu0 %v5142_v7  ;;  %v343_v20 = vld [vmem:[%s7568_s8 + $0xe0] sm:$0xff]  ;;  %383 = vmatpush1.msra.mxu1 %v345_v17  ;;  %v342_v22 = vld [vmem:[%s7568_s8 + $0xd8] sm:$0xff]  ;;  %v341_v24 = vld [vmem:[%s7568_s8 + $0xd0] sm:$0xff] }
  0x74   :  { %229 = vmatpush1.msra.mxu0 %v5148_v8  ;;  %384 = vmatprep.subr.mxu1 %v344_v18  ;;  %v5232_v25 = vld [vmem:[%s7567_s25 + $0x28] sm:$0xff]  ;;  %v5241_v27 = vld [vmem:[%s7567_s25 + $0x20] sm:$0xff]  ;;  %v5250_v29 = vld [vmem:[%s7567_s25 + $0x18] sm:$0xff] }
  0x75   :  { %230 = vmatprep.subr.mxu0 %v5154_v9  ;;  %385 = vmatpush1.msra.mxu1 %v343_v20  ;;  %v340_v26 = vld [vmem:[%s7568_s8 + $0xc8] sm:$0xff]  ;;  %v339_v28 = vld [vmem:[%s7568_s8 + $0xc0] sm:$0xff]  ;;  %v338_v30 = vld [vmem:[%s7568_s8 + $0xb8] sm:$0xff] }
  0x76   :  { %231 = vmatpush1.msra.mxu0 %v5160_v10  ;;  %386 = vmatprep.subr.mxu1 %v342_v22  ;;  %v5259_v31 = vld [vmem:[%s7567_s25 + $0x10] sm:$0xff]  ;;  %v5268_v33 = vld [vmem:[%s7567_s25 + $0x8] sm:$0xff]  ;;  %v5277_v35 = vld [vmem:[%s7567_s25] sm:$0xff] }
  0x77   :  { %232 = vmatprep.subr.mxu0 %v5166_v11  ;;  %387 = vmatpush1.msra.mxu1 %v341_v24  ;;  %v337_v32 = vld [vmem:[%s7568_s8 + $0xb0] sm:$0xff]  ;;  %v336_v34 = vld [vmem:[%s7568_s8 + $0xa8] sm:$0xff]  ;;  %v335_v36 = vld [vmem:[%s7568_s8 + $0xa0] sm:$0xff] }
  0x78   :  { %233 = vmatpush1.msra.mxu0 %v5172_v12  ;;  %388 = vmatprep.subr.mxu1 %v340_v26  ;;  %v189_v37 = vld [vmem:[%s7569_s23] sm:$0xff]  ;;  %v334_v38 = vld [vmem:[%s7568_s8 + $0x98] sm:$0xff]  ;;  %v333_v39 = vld [vmem:[%s7568_s8 + $0x90] sm:$0xff] }
  0x79   :  { %234 = vmatprep.subr.mxu0 %v5178_v13  ;;  %389 = vmatpush1.msra.mxu1 %v339_v28  ;;  %v190_v40 = vld [vmem:[%s7569_s23 + $0x8] sm:$0xff]  ;;  %v331_v42 = vld [vmem:[%s7568_s8 + $0x80] sm:$0xff]  ;;  %v191_v43 = vld [vmem:[%s7569_s23 + $0x10] sm:$0xff] }
  0x7a   :  { %235 = vmatpush1.msra.mxu0 %v5184_v14  ;;  %390 = vmatprep.subr.mxu1 %v338_v30  ;;  %v332_v41 = vld [vmem:[%s7568_s8 + $0x88] sm:$0xff]  ;;  %v330_v44 = vld [vmem:[%s7568_s8 + $0x78] sm:$0xff]  ;;  %v329_v45 = vld [vmem:[%s7568_s8 + $0x70] sm:$0xff] }
  0x7b   :  { %236 = vmatprep.subr.mxu0 %v5189_v15  ;;  %391 = vmatpush1.msra.mxu1 %v337_v32  ;;  %v192_v46 = vld [vmem:[%s7569_s23 + $0x18] sm:$0xff]  ;;  %v328_v47 = vld [vmem:[%s7568_s8 + $0x68] sm:$0xff]  ;;  %v327_v48 = vld [vmem:[%s7568_s8 + $0x60] sm:$0xff] }
  0x7c   :  { %237 = vmatpush1.msra.mxu0 %v5205_v19  ;;  %392 = vmatprep.subr.mxu1 %v336_v34  ;;  %v193_v49 = vld [vmem:[%s7569_s23 + $0x20] sm:$0xff]  ;;  %v326_v50 = vld [vmem:[%s7568_s8 + $0x58] sm:$0xff]  ;;  %v325_v51 = vld [vmem:[%s7568_s8 + $0x50] sm:$0xff] }
  0x7d   :  { %238 = vmatprep.subr.mxu0 %v5214_v21  ;;  %393 = vmatpush1.msra.mxu1 %v335_v36  ;;  %v194_v52 = vld [vmem:[%s7569_s23 + $0x28] sm:$0xff]  ;;  %v323_v54 = vld [vmem:[%s7568_s8 + $0x40] sm:$0xff]  ;;  %v4160_v55 = vld [vmem:[%s7569_s23 + $0x30] sm:$0xff] }
  0x7e   :  { %239 = vmatpush1.msra.mxu0 %v5223_v23  ;;  %394 = vmatprep.subr.mxu1 %v334_v38  ;;  %v324_v53 = vld [vmem:[%s7568_s8 + $0x48] sm:$0xff]  ;;  %v322_v56 = vld [vmem:[%s7568_s8 + $0x38] sm:$0xff]  ;;  %v321_v58 = vld [vmem:[%s7568_s8 + $0x30] sm:$0xff] }
  0x7f   :  { %240 = vmatprep.subr.mxu0 %v5232_v25  ;;  %395 = vmatpush1.msra.mxu1 %v333_v39  ;;  %v4203_v57 = vld [vmem:[%s7568_s8 + $0x278] sm:$0xff]  ;;  %v4202_v59 = vld [vmem:[%s7568_s8 + $0x270] sm:$0xff]  ;;  %v320_v60 = vld [vmem:[%s7568_s8 + $0x28] sm:$0xff] }
  0x80   :  { %241 = vmatpush1.msra.mxu0 %v5241_v27  ;;  %396 = vmatprep.subr.mxu1 %v332_v41  ;;  %v4201_v61 = vld [vmem:[%s7568_s8 + $0x268] sm:$0xff]  ;;  %v4161_v62 = vld [vmem:[%s7569_s23 + $0x38] sm:$0xff]  ;;  %v319_v63 = vld [vmem:[%s7568_s8 + $0x20] sm:$0xff] }
  0x81   :  { %242 = vmatprep.subr.mxu0 %v5250_v29  ;;  %397 = vmatpush1.msra.mxu1 %v331_v42  ;;  %v4200_v16 = vld [vmem:[%s7568_s8 + $0x260] sm:$0xff]  ;;  %v318_v17 = vld [vmem:[%s7568_s8 + $0x18] sm:$0xff]  ;;  %v317_v20 = vld [vmem:[%s7568_s8 + $0x10] sm:$0xff] }
  0x82   :  { %243 = vmatpush1.msra.mxu0 %v5259_v31  ;;  %398 = vmatprep.subr.mxu1 %v330_v44  ;;  %v4199_v18 = vld [vmem:[%s7568_s8 + $0x258] sm:$0xff]  ;;  %v4198_v22 = vld [vmem:[%s7568_s8 + $0x250] sm:$0xff]  ;;  %v4162_v24 = vld [vmem:[%s7569_s23 + $0x40] sm:$0xff] }
  0x83   :  { %244 = vmatprep.subr.mxu0 %v5268_v33  ;;  %399 = vmatpush1.msra.mxu1 %v329_v45  ;;  %v316_v26 = vld [vmem:[%s7568_s8 + $0x8] sm:$0xff]  ;;  %v315_v30 = vld [vmem:[%s7568_s8] sm:$0xff]  ;;  %v362_v34 = vld [vmem:[%s7568_s8 + $0x178] sm:$0xff] }
  0x84   :  { %245 = vmatpush1.msra.mxu0 %v5277_v35  ;;  %400 = vmatprep.subr.mxu1 %v328_v47  ;;  %v4197_v28 = vld [vmem:[%s7568_s8 + $0x248] sm:$0xff]  ;;  %v4196_v32 = vld [vmem:[%s7568_s8 + $0x240] sm:$0xff]  ;;  %v4195_v36 = vld [vmem:[%s7568_s8 + $0x238] sm:$0xff] }
  0x85   :  { %4148 = vmatmul.mubr.msk.f32.vlgmr.msra.gmra.mxu0 %vm195_vm0, %v189_v37  ;;  %539 = vmatprep.subr.mxu0 %v5108_v1  ;;  %v4163_v37 = vld [vmem:[%s7569_s23 + $0x48] sm:$0xff]  ;;  %v361_v38 = vld [vmem:[%s7568_s8 + $0x170] sm:$0xff]  ;;  %v359_v42 = vld [vmem:[%s7568_s8 + $0x160] sm:$0xff] }
  0x86   :  { %540 = vmatpush1.msra.mxu0 %v5113_v2  ;;  %284 = vmatprep.mubr.f32.mxu0 %v7501_v0  ;;  %v4194_v39 = vld [vmem:[%s7568_s8 + $0x230] sm:$0xff]  ;;  %v4193_v41 = vld [vmem:[%s7568_s8 + $0x228] sm:$0xff]  ;;  %v358_v45 = vld [vmem:[%s7568_s8 + $0x158] sm:$0xff] }
  0x87   :  { %541 = vmatprep.subr.mxu0 %v5118_v3  ;;  %401 = vmatpush1.msra.mxu1 %v327_v48  ;;  %v4164_v44 = vld [vmem:[%s7569_s23 + $0x50] sm:$0xff] }
  0x88   :  { %542 = vmatpush1.msra.mxu0 %v5124_v4  ;;  %402 = vmatprep.subr.mxu1 %v326_v50  ;;  %v357_v47 = vld [vmem:[%s7568_s8 + $0x150] sm:$0xff]  ;;  %v4189_v50 = vld [vmem:[%s7568_s8 + $0x208] sm:$0xff] }
  0x89   :  { %4149 = vmatmul.mubr.msk.f32.gmra.mxu0 %vm195_vm0, %v190_v40  ;;  %543 = vmatprep.subr.mxu0 %v5130_v5  ;;  %v360_v40 = vld [vmem:[%s7568_s8 + $0x168] sm:$0xff]  ;;  %v4190_v48 = vld [vmem:[%s7568_s8 + $0x210] sm:$0xff] }
  0x8a   :  { %544 = vmatpush1.msra.mxu0 %v5136_v6  ;;  %290 = vmatprep.mubr.f32.mxu0 %v7501_v0 }
  0x8b   :  { %545 = vmatprep.subr.mxu0 %v5142_v7  ;;  %403 = vmatpush1.msra.mxu1 %v325_v51  ;;  %v4165_v51 = vld [vmem:[%s7569_s23 + $0x58] sm:$0xff] }
  0x8c   :  { %546 = vmatpush1.msra.mxu0 %v5148_v8  ;;  %404 = vmatprep.subr.mxu1 %v324_v53  ;;  %v4188_v53 = vld [vmem:[%s7568_s8 + $0x200] sm:$0xff] }
  0x8d   :  { %4150 = vmatmul.mubr.msk.f32.gmra.mxu0 %vm195_vm0, %v191_v43  ;;  %547 = vmatprep.subr.mxu0 %v5154_v9  ;;  %v4192_v43 = vld [vmem:[%s7568_s8 + $0x220] sm:$0xff] }
  0x8e   :  { %548 = vmatpush1.msra.mxu0 %v5160_v10  ;;  %296 = vmatprep.mubr.f32.mxu0 %v7501_v0 }
  0x8f   :  { %549 = vmatprep.subr.mxu0 %v5166_v11  ;;  %405 = vmatpush1.msra.mxu1 %v323_v54  ;;  %v354_v54 = vld [vmem:[%s7568_s8 + $0x138] sm:$0xff] }
  0x90   :  { %550 = vmatpush1.msra.mxu0 %v5172_v12  ;;  %406 = vmatprep.subr.mxu1 %v322_v56  ;;  %v353_v56 = vld [vmem:[%s7568_s8 + $0x130] sm:$0xff] }
  0x91   :  { %4151 = vmatmul.mubr.msk.f32.gmra.mxu0 %vm195_vm0, %v192_v46  ;;  %551 = vmatprep.subr.mxu0 %v5178_v13  ;;  %v4191_v46 = vld [vmem:[%s7568_s8 + $0x218] sm:$0xff] }
  0x92   :  { %552 = vmatpush1.msra.mxu0 %v5184_v14  ;;  %302 = vmatprep.mubr.f32.mxu0 %v7501_v0 }
  0x93   :  { %553 = vmatprep.subr.mxu0 %v5189_v15  ;;  %407 = vmatpush1.msra.mxu1 %v321_v58  ;;  %v352_v58 = vld [vmem:[%s7568_s8 + $0x128] sm:$0xff] }
  0x94   :  { %554 = vmatpush1.msra.mxu0 %v5205_v19  ;;  %408 = vmatprep.subr.mxu1 %v320_v60  ;;  %v351_v60 = vld [vmem:[%s7568_s8 + $0x120] sm:$0xff] }
  0x95   :  { %4152 = vmatmul.mubr.msk.f32.gmra.mxu0 %vm195_vm0, %v193_v49  ;;  %555 = vmatprep.subr.mxu0 %v5214_v21  ;;  %v356_v49 = vld [vmem:[%s7568_s8 + $0x148] sm:$0xff] }
  0x96   :  { %556 = vmatpush1.msra.mxu0 %v5223_v23  ;;  %308 = vmatprep.mubr.f32.mxu0 %v7501_v0 }
  0x97   :  { %557 = vmatprep.subr.mxu0 %v5232_v25  ;;  %409 = vmatpush1.msra.mxu1 %v319_v63  ;;  %v4183_v63 = vld [vmem:[%s7568_s8 + $0x1d8] sm:$0xff] }
  0x98   :  { %558 = vmatpush1.msra.mxu0 %v5241_v27  ;;  %410 = vmatprep.subr.mxu1 %v318_v17  ;;  %v4182_v17 = vld [vmem:[%s7568_s8 + $0x1d0] sm:$0xff] }
  0x99   :  { %4153 = vmatmul.mubr.msk.f32.gmra.mxu0 %vm195_vm0, %v194_v52  ;;  %559 = vmatprep.subr.mxu0 %v5250_v29  ;;  %v355_v52 = vld [vmem:[%s7568_s8 + $0x140] sm:$0xff] }
  0x9a   :  { %560 = vmatpush1.msra.mxu0 %v5259_v31  ;;  %595 = vmatprep.mubr.f32.mxu0 %v7501_v0 }
  0x9b   :  { %561 = vmatprep.subr.mxu0 %v5268_v33  ;;  %411 = vmatpush1.msra.mxu1 %v317_v20  ;;  %v4181_v20 = vld [vmem:[%s7568_s8 + $0x1c8] sm:$0xff] }
  0x9c   :  { %562 = vmatpush1.msra.mxu0 %v5277_v35  ;;  %412 = vmatprep.subr.mxu1 %v316_v26  ;;  %v4179_v26 = vld [vmem:[%s7568_s8 + $0x1b8] sm:$0xff] }
  0x9d   :  { %4166 = vmatmul.mubr.msk.f32.vlgmr.msra.gmra.mxu0 %vm195_vm0, %v4160_v55  ;;  %699 = vmatprep.subr.mxu0 %v4203_v57  ;;  %v4187_v55 = vld [vmem:[%s7568_s8 + $0x1f8] sm:$0xff]  ;;  %v4186_v57 = vld [vmem:[%s7568_s8 + $0x1f0] sm:$0xff] }
  0x9e   :  { %601 = vmatprep.mubr.f32.mxu0 %v7501_v0  ;;  %700 = vmatpush1.msra.mxu0 %v4202_v59  ;;  %v4185_v59 = vld [vmem:[%s7568_s8 + $0x1e8] sm:$0xff] }
  0x9f   :  { %701 = vmatprep.subr.mxu0 %v4201_v61  ;;  %413 = vmatpush1.msra.mxu1 %v315_v30  ;;  %v4184_v61 = vld [vmem:[%s7568_s8 + $0x1e0] sm:$0xff]  ;;  %v4177_v30 = vld [vmem:[%s7568_s8 + $0x1a8] sm:$0xff] }
  0xa0   :  { %702 = vmatpush1.msra.mxu0 %v4200_v16  ;;  %430 = vmatprep.subr.mxu1 %v362_v34  ;;  %v349_v16 = vld [vmem:[%s7568_s8 + $0x110] sm:$0xff]  ;;  %v4175_v34 = vld [vmem:[%s7568_s8 + $0x198] sm:$0xff] }
  0xa1   :  { %4167 = vmatmul.mubr.msk.f32.gmra.mxu0 %vm195_vm0, %v4161_v62  ;;  %703 = vmatprep.subr.mxu0 %v4199_v18  ;;  %v350_v62 = vld [vmem:[%s7568_s8 + $0x118] sm:$0xff]  ;;  %v348_v18 = vld [vmem:[%s7568_s8 + $0x108] sm:$0xff] }
  0xa2   :  { %607 = vmatprep.mubr.f32.mxu0 %v7501_v0  ;;  %704 = vmatpush1.msra.mxu0 %v4198_v22  ;;  %v347_v22 = vld [vmem:[%s7568_s8 + $0x100] sm:$0xff] }
  0xa3   :  { %705 = vmatprep.subr.mxu0 %v4197_v28  ;;  %431 = vmatpush2.msra.mxu1 %v361_v38  ;;  %v4178_v28 = vld [vmem:[%s7568_s8 + $0x1b0] sm:$0xff]  ;;  %v4219_v38 = vld [vmem:[%s7568_s8 + $0x2f8] sm:$0xff] }
  0xa4   :  { %706 = vmatpush1.msra.mxu0 %v4196_v32  ;;  %432 = vmatprep.subr.mxu1 %v360_v40  ;;  %v4176_v32 = vld [vmem:[%s7568_s8 + $0x1a0] sm:$0xff]  ;;  %v4217_v40 = vld [vmem:[%s7568_s8 + $0x2e8] sm:$0xff] }
  0xa5   :  { %4168 = vmatmul.mubr.msk.f32.gmra.mxu0 %vm195_vm0, %v4162_v24  ;;  %707 = vmatprep.subr.mxu0 %v4195_v36  ;;  %v4180_v24 = vld [vmem:[%s7568_s8 + $0x1c0] sm:$0xff]  ;;  %v4173_v36 = vld [vmem:[%s7568_s8 + $0x188] sm:$0xff] }
  0xa6   :  { %613 = vmatprep.mubr.f32.mxu0 %v7501_v0  ;;  %708 = vmatpush1.msra.mxu0 %v4194_v39  ;;  %v4218_v39 = vld [vmem:[%s7568_s8 + $0x2f0] sm:$0xff] }
  0xa7   :  { %709 = vmatprep.subr.mxu0 %v4193_v41  ;;  %433 = vmatpush2.msra.mxu1 %v359_v42  ;;  %v4216_v41 = vld [vmem:[%s7568_s8 + $0x2e0] sm:$0xff]  ;;  %v4215_v42 = vld [vmem:[%s7568_s8 + $0x2d8] sm:$0xff] }
  0xa8   :  { %710 = vmatpush1.msra.mxu0 %v4192_v43  ;;  %434 = vmatprep.subr.mxu1 %v358_v45  ;;  %v4214_v43 = vld [vmem:[%s7568_s8 + $0x2d0] sm:$0xff]  ;;  %v4212_v45 = vld [vmem:[%s7568_s8 + $0x2c0] sm:$0xff] }
  0xa9   :  { %4169 = vmatmul.mubr.msk.f32.gmra.mxu0 %vm195_vm0, %v4163_v37  ;;  %711 = vmatprep.subr.mxu0 %v4191_v46  ;;  %v4172_v37 = vld [vmem:[%s7568_s8 + $0x180] sm:$0xff]  ;;  %v4211_v46 = vld [vmem:[%s7568_s8 + $0x2b8] sm:$0xff] }
  0xaa   :  { %619 = vmatprep.mubr.f32.mxu0 %v7501_v0  ;;  %435 = vmatpush2.msra.mxu1 %v357_v47  ;;  %v4210_v47 = vld [vmem:[%s7568_s8 + $0x2b0] sm:$0xff] }
  0xab   :  { %712 = vmatpush1.msra.mxu0 %v4190_v48  ;;  %436 = vmatprep.subr.mxu1 %v356_v49  ;;  %v4209_v48 = vld [vmem:[%s7568_s8 + $0x2a8] sm:$0xff]  ;;  %v4208_v49 = vld [vmem:[%s7568_s8 + $0x2a0] sm:$0xff] }
  0xac   :  { %713 = vmatprep.subr.mxu0 %v4189_v50  ;;  %437 = vmatpush2.msra.mxu1 %v355_v52  ;;  %v4207_v50 = vld [vmem:[%s7568_s8 + $0x298] sm:$0xff]  ;;  %v4205_v52 = vld [vmem:[%s7568_s8 + $0x288] sm:$0xff] }
  0xad   :  { %4170 = vmatmul.mubr.msk.f32.gmra.mxu0 %vm195_vm0, %v4164_v44  ;;  %438 = vmatprep.subr.mxu1 %v354_v54  ;;  %v4213_v44 = vld [vmem:[%s7568_s8 + $0x2c8] sm:$0xff] }
  0xae   :  { %625 = vmatprep.mubr.f32.mxu0 %v7501_v0  ;;  %714 = vmatpush1.msra.mxu0 %v4188_v53  ;;  %v4204_v53 = vld [vmem:[%s7568_s8 + $0x280] sm:$0xff] }
  0xaf   :  { %715 = vmatprep.subr.mxu0 %v4187_v55  ;;  %439 = vmatpush2.msra.mxu1 %v353_v56 }
  0xb0   :  { %716 = vmatpush1.msra.mxu0 %v4186_v57  ;;  %440 = vmatprep.subr.mxu1 %v352_v58 }
  0xb1   :  { %4171 = vmatmul.mubr.msk.f32.gmra.mxu0 %vm195_vm0, %v4165_v51  ;;  %717 = vmatprep.subr.mxu0 %v4185_v59  ;;  %v4206_v51 = vld [vmem:[%s7568_s8 + $0x290] sm:$0xff] }
  0xb2   :  { %441 = vmatpush2.msra.mxu1 %v351_v60  ;;  %718 = vmatpush1.msra.mxu0 %v4184_v61  ;;  %v4261_v61 = vld [vmem:[%s7568_s8 + $0x3b8] sm:$0xff] }
  0xb3   :  { %442 = vmatprep.subr.mxu1 %v350_v62  ;;  %719 = vmatprep.subr.mxu0 %v4183_v63  ;;  %v4229_v62 = vld [vmem:[%s7569_s23 + $0x78] sm:$0xff] }
  0xb4   :  { %443 = vmatpush2.msra.mxu1 %v349_v16  ;;  %720 = vmatpush1.msra.mxu0 %v4182_v17  ;;  %v4260_v16 = vld [vmem:[%s7568_s8 + $0x3b0] sm:$0xff]  ;;  %v4259_v17 = vld [vmem:[%s7568_s8 + $0x3a8] sm:$0xff] }
  0xb5   :  { %444 = vmatprep.subr.mxu1 %v348_v18  ;;  %721 = vmatprep.subr.mxu0 %v4181_v20  ;;  %v4258_v20 = vld [vmem:[%s7568_s8 + $0x3a0] sm:$0xff] }
  0xb6   :  { %445 = vmatpush2.msra.mxu1 %v347_v22  ;;  %722 = vmatpush1.msra.mxu0 %v4180_v24  ;;  %v4230_v22 = vld [vmem:[%s7569_s23 + $0x80] sm:$0xff] }
  0xb7   :  { %723 = vmatprep.subr.mxu0 %v4179_v26  ;;  %845 = vmatprep.subr.mxu1 %v5108_v1  ;;  %v4174_v1 = vld [vmem:[%s7568_s8 + $0x190] sm:$0xff]  ;;  %v4257_v26 = vld [vmem:[%s7568_s8 + $0x398] sm:$0xff] }
  0xb8   :  { %724 = vmatpush1.msra.mxu0 %v4178_v28  ;;  %v4256_v28 = vld [vmem:[%s7568_s8 + $0x390] sm:$0xff] }
  0xb9   :  { %725 = vmatprep.subr.mxu0 %v4177_v30 }
  0xba   :  { %726 = vmatpush1.msra.mxu0 %v4176_v32  ;;  %v4255_v32 = vld [vmem:[%s7568_s8 + $0x388] sm:$0xff] }
  0xbb   :  { %727 = vmatprep.subr.mxu0 %v4175_v34  ;;  %v4231_v34 = vld [vmem:[%s7569_s23 + $0x88] sm:$0xff] }
  0xbc   :  { %728 = vmatpush1.msra.mxu0 %v4174_v1 }
  0xbd   :  { %729 = vmatprep.subr.mxu0 %v4173_v36  ;;  %v4254_v36 = vld [vmem:[%s7568_s8 + $0x380] sm:$0xff] }
  0xbe   :  { %730 = vmatpush1.msra.mxu0 %v4172_v37  ;;  %v4253_v37 = vld [vmem:[%s7568_s8 + $0x378] sm:$0xff] }
  0xbf   :  { %747 = vmatprep.subr.mxu0 %v4219_v38  ;;  %v4252_v38 = vld [vmem:[%s7568_s8 + $0x370] sm:$0xff] }
  0xc0   :  { %748 = vmatpush2.msra.mxu0 %v4218_v39  ;;  %v4251_v39 = vld [vmem:[%s7568_s8 + $0x368] sm:$0xff] }
  0xc1   :  { %749 = vmatprep.subr.mxu0 %v4217_v40  ;;  %v4250_v40 = vld [vmem:[%s7568_s8 + $0x360] sm:$0xff] }
  0xc2   :  { %750 = vmatpush2.msra.mxu0 %v4216_v41  ;;  %v4249_v41 = vld [vmem:[%s7568_s8 + $0x358] sm:$0xff] }
  0xc3   :  { %751 = vmatprep.subr.mxu0 %v4215_v42  ;;  %v4248_v42 = vld [vmem:[%s7568_s8 + $0x350] sm:$0xff] }
  0xc4   :  { %752 = vmatpush2.msra.mxu0 %v4214_v43  ;;  %v4247_v43 = vld [vmem:[%s7568_s8 + $0x348] sm:$0xff] }
  0xc5   :  { %753 = vmatprep.subr.mxu0 %v4213_v44  ;;  %v4246_v44 = vld [vmem:[%s7568_s8 + $0x340] sm:$0xff] }
  0xc6   :  { %754 = vmatpush2.msra.mxu0 %v4212_v45  ;;  %v4245_v45 = vld [vmem:[%s7568_s8 + $0x338] sm:$0xff] }
  0xc7   :  { %755 = vmatprep.subr.mxu0 %v4211_v46  ;;  %v4244_v46 = vld [vmem:[%s7568_s8 + $0x330] sm:$0xff] }
  0xc8   :  { %756 = vmatpush2.msra.mxu0 %v4210_v47  ;;  %v4243_v47 = vld [vmem:[%s7568_s8 + $0x328] sm:$0xff] }
  0xc9   :  { %757 = vmatprep.subr.mxu0 %v4209_v48  ;;  %v4242_v48 = vld [vmem:[%s7568_s8 + $0x320] sm:$0xff] }
  0xca   :  { %758 = vmatpush2.msra.mxu0 %v4208_v49  ;;  %v4241_v49 = vld [vmem:[%s7568_s8 + $0x318] sm:$0xff] }
  0xcb   :  { %759 = vmatprep.subr.mxu0 %v4207_v50  ;;  %v4240_v50 = vld [vmem:[%s7568_s8 + $0x310] sm:$0xff] }
  0xcc   :  { %760 = vmatpush2.msra.mxu0 %v4206_v51  ;;  %v4239_v51 = vld [vmem:[%s7568_s8 + $0x308] sm:$0xff] }
  0xcd   :  { %761 = vmatprep.subr.mxu0 %v4205_v52  ;;  %v4238_v52 = vld [vmem:[%s7568_s8 + $0x300] sm:$0xff] }
  0xce   :  { %762 = vmatpush2.msra.mxu0 %v4204_v53  ;;  %v4285_v53 = vld [vmem:[%s7568_s8 + $0x478] sm:$0xff] }
 0x145   :  { %v280_v54 = vpop.f32.mrf.mxu0 }
 0x147   :  { %v282_v55 = vpop.f32.mrf.mxu0 }
 0x148   :  { %4154 = vmatprep.mubr.msk.f32.mxu1 %vm363_vm1, %v282_v55  ;;  %v4283_v55 = vld [vmem:[%s7568_s8 + $0x468] sm:$0xff] }
 0x149   :  { %v286_v56 = vpop.f32.mrf.mxu0  ;;  %447 = vmatmul.mubr.f32.vlgmr.msra.gmra.mxu1 %v280_v54  ;;  %v4284_v54 = vld [vmem:[%s7568_s8 + $0x470] sm:$0xff] }
 0x14a   :  { %846 = vmatpush1.msra.mxu1 %v5113_v2 }
 0x14b   :  { %v288_v57 = vpop.f32.mrf.mxu0  ;;  %847 = vmatprep.subr.mxu1 %v5118_v3 }
 0x14c   :  { %4155 = vmatprep.mubr.msk.f32.mxu1 %vm363_vm1, %v288_v57  ;;  %848 = vmatpush1.msra.mxu1 %v5124_v4  ;;  %v4281_v57 = vld [vmem:[%s7568_s8 + $0x458] sm:$0xff] }
 0x14d   :  { %v292_v58 = vpop.f32.mrf.mxu0  ;;  %453 = vmatmul.mubr.f32.gmra.mxu1 %v286_v56  ;;  %849 = vmatprep.subr.mxu1 %v5130_v5  ;;  %v4282_v56 = vld [vmem:[%s7568_s8 + $0x460] sm:$0xff] }
 0x14e   :  { %850 = vmatpush1.msra.mxu1 %v5136_v6 }
 0x14f   :  { %v294_v59 = vpop.f32.mrf.mxu0  ;;  %851 = vmatprep.subr.mxu1 %v5142_v7 }
 0x150   :  { %4156 = vmatprep.mubr.msk.f32.mxu1 %vm363_vm1, %v294_v59  ;;  %852 = vmatpush1.msra.mxu1 %v5148_v8  ;;  %v4279_v59 = vld [vmem:[%s7568_s8 + $0x448] sm:$0xff] }
 0x151   :  { %v298_v2 = vpop.f32.mrf.mxu0  ;;  %459 = vmatmul.mubr.f32.gmra.mxu1 %v292_v58  ;;  %853 = vmatprep.subr.mxu1 %v5154_v9  ;;  %v4226_v9 = vld [vmem:[%s7569_s23 + $0x60] sm:$0xff]  ;;  %v4280_v58 = vld [vmem:[%s7568_s8 + $0x450] sm:$0xff] }
 0x152   :  { %854 = vmatpush1.msra.mxu1 %v5160_v10 }
 0x153   :  { %v300_v3 = vpop.f32.mrf.mxu0  ;;  %855 = vmatprep.subr.mxu1 %v5166_v11  ;;  %v4269_v11 = vld [vmem:[%s7568_s8 + $0x3f8] sm:$0xff] }
 0x154   :  { %4157 = vmatprep.mubr.msk.f32.mxu1 %vm363_vm1, %v300_v3  ;;  %856 = vmatpush1.msra.mxu1 %v5172_v12  ;;  %v4268_v12 = vld [vmem:[%s7568_s8 + $0x3f0] sm:$0xff]  ;;  %v4277_v3 = vld [vmem:[%s7568_s8 + $0x438] sm:$0xff] }
 0x155   :  { %v304_v4 = vpop.f32.mrf.mxu0  ;;  %465 = vmatmul.mubr.f32.gmra.mxu1 %v298_v2  ;;  %857 = vmatprep.subr.mxu1 %v5178_v13  ;;  %v4278_v2 = vld [vmem:[%s7568_s8 + $0x440] sm:$0xff] }
 0x156   :  { %858 = vmatpush1.msra.mxu1 %v5184_v14  ;;  %v4267_v14 = vld [vmem:[%s7568_s8 + $0x3e8] sm:$0xff] }
 0x157   :  { %v306_v5 = vpop.f32.mrf.mxu0  ;;  %859 = vmatprep.subr.mxu1 %v5189_v15  ;;  %v4227_v15 = vld [vmem:[%s7569_s23 + $0x68] sm:$0xff] }
 0x158   :  { %4158 = vmatprep.mubr.msk.f32.mxu1 %vm363_vm1, %v306_v5  ;;  %860 = vmatpush1.msra.mxu1 %v5205_v19  ;;  %v4275_v5 = vld [vmem:[%s7568_s8 + $0x428] sm:$0xff] }
 0x159   :  { %v310_v6 = vpop.f32.mrf.mxu0  ;;  %471 = vmatmul.mubr.f32.gmra.mxu1 %v304_v4  ;;  %861 = vmatprep.subr.mxu1 %v5214_v21  ;;  %v4266_v21 = vld [vmem:[%s7568_s8 + $0x3e0] sm:$0xff]  ;;  %v4276_v4 = vld [vmem:[%s7568_s8 + $0x430] sm:$0xff] }
 0x15a   :  { %862 = vmatpush1.msra.mxu1 %v5223_v23  ;;  %v4265_v23 = vld [vmem:[%s7568_s8 + $0x3d8] sm:$0xff] }
 0x15b   :  { %v312_v7 = vpop.f32.mrf.mxu0  ;;  %863 = vmatprep.subr.mxu1 %v5232_v25 }
 0x15c   :  { %4159 = vmatprep.mubr.msk.f32.mxu1 %vm363_vm1, %v312_v7  ;;  %864 = vmatpush1.msra.mxu1 %v5241_v27  ;;  %v4264_v27 = vld [vmem:[%s7568_s8 + $0x3d0] sm:$0xff]  ;;  %v4273_v7 = vld [vmem:[%s7568_s8 + $0x418] sm:$0xff] }
 0x15d   :  { %477 = vmatmul.mubr.f32.gmra.mxu1 %v310_v6  ;;  %v597_v8 = vpop.f32.mrf.mxu0  ;;  %865 = vmatprep.subr.mxu1 %v5250_v29  ;;  %v4228_v29 = vld [vmem:[%s7569_s23 + $0x70] sm:$0xff]  ;;  %v4274_v6 = vld [vmem:[%s7568_s8 + $0x420] sm:$0xff] }
 0x15e   :  { %866 = vmatpush1.msra.mxu1 %v5259_v31  ;;  %901 = vmatprep.mubr.f32.mxu1 %v7501_v0 }
 0x15f   :  { %v599_v10 = vpop.f32.mrf.mxu0  ;;  %867 = vmatprep.subr.mxu1 %v5268_v33  ;;  %v4263_v33 = vld [vmem:[%s7568_s8 + $0x3c8] sm:$0xff] }
 0x160   :  { %4220 = vmatprep.mubr.msk.f32.mxu0 %vm363_vm1, %v599_v10  ;;  %868 = vmatpush1.msra.mxu1 %v5277_v35  ;;  %v4262_v35 = vld [vmem:[%s7568_s8 + $0x3c0] sm:$0xff] }
 0x161   :  { %v603_v13 = vpop.f32.mrf.mxu0  ;;  %764 = vmatmul.mubr.f32.vlgmr.msra.gmra.mxu0 %v597_v8  ;;  %4232 = vmatmul.mubr.msk.f32.vlgmr.msra.gmra.mxu1 %vm195_vm0, %v4226_v9  ;;  %v4272_v8 = vld [vmem:[%s7568_s8 + $0x410] sm:$0xff]  ;;  %v4271_v9 = vld [vmem:[%s7568_s8 + $0x408] sm:$0xff]  ;;  %v4270_v10 = vld [vmem:[%s7568_s8 + $0x400] sm:$0xff] }
 0x162   :  { %907 = vmatprep.mubr.f32.mxu1 %v7501_v0  ;;  %1005 = vmatprep.subr.mxu1 %v4269_v11 }
 0x163   :  { %v605_v19 = vpop.f32.mrf.mxu0  ;;  %1006 = vmatpush1.msra.mxu1 %v4268_v12 }
 0x164   :  { %4221 = vmatprep.mubr.msk.f32.mxu0 %vm363_vm1, %v605_v19  ;;  %1007 = vmatprep.subr.mxu1 %v4267_v14 }
 0x165   :  { %v609_v25 = vpop.f32.mrf.mxu0  ;;  %770 = vmatmul.mubr.f32.gmra.mxu0 %v603_v13  ;;  %4233 = vmatmul.mubr.msk.f32.gmra.mxu1 %vm195_vm0, %v4227_v15 }
 0x166   :  { %913 = vmatprep.mubr.f32.mxu1 %v7501_v0  ;;  %1008 = vmatpush1.msra.mxu1 %v4266_v21 }
 0x167   :  { %v611_v31 = vpop.f32.mrf.mxu0  ;;  %1009 = vmatprep.subr.mxu1 %v4265_v23 }
 0x168   :  { %4222 = vmatprep.mubr.msk.f32.mxu0 %vm363_vm1, %v611_v31  ;;  %1010 = vmatpush1.msra.mxu1 %v4264_v27 }
 0x169   :  { %v615_v60 = vpop.f32.mrf.mxu0  ;;  %776 = vmatmul.mubr.f32.gmra.mxu0 %v609_v25  ;;  %4234 = vmatmul.mubr.msk.f32.gmra.mxu1 %vm195_vm0, %v4228_v29 }
 0x16a   :  { %919 = vmatprep.mubr.f32.mxu1 %v7501_v0  ;;  %1011 = vmatprep.subr.mxu1 %v4263_v33 }
 0x16b   :  { %v617_v63 = vpop.f32.mrf.mxu0  ;;  %1012 = vmatpush1.msra.mxu1 %v4262_v35 }
 0x16c   :  { %4223 = vmatprep.mubr.msk.f32.mxu0 %vm363_vm1, %v617_v63  ;;  %1013 = vmatprep.subr.mxu1 %v4261_v61 }
 0x16d   :  { %v621_v18 = vpop.f32.mrf.mxu0  ;;  %782 = vmatmul.mubr.f32.gmra.mxu0 %v615_v60  ;;  %4235 = vmatmul.mubr.msk.f32.gmra.mxu1 %vm195_vm0, %v4229_v62 }
 0x16e   :  { %925 = vmatprep.mubr.f32.mxu1 %v7501_v0  ;;  %1014 = vmatpush1.msra.mxu1 %v4260_v16 }
 0x16f   :  { %v623_v24 = vpop.f32.mrf.mxu0  ;;  %1015 = vmatprep.subr.mxu1 %v4259_v17 }
 0x170   :  { %4224 = vmatprep.mubr.msk.f32.mxu0 %vm363_vm1, %v623_v24  ;;  %1016 = vmatpush1.msra.mxu1 %v4258_v20 }
 0x171   :  { %v627_v30 = vpop.f32.mrf.mxu0  ;;  %788 = vmatmul.mubr.f32.gmra.mxu0 %v621_v18  ;;  %4236 = vmatmul.mubr.msk.f32.gmra.mxu1 %vm195_vm0, %v4230_v22 }
 0x172   :  { %931 = vmatprep.mubr.f32.mxu1 %v7501_v0  ;;  %1017 = vmatprep.subr.mxu1 %v4257_v26 }
 0x173   :  { %v629_v1 = vpop.f32.mrf.mxu0  ;;  %1018 = vmatpush1.msra.mxu1 %v4256_v28 }
 0x174   :  { %4225 = vmatprep.mubr.msk.f32.mxu0 %vm363_vm1, %v629_v1  ;;  %1019 = vmatprep.subr.mxu1 %v4255_v32 }
 0x175   :  { %794 = vmatmul.mubr.f32.gmra.mxu0 %v627_v30  ;;  %4237 = vmatmul.mubr.msk.f32.gmra.mxu1 %vm195_vm0, %v4231_v34 }
 0x176   :  { %1020 = vmatpush1.msra.mxu1 %v4254_v36  ;;  %1208 = vmatprep.mubr.f32.mxu0 %v7501_v0 }
 0x177   :  { %1021 = vmatprep.subr.mxu1 %v4253_v37 }
 0x178   :  { %1022 = vmatpush1.msra.mxu1 %v4252_v38 }
 0x179   :  { %1023 = vmatprep.subr.mxu1 %v4251_v39 }
 0x17a   :  { %1024 = vmatpush1.msra.mxu1 %v4250_v40  ;;  %v484_v40 = vlaneseq }
 0x17b   :  { %1025 = vmatprep.subr.mxu1 %v4249_v41 }
 0x17c   :  { %1026 = vmatpush1.msra.mxu1 %v4248_v42 }
 0x17d   :  { %1027 = vmatprep.subr.mxu1 %v4247_v43 }
 0x17e   :  { %1028 = vmatpush1.msra.mxu1 %v4246_v44  ;;  %v485_v44 = vshrl.u32 %v484_v40, 7 }
 0x17f   :  { %1029 = vmatprep.subr.mxu1 %v4245_v45 }
 0x180   :  { %1030 = vmatpush1.msra.mxu1 %v4244_v46 }
 0x181   :  { %1031 = vmatprep.subr.mxu1 %v4243_v47 }
 0x182   :  { %1032 = vmatpush1.msra.mxu1 %v4242_v48  ;;  %v5864_v48 = vsub.s32 0, %v485_v44 }
 0x183   :  { %1033 = vmatprep.subr.mxu1 %v4241_v49 }
 0x184   :  { %1034 = vmatpush1.msra.mxu1 %v4240_v50  ;;  %v188_v50 = vld [vmem:[#allocation2] sm:$0x3] }
 0x185   :  { %1035 = vmatprep.subr.mxu1 %v4239_v51  ;;  %v5866_v51 = vsub.s32 1, %v485_v44 }
 0x186   :  { %1036 = vmatpush1.msra.mxu1 %v4238_v52 }
 0x187   :  { %1053 = vmatprep.subr.mxu1 %v4285_v53 }
 0x188   :  { %1054 = vmatpush2.msra.mxu1 %v4284_v54  ;;  %v487_v54 = vrot.slane %v188_v50, %v5864_v48 }
 0x189   :  { %1055 = vmatprep.subr.mxu1 %v4283_v55 }
 0x18a   :  { %1056 = vmatpush2.msra.mxu1 %v4282_v56  ;;  %v491_v56 = vrot.slane %v188_v50, %v5866_v51  ;;  %v1256_v50 = vld [vmem:[%s7483_s5 + $0xe8] sm:$0xff] }
 0x18b   :  { %1057 = vmatprep.subr.mxu1 %v4281_v57 }
 0x18c   :  { %1058 = vmatpush2.msra.mxu1 %v4280_v58 }
 0x18d   :  { %1059 = vmatprep.subr.mxu1 %v4279_v59 }
 0x18e   :  { %1060 = vmatpush2.msra.mxu1 %v4278_v2 }
 0x18f   :  { %1061 = vmatprep.subr.mxu1 %v4277_v3 }
 0x190   :  { %1062 = vmatpush2.msra.mxu1 %v4276_v4 }
 0x191   :  { %1063 = vmatprep.subr.mxu1 %v4275_v5 }
 0x192   :  { %1064 = vmatpush2.msra.mxu1 %v4274_v6 }
 0x193   :  { %1065 = vmatprep.subr.mxu1 %v4273_v7 }
 0x194   :  { %1066 = vmatpush2.msra.mxu1 %v4272_v8 }
 0x195   :  { %1067 = vmatprep.subr.mxu1 %v4271_v9 }
 0x196   :  { %1068 = vmatpush2.msra.mxu1 %v4270_v10 }
 0x209   :  { %v5831_v11 = vpop.f32.mrf.mxu1 }
 0x20b   :  { %v5833_v12 = vpop.f32.mrf.mxu1 }
 0x20d   :  { %v5835_v13 = vpop.f32.mrf.mxu1 }
 0x20f   :  { %v5837_v14 = vpop.f32.mrf.mxu1 }
 0x211   :  { %v5839_v15 = vpop.f32.mrf.mxu1 }
 0x213   :  { %v5841_v19 = vpop.f32.mrf.mxu1 }
 0x215   :  { %v5843_v21 = vpop.f32.mrf.mxu1 }
 0x216   :  { %v500_v10 = vadd.f32 %v487_v54, %v5843_v21  ;;  %v496_v21 = vadd.f32 %v487_v54, %v5835_v13 }
 0x217   :  { %v5845_v23 = vpop.f32.mrf.mxu1 }
 0x218   :  { %v501_v7 = vadd.f32 %v491_v56, %v5845_v23 }
 0x219   :  { %v472_v25 = vpop.f32.mrf.mxu1 }
 0x21a   :  { %v502_v4 = vadd.f32 %v487_v54, %v472_v25 }
 0x21b   :  { %v474_v27 = vpop.f32.mrf.mxu1 }
 0x21c   :  { %v503_v2 = vadd.f32 %v491_v56, %v474_v27  ;;  %v498_v27 = vadd.f32 %v487_v54, %v5839_v15 }
 0x21d   :  { %v478_v29 = vpop.f32.mrf.mxu1 }
 0x21e   :  { %v504_v57 = vadd.f32 %v487_v54, %v478_v29 }
 0x21f   :  { %v480_v31 = vpop.f32.mrf.mxu1 }
 0x220   :  { %v505_v3 = vadd.f32 %v491_v56, %v480_v31 }
 0x221   :  { %v903_v33 = vpop.f32.mrf.mxu1  ;;  %v5854_v26 = vpop.f32.mrf.mxu0 }
 0x223   :  { %v905_v35 = vpop.f32.mrf.mxu1  ;;  %v5856_v28 = vpop.f32.mrf.mxu0 }
 0x224   :  { %4286 = vmatprep.mubr.msk.f32.mxu1 %vm363_vm1, %v905_v35 }
 0x225   :  { %v909_v60 = vpop.f32.mrf.mxu1  ;;  %1070 = vmatmul.mubr.f32.vlgmr.msra.gmra.mxu1 %v903_v33  ;;  %v771_v30 = vpop.f32.mrf.mxu0 }
 0x226   :  { %v802_v15 = vadd.f32 %v771_v30, %v496_v21  ;;  %v1239_v21 = vld [vmem:[%s7483_s5 + $0x60] sm:$0xff] }
 0x227   :  { %v911_v61 = vpop.f32.mrf.mxu1  ;;  %v773_v32 = vpop.f32.mrf.mxu0 }
 0x228   :  { %4287 = vmatprep.mubr.msk.f32.mxu1 %vm363_vm1, %v911_v61  ;;  %v499_v61 = vadd.f32 %v491_v56, %v5841_v19  ;;  %v495_v19 = vadd.f32 %v491_v56, %v5833_v12 }
 0x229   :  { %v915_v62 = vpop.f32.mrf.mxu1  ;;  %1076 = vmatmul.mubr.f32.gmra.mxu1 %v909_v60  ;;  %v777_v34 = vpop.f32.mrf.mxu0 }
 0x22a   :  { %v801_v12 = vadd.f32 %v5856_v28, %v495_v19  ;;  %v4322_v19 = vld [vmem:[%s7483_s5 + $0x2a8] sm:$0xff] }
 0x22b   :  { %v917_v63 = vpop.f32.mrf.mxu1  ;;  %v779_v1 = vpop.f32.mrf.mxu0 }
 0x22c   :  { %4288 = vmatprep.mubr.msk.f32.mxu1 %vm363_vm1, %v917_v63 }
 0x22d   :  { %v921_v16 = vpop.f32.mrf.mxu1  ;;  %1082 = vmatmul.mubr.f32.gmra.mxu1 %v915_v62  ;;  %v783_v36 = vpop.f32.mrf.mxu0 }
 0x22e   :  { %v806_v31 = vadd.f32 %v783_v36, %v500_v10  ;;  %v1246_v10 = vld [vmem:[%s7483_s5 + $0x98] sm:$0xff] }
 0x22f   :  { %v923_v17 = vpop.f32.mrf.mxu1  ;;  %v785_v38 = vpop.f32.mrf.mxu0 }
 0x230   :  { %4289 = vmatprep.mubr.msk.f32.mxu1 %vm363_vm1, %v923_v17  ;;  %v807_v62 = vadd.f32 %v785_v38, %v501_v7  ;;  %v805_v17 = vadd.f32 %v779_v1, %v499_v61  ;;  %v4297_v7 = vld [vmem:[%s7482_s4 + $0x28] sm:$0xff] }
 0x231   :  { %v927_v18 = vpop.f32.mrf.mxu1  ;;  %1088 = vmatmul.mubr.f32.gmra.mxu1 %v921_v16  ;;  %v789_v42 = vpop.f32.mrf.mxu0  ;;  %v497_v16 = vadd.f32 %v491_v56, %v5837_v14  ;;  %v494_v14 = vadd.f32 %v487_v54, %v5831_v11  ;;  %v1132_v54 = vld [vmem:[%s7482_s4 + $0x8] sm:$0xff]  ;;  %v1253_v56 = vld [vmem:[%s7483_s5 + $0xd0] sm:$0xff] }
 0x232   :  { %v808_v33 = vadd.f32 %v789_v42, %v502_v4  ;;  %v1249_v4 = vld [vmem:[%s7483_s5 + $0xb0] sm:$0xff]  ;;  %v1244_v61 = vld [vmem:[%s7483_s5 + $0x88] sm:$0xff] }
 0x233   :  { %v929_v20 = vpop.f32.mrf.mxu1  ;;  %v791_v46 = vpop.f32.mrf.mxu0  ;;  %v803_v38 = vadd.f32 %v773_v32, %v497_v16  ;;  %v4325_v16 = vld [vmem:[%s7483_s5 + $0x2c0] sm:$0xff] }
 0x234   :  { %4290 = vmatprep.mubr.msk.f32.mxu1 %vm363_vm1, %v929_v20  ;;  %v809_v8 = vadd.f32 %v791_v46, %v503_v2  ;;  %v804_v20 = vadd.f32 %v777_v34, %v498_v27  ;;  %v800_v34 = vadd.f32 %v5854_v26, %v494_v14  ;;  %v1131_v46 = vld [vmem:[%s7482_s4] sm:$0xff]  ;;  %v1133_v2 = vld [vmem:[%s7482_s4 + $0x10] sm:$0xff]  ;;  %v1242_v27 = vld [vmem:[%s7483_s5 + $0x78] sm:$0xff] }
 0x235   :  { %v933_v22 = vpop.f32.mrf.mxu1  ;;  %1094 = vmatmul.mubr.f32.gmra.mxu1 %v927_v18  ;;  %v795_v52 = vpop.f32.mrf.mxu0  ;;  %v1236_v14 = vld [vmem:[%s7483_s5 + $0x48] sm:$0xff] }
 0x236   :  { %v810_v5 = vadd.f32 %v795_v52, %v504_v57  ;;  %v4295_v52 = vld [vmem:[%s7482_s4 + $0x18] sm:$0xff]  ;;  %v1252_v57 = vld [vmem:[%s7483_s5 + $0xc8] sm:$0xff] }
 0x237   :  { %v935_v24 = vpop.f32.mrf.mxu1  ;;  %v797_v58 = vpop.f32.mrf.mxu0 }
 0x238   :  { %4291 = vmatprep.mubr.msk.f32.mxu1 %vm363_vm1, %v935_v24  ;;  %v811_v9 = vadd.f32 %v797_v58, %v505_v3  ;;  %v4296_v58 = vld [vmem:[%s7482_s4 + $0x20] sm:$0xff]  ;;  %v1250_v3 = vld [vmem:[%s7483_s5 + $0xb8] sm:$0xff] }
 0x239   :  { %1100 = vmatmul.mubr.f32.gmra.mxu1 %v933_v22 }
 0x23a   :  { %1468 = vmatprep.mubr.f32.mxu1 %v7501_v0 }
 0x2e5   :  { %v5858_v37 = vpop.f32.mrf.mxu1 }
 0x2e7   :  { %v5860_v39 = vpop.f32.mrf.mxu1 }
 0x2e8   :  { %v1107_v44 = vadd.f32 %v5860_v39, %v801_v12  ;;  %v4319_v12 = vld [vmem:[%s7483_s5 + $0x290] sm:$0xff] }
 0x2e9   :  { %v5862_v41 = vpop.f32.mrf.mxu1 }
 0x2ea   :  { %v1108_v11 = vadd.f32 %v5862_v41, %v802_v15  ;;  %v5919_v41 = vmax.f32 %v1107_v44, 0.0  ;;  %v4320_v15 = vld [vmem:[%s7483_s5 + $0x298] sm:$0xff]  ;;  %v4317_v44 = vld [vmem:[%s7483_s5 + $0x280] sm:$0xff] }
 0x2eb   :  { %v1079_v43 = vpop.f32.mrf.mxu1 }
 0x2ec   :  { %v1109_v13 = vadd.f32 %v1079_v43, %v803_v38  ;;  %v1106_v43 = vadd.f32 %v5858_v37, %v800_v34  ;;  %v5915_v39 = vmax.f32 %v1108_v11, 0.0  ;;  %v1237_v38 = vld [vmem:[%s7483_s5 + $0x50] sm:$0xff]  ;;  %v4318_v34 = vld [vmem:[%s7483_s5 + $0x288] sm:$0xff] }
 0x2ed   :  { %v1083_v45 = vpop.f32.mrf.mxu1  ;;  %v1233_v11 = vld [vmem:[%s7483_s5 + $0x30] sm:$0xff] }
 0x2ee   :  { %v1110_v1 = vadd.f32 %v1083_v45, %v804_v20  ;;  %v5911_v26 = vmax.f32 %v1109_v13, 0.0  ;;  %v5923_v37 = vmax.f32 %v1106_v43, 0.0  ;;  %v4323_v20 = vld [vmem:[%s7483_s5 + $0x2b0] sm:$0xff]  ;;  %v1234_v13 = vld [vmem:[%s7483_s5 + $0x38] sm:$0xff]  ;;  %v1232_v43 = vld [vmem:[%s7483_s5 + $0x28] sm:$0xff] }
 0x2ef   :  { %v1085_v47 = vpop.f32.mrf.mxu1 }
 0x2f0   :  { %v1111_v40 = vadd.f32 %v1085_v47, %v805_v17  ;;  %v5907_v45 = vmax.f32 %v1110_v1, 0.0  ;;  %v1258_v47 = vld [vmem:[%s7483_s5 + $0xf8] sm:$0xff]  ;;  %v1240_v17 = vld [vmem:[%s7483_s5 + $0x68] sm:$0xff]  ;;  %v1235_v1 = vld [vmem:[%s7483_s5 + $0x40] sm:$0xff] }
 0x2f1   :  { %v1089_v49 = vpop.f32.mrf.mxu1 }
 0x2f2   :  { %v1112_v22 = vadd.f32 %v1089_v49, %v806_v31  ;;  %v5902_v28 = vmax.f32 %v1111_v40, 0.0  ;;  %v1257_v49 = vld [vmem:[%s7483_s5 + $0xf0] sm:$0xff]  ;;  %v4326_v31 = vld [vmem:[%s7483_s5 + $0x2c8] sm:$0xff]  ;;  %v4321_v40 = vld [vmem:[%s7483_s5 + $0x2a0] sm:$0xff] }
 0x2f3   :  { %v1091_v53 = vpop.f32.mrf.mxu1 }
 0x2f4   :  { %v1113_v23 = vadd.f32 %v1091_v53, %v807_v62  ;;  %v5897_v30 = vmax.f32 %v1112_v22, 0.0  ;;  %v1255_v53 = vld [vmem:[%s7483_s5 + $0xe0] sm:$0xff]  ;;  %v4328_v62 = vld [vmem:[%s7483_s5 + $0x2d8] sm:$0xff] }
 0x2f5   :  { %v1095_v55 = vpop.f32.mrf.mxu1  ;;  %v1238_v22 = vld [vmem:[%s7483_s5 + $0x58] sm:$0xff] }
 0x2f6   :  { %v1114_v25 = vadd.f32 %v1095_v55, %v808_v33  ;;  %v5891_v32 = vmax.f32 %v1113_v23, 0.0  ;;  %v1254_v55 = vld [vmem:[%s7483_s5 + $0xd8] sm:$0xff]  ;;  %v4330_v33 = vld [vmem:[%s7483_s5 + $0x2e8] sm:$0xff] }
 0x2f7   :  { %v1097_v59 = vpop.f32.mrf.mxu1  ;;  %v4324_v23 = vld [vmem:[%s7483_s5 + $0x2b8] sm:$0xff] }
 0x2f8   :  { %v1115_v29 = vadd.f32 %v1097_v59, %v809_v8  ;;  %v5886_v36 = vmax.f32 %v1114_v25, 0.0  ;;  %v1251_v59 = vld [vmem:[%s7483_s5 + $0xc0] sm:$0xff]  ;;  %v1241_v25 = vld [vmem:[%s7483_s5 + $0x70] sm:$0xff] }
 0x2f9   :  { %v1101_v6 = vpop.f32.mrf.mxu1  ;;  %v1247_v8 = vld [vmem:[%s7483_s5 + $0xa0] sm:$0xff] }
 0x2fa   :  { %v1116_v35 = vadd.f32 %v1101_v6, %v810_v5  ;;  %v5881_v42 = vmax.f32 %v1115_v29, 0.0  ;;  %v4332_v5 = vld [vmem:[%s7483_s5 + $0x2f8] sm:$0xff]  ;;  %v1248_v6 = vld [vmem:[%s7483_s5 + $0xa8] sm:$0xff]  ;;  %v1243_v29 = vld [vmem:[%s7483_s5 + $0x80] sm:$0xff] }
 0x2fb   :  { %v1103_v60 = vpop.f32.mrf.mxu1 }
 0x2fc   :  { %v1117_v63 = vadd.f32 %v1103_v60, %v811_v9  ;;  %v5878_v24 = vmax.f32 %v1116_v35, 0.0  ;;  %v4331_v9 = vld [vmem:[%s7483_s5 + $0x2f0] sm:$0xff]  ;;  %v4329_v60 = vld [vmem:[%s7483_s5 + $0x2e0] sm:$0xff] }
 0x2fd   :  { %v1245_v35 = vld [vmem:[%s7483_s5 + $0x90] sm:$0xff] }
 0x2fe   :  { %v5875_v18 = vmax.f32 %v1117_v63, 0.0  ;;  %v4327_v63 = vld [vmem:[%s7483_s5 + $0x2d0] sm:$0xff] }
 0x300   :  { %1164 = vmatprep.subr.mxu0 %v5875_v18  ;;  %1424 = vmatprep.subr.mxu1 %v5875_v18 }
 0x301   :  { %1165 = vmatpush1.msra.mxu0 %v5878_v24  ;;  %1425 = vmatpush1.msra.mxu1 %v5878_v24 }
 0x302   :  { %1166 = vmatprep.subr.mxu0 %v5881_v42  ;;  %1426 = vmatprep.subr.mxu1 %v5881_v42 }
 0x303   :  { %1167 = vmatpush1.msra.mxu0 %v5886_v36  ;;  %1427 = vmatpush1.msra.mxu1 %v5886_v36 }
 0x304   :  { %1168 = vmatprep.subr.mxu0 %v5891_v32  ;;  %1428 = vmatprep.subr.mxu1 %v5891_v32 }
 0x305   :  { %1169 = vmatpush1.msra.mxu0 %v5897_v30  ;;  %1429 = vmatpush1.msra.mxu1 %v5897_v30 }
 0x306   :  { %1170 = vmatprep.subr.mxu0 %v5902_v28  ;;  %1430 = vmatprep.subr.mxu1 %v5902_v28 }
 0x307   :  { %1171 = vmatpush1.msra.mxu0 %v5907_v45  ;;  %1431 = vmatpush1.msra.mxu1 %v5907_v45 }
 0x308   :  { %1172 = vmatprep.subr.mxu0 %v5911_v26  ;;  %1432 = vmatprep.subr.mxu1 %v5911_v26 }
 0x309   :  { %1173 = vmatpush1.msra.mxu0 %v5915_v39  ;;  %1433 = vmatpush1.msra.mxu1 %v5915_v39 }
 0x30a   :  { %1174 = vmatprep.subr.mxu0 %v5919_v41  ;;  %1434 = vmatprep.subr.mxu1 %v5919_v41 }
 0x30b   :  { %1175 = vmatpush1.msra.mxu0 %v5923_v37  ;;  %1435 = vmatpush1.msra.mxu1 %v5923_v37 }
 0x30c   :  { %4292 = vmatmul.mubr.msk.f32.vlgmr.msra.gmra.mxu0 %vm1134_vm2, %v1131_v46  ;;  %1291 = vmatprep.subr.mxu0 %v1258_v47  ;;  %v4316_v46 = vld [vmem:[%s7483_s5 + $0x278] sm:$0xff]  ;;  %v1231_v47 = vld [vmem:[%s7483_s5 + $0x20] sm:$0xff] }
 0x30d   :  { %1292 = vmatpush1.msra.mxu0 %v1257_v49  ;;  %1214 = vmatprep.mubr.f32.mxu0 %v7501_v0  ;;  %v4315_v49 = vld [vmem:[%s7483_s5 + $0x270] sm:$0xff] }
 0x30e   :  { %1293 = vmatprep.subr.mxu0 %v1256_v50  ;;  %4298 = vmatmul.mubr.msk.f32.vlgmr.msra.gmra.mxu1 %vm1134_vm2, %v4295_v52  ;;  %v1230_v50 = vld [vmem:[%s7483_s5 + $0x18] sm:$0xff]  ;;  %v4314_v52 = vld [vmem:[%s7483_s5 + $0x268] sm:$0xff] }
 0x30f   :  { %1294 = vmatpush1.msra.mxu0 %v1255_v53  ;;  %1474 = vmatprep.mubr.f32.mxu1 %v7501_v0  ;;  %v1229_v53 = vld [vmem:[%s7483_s5 + $0x10] sm:$0xff] }
 0x310   :  { %4293 = vmatmul.mubr.msk.f32.gmra.mxu0 %vm1134_vm2, %v1132_v54  ;;  %1295 = vmatprep.subr.mxu0 %v1254_v55  ;;  %v4313_v54 = vld [vmem:[%s7483_s5 + $0x260] sm:$0xff]  ;;  %v1228_v55 = vld [vmem:[%s7483_s5 + $0x8] sm:$0xff] }
 0x311   :  { %1296 = vmatpush1.msra.mxu0 %v1253_v56  ;;  %1220 = vmatprep.mubr.f32.mxu0 %v7501_v0  ;;  %v4312_v56 = vld [vmem:[%s7483_s5 + $0x258] sm:$0xff] }
 0x312   :  { %1297 = vmatprep.subr.mxu0 %v1252_v57  ;;  %4299 = vmatmul.mubr.msk.f32.gmra.mxu1 %vm1134_vm2, %v4296_v58  ;;  %v1227_v57 = vld [vmem:[%s7483_s5] sm:$0xff]  ;;  %v4311_v58 = vld [vmem:[%s7483_s5 + $0x250] sm:$0xff] }
 0x313   :  { %1298 = vmatpush1.msra.mxu0 %v1251_v59  ;;  %1480 = vmatprep.mubr.f32.mxu1 %v7501_v0  ;;  %v1290_v59 = vld [vmem:[%s7483_s5 + $0x1f8] sm:$0xff] }
 0x314   :  { %4294 = vmatmul.mubr.msk.f32.gmra.mxu0 %vm1134_vm2, %v1133_v2  ;;  %1299 = vmatprep.subr.mxu0 %v1250_v3  ;;  %v4310_v2 = vld [vmem:[%s7483_s5 + $0x248] sm:$0xff]  ;;  %v1289_v3 = vld [vmem:[%s7483_s5 + $0x1f0] sm:$0xff] }
 0x315   :  { %1300 = vmatpush1.msra.mxu0 %v1249_v4  ;;  %1552 = vmatprep.subr.mxu1 %v4332_v5  ;;  %v4309_v4 = vld [vmem:[%s7483_s5 + $0x240] sm:$0xff]  ;;  %v1288_v5 = vld [vmem:[%s7483_s5 + $0x1e8] sm:$0xff] }
 0x316   :  { %1301 = vmatprep.subr.mxu0 %v1248_v6  ;;  %4300 = vmatmul.mubr.msk.f32.gmra.mxu1 %vm1134_vm2, %v4297_v7  ;;  %v4308_v6 = vld [vmem:[%s7483_s5 + $0x238] sm:$0xff]  ;;  %v1287_v7 = vld [vmem:[%s7483_s5 + $0x1e0] sm:$0xff] }
 0x317   :  { %1302 = vmatpush1.msra.mxu0 %v1247_v8  ;;  %1553 = vmatpush1.msra.mxu1 %v4331_v9  ;;  %v4307_v8 = vld [vmem:[%s7483_s5 + $0x230] sm:$0xff]  ;;  %v1286_v9 = vld [vmem:[%s7483_s5 + $0x1d8] sm:$0xff] }
 0x318   :  { %1303 = vmatprep.subr.mxu0 %v1246_v10  ;;  %1554 = vmatprep.subr.mxu1 %v4330_v33  ;;  %v4306_v10 = vld [vmem:[%s7483_s5 + $0x228] sm:$0xff]  ;;  %v1285_v33 = vld [vmem:[%s7483_s5 + $0x1d0] sm:$0xff] }
 0x319   :  { %1304 = vmatpush1.msra.mxu0 %v1245_v35  ;;  %1555 = vmatpush1.msra.mxu1 %v4329_v60  ;;  %v4305_v35 = vld [vmem:[%s7483_s5 + $0x220] sm:$0xff]  ;;  %v1284_v60 = vld [vmem:[%s7483_s5 + $0x1c8] sm:$0xff] }
 0x31a   :  { %1305 = vmatprep.subr.mxu0 %v1244_v61  ;;  %1556 = vmatprep.subr.mxu1 %v4328_v62  ;;  %v4304_v61 = vld [vmem:[%s7483_s5 + $0x218] sm:$0xff]  ;;  %v1283_v62 = vld [vmem:[%s7483_s5 + $0x1c0] sm:$0xff] }
 0x31b   :  { %1306 = vmatpush1.msra.mxu0 %v1243_v29  ;;  %1557 = vmatpush1.msra.mxu1 %v4327_v63  ;;  %v4303_v29 = vld [vmem:[%s7483_s5 + $0x210] sm:$0xff]  ;;  %v1282_v63 = vld [vmem:[%s7483_s5 + $0x1b8] sm:$0xff] }
 0x31c   :  { %1307 = vmatprep.subr.mxu0 %v1242_v27  ;;  %1558 = vmatprep.subr.mxu1 %v4326_v31  ;;  %v4302_v27 = vld [vmem:[%s7483_s5 + $0x208] sm:$0xff]  ;;  %v1281_v31 = vld [vmem:[%s7483_s5 + $0x1b0] sm:$0xff] }
 0x31d   :  { %1308 = vmatpush1.msra.mxu0 %v1241_v25  ;;  %1559 = vmatpush1.msra.mxu1 %v4325_v16  ;;  %v4301_v25 = vld [vmem:[%s7483_s5 + $0x200] sm:$0xff]  ;;  %v1280_v16 = vld [vmem:[%s7483_s5 + $0x1a8] sm:$0xff] }
 0x31e   :  { %1309 = vmatprep.subr.mxu0 %v1240_v17  ;;  %1560 = vmatprep.subr.mxu1 %v4324_v23  ;;  %v4364_v17 = vld [vmem:[%s7483_s5 + $0x3f8] sm:$0xff]  ;;  %v1279_v23 = vld [vmem:[%s7483_s5 + $0x1a0] sm:$0xff] }
 0x31f   :  { %1310 = vmatpush1.msra.mxu0 %v1239_v21  ;;  %1561 = vmatpush1.msra.mxu1 %v4323_v20  ;;  %v4363_v21 = vld [vmem:[%s7483_s5 + $0x3f0] sm:$0xff]  ;;  %v1278_v20 = vld [vmem:[%s7483_s5 + $0x198] sm:$0xff] }
 0x320   :  { %1311 = vmatprep.subr.mxu0 %v1238_v22  ;;  %1562 = vmatprep.subr.mxu1 %v4322_v19  ;;  %v4362_v22 = vld [vmem:[%s7483_s5 + $0x3e8] sm:$0xff]  ;;  %v1277_v19 = vld [vmem:[%s7483_s5 + $0x190] sm:$0xff] }
 0x321   :  { %1312 = vmatpush1.msra.mxu0 %v1237_v38  ;;  %1563 = vmatpush1.msra.mxu1 %v4321_v40  ;;  %v4361_v38 = vld [vmem:[%s7483_s5 + $0x3e0] sm:$0xff]  ;;  %v1276_v40 = vld [vmem:[%s7483_s5 + $0x188] sm:$0xff] }
 0x322   :  { %1313 = vmatprep.subr.mxu0 %v1236_v14  ;;  %1564 = vmatprep.subr.mxu1 %v4320_v15  ;;  %v4360_v14 = vld [vmem:[%s7483_s5 + $0x3d8] sm:$0xff]  ;;  %v1275_v15 = vld [vmem:[%s7483_s5 + $0x180] sm:$0xff] }
 0x323   :  { %1314 = vmatpush1.msra.mxu0 %v1235_v1  ;;  %1565 = vmatpush1.msra.mxu1 %v4319_v12  ;;  %v4359_v1 = vld [vmem:[%s7483_s5 + $0x3d0] sm:$0xff]  ;;  %v1274_v12 = vld [vmem:[%s7483_s5 + $0x178] sm:$0xff] }
 0x324   :  { %1315 = vmatprep.subr.mxu0 %v1234_v13  ;;  %1566 = vmatprep.subr.mxu1 %v4318_v34  ;;  %v4358_v13 = vld [vmem:[%s7483_s5 + $0x3c8] sm:$0xff]  ;;  %v1273_v34 = vld [vmem:[%s7483_s5 + $0x170] sm:$0xff] }
 0x325   :  { %1316 = vmatpush1.msra.mxu0 %v1233_v11  ;;  %1567 = vmatpush1.msra.mxu1 %v4317_v44  ;;  %v4357_v11 = vld [vmem:[%s7483_s5 + $0x3c0] sm:$0xff]  ;;  %v1272_v44 = vld [vmem:[%s7483_s5 + $0x168] sm:$0xff] }
 0x326   :  { %1317 = vmatprep.subr.mxu0 %v1232_v43  ;;  %1568 = vmatprep.subr.mxu1 %v4316_v46  ;;  %v4356_v43 = vld [vmem:[%s7483_s5 + $0x3b8] sm:$0xff]  ;;  %v1271_v46 = vld [vmem:[%s7483_s5 + $0x160] sm:$0xff] }
 0x327   :  { %1318 = vmatpush1.msra.mxu0 %v1231_v47  ;;  %1569 = vmatpush1.msra.mxu1 %v4315_v49  ;;  %v4355_v47 = vld [vmem:[%s7483_s5 + $0x3b0] sm:$0xff]  ;;  %v1270_v49 = vld [vmem:[%s7483_s5 + $0x158] sm:$0xff] }
 0x328   :  { %1319 = vmatprep.subr.mxu0 %v1230_v50  ;;  %1570 = vmatprep.subr.mxu1 %v4314_v52  ;;  %v4354_v50 = vld [vmem:[%s7483_s5 + $0x3a8] sm:$0xff]  ;;  %v1269_v52 = vld [vmem:[%s7483_s5 + $0x150] sm:$0xff] }
 0x329   :  { %1320 = vmatpush1.msra.mxu0 %v1229_v53  ;;  %1571 = vmatpush1.msra.mxu1 %v4313_v54  ;;  %v4353_v53 = vld [vmem:[%s7483_s5 + $0x3a0] sm:$0xff]  ;;  %v1268_v54 = vld [vmem:[%s7483_s5 + $0x148] sm:$0xff] }
 0x32a   :  { %1321 = vmatprep.subr.mxu0 %v1228_v55  ;;  %1572 = vmatprep.subr.mxu1 %v4312_v56  ;;  %v4352_v55 = vld [vmem:[%s7483_s5 + $0x398] sm:$0xff]  ;;  %v1267_v56 = vld [vmem:[%s7483_s5 + $0x140] sm:$0xff] }
 0x32b   :  { %1322 = vmatpush1.msra.mxu0 %v1227_v57  ;;  %1573 = vmatpush1.msra.mxu1 %v4311_v58  ;;  %v4351_v57 = vld [vmem:[%s7483_s5 + $0x390] sm:$0xff]  ;;  %v1266_v58 = vld [vmem:[%s7483_s5 + $0x138] sm:$0xff] }
 0x32c   :  { %1323 = vmatprep.subr.mxu0 %v1290_v59  ;;  %1574 = vmatprep.subr.mxu1 %v4310_v2  ;;  %v4350_v59 = vld [vmem:[%s7483_s5 + $0x388] sm:$0xff]  ;;  %v1265_v2 = vld [vmem:[%s7483_s5 + $0x130] sm:$0xff] }
 0x32d   :  { %1324 = vmatpush2.msra.mxu0 %v1289_v3  ;;  %1575 = vmatpush1.msra.mxu1 %v4309_v4  ;;  %v4349_v3 = vld [vmem:[%s7483_s5 + $0x380] sm:$0xff]  ;;  %v1264_v4 = vld [vmem:[%s7483_s5 + $0x128] sm:$0xff] }
 0x32e   :  { %1325 = vmatprep.subr.mxu0 %v1288_v5  ;;  %1576 = vmatprep.subr.mxu1 %v4308_v6  ;;  %v4348_v5 = vld [vmem:[%s7483_s5 + $0x378] sm:$0xff]  ;;  %v1263_v6 = vld [vmem:[%s7483_s5 + $0x120] sm:$0xff] }
 0x32f   :  { %1326 = vmatpush2.msra.mxu0 %v1287_v7  ;;  %1577 = vmatpush1.msra.mxu1 %v4307_v8  ;;  %v4347_v7 = vld [vmem:[%s7483_s5 + $0x370] sm:$0xff]  ;;  %v1262_v8 = vld [vmem:[%s7483_s5 + $0x118] sm:$0xff] }
 0x330   :  { %1327 = vmatprep.subr.mxu0 %v1286_v9  ;;  %1578 = vmatprep.subr.mxu1 %v4306_v10  ;;  %v4346_v9 = vld [vmem:[%s7483_s5 + $0x368] sm:$0xff]  ;;  %v1261_v10 = vld [vmem:[%s7483_s5 + $0x110] sm:$0xff] }
 0x331   :  { %1328 = vmatpush2.msra.mxu0 %v1285_v33  ;;  %1579 = vmatpush1.msra.mxu1 %v4305_v35  ;;  %v4345_v33 = vld [vmem:[%s7483_s5 + $0x360] sm:$0xff]  ;;  %v1260_v35 = vld [vmem:[%s7483_s5 + $0x108] sm:$0xff] }
 0x332   :  { %1329 = vmatprep.subr.mxu0 %v1284_v60  ;;  %1580 = vmatprep.subr.mxu1 %v4304_v61  ;;  %v4344_v60 = vld [vmem:[%s7483_s5 + $0x358] sm:$0xff]  ;;  %v1259_v61 = vld [vmem:[%s7483_s5 + $0x100] sm:$0xff] }
 0x333   :  { %1330 = vmatpush2.msra.mxu0 %v1283_v62  ;;  %1581 = vmatpush1.msra.mxu1 %v4303_v29  ;;  %v4343_v62 = vld [vmem:[%s7483_s5 + $0x350] sm:$0xff]  ;;  %v4342_v29 = vld [vmem:[%s7483_s5 + $0x348] sm:$0xff] }
 0x334   :  { %1331 = vmatprep.subr.mxu0 %v1282_v63  ;;  %1582 = vmatprep.subr.mxu1 %v4302_v27  ;;  %v4341_v63 = vld [vmem:[%s7483_s5 + $0x340] sm:$0xff]  ;;  %v4340_v27 = vld [vmem:[%s7483_s5 + $0x338] sm:$0xff] }
 0x335   :  { %1332 = vmatpush2.msra.mxu0 %v1281_v31  ;;  %1583 = vmatpush1.msra.mxu1 %v4301_v25  ;;  %v4339_v31 = vld [vmem:[%s7483_s5 + $0x330] sm:$0xff]  ;;  %v4338_v25 = vld [vmem:[%s7483_s5 + $0x328] sm:$0xff] }
 0x336   :  { %1333 = vmatprep.subr.mxu0 %v1280_v16  ;;  %1584 = vmatprep.subr.mxu1 %v4364_v17  ;;  %v4337_v16 = vld [vmem:[%s7483_s5 + $0x320] sm:$0xff]  ;;  %v4335_v17 = vld [vmem:[%s7483_s5 + $0x310] sm:$0xff] }
 0x337   :  { %1334 = vmatpush2.msra.mxu0 %v1279_v23  ;;  %1585 = vmatpush2.msra.mxu1 %v4363_v21  ;;  %v4334_v23 = vld [vmem:[%s7483_s5 + $0x308] sm:$0xff]  ;;  %v4333_v21 = vld [vmem:[%s7483_s5 + $0x300] sm:$0xff] }
 0x338   :  { %1335 = vmatprep.subr.mxu0 %v1278_v20  ;;  %1586 = vmatprep.subr.mxu1 %v4362_v22 }
 0x339   :  { %1336 = vmatpush2.msra.mxu0 %v1277_v19  ;;  %1587 = vmatpush2.msra.mxu1 %v4361_v38 }
 0x33a   :  { %1337 = vmatprep.subr.mxu0 %v1276_v40  ;;  %1588 = vmatprep.subr.mxu1 %v4360_v14 }
 0x33b   :  { %1338 = vmatpush2.msra.mxu0 %v1275_v15  ;;  %1589 = vmatpush2.msra.mxu1 %v4359_v1 }
 0x33c   :  { %1339 = vmatprep.subr.mxu0 %v1274_v12  ;;  %1590 = vmatprep.subr.mxu1 %v4358_v13 }
 0x33d   :  { %1340 = vmatpush2.msra.mxu0 %v1273_v34  ;;  %1591 = vmatpush2.msra.mxu1 %v4357_v11  ;;  %v4395_v34 = vld [vmem:[%s7483_s5 + $0x4c0] sm:$0xff] }
 0x33e   :  { %1341 = vmatprep.subr.mxu0 %v1272_v44  ;;  %1592 = vmatprep.subr.mxu1 %v4356_v43  ;;  %v4367_v11 = vld [vmem:[%s7482_s4 + $0x40] sm:$0xff]  ;;  %v4394_v44 = vld [vmem:[%s7483_s5 + $0x4b8] sm:$0xff]  ;;  %v4393_v43 = vld [vmem:[%s7483_s5 + $0x4b0] sm:$0xff] }
 0x33f   :  { %1342 = vmatpush2.msra.mxu0 %v1271_v46  ;;  %1593 = vmatpush2.msra.mxu1 %v4355_v47  ;;  %v4392_v46 = vld [vmem:[%s7483_s5 + $0x4a8] sm:$0xff]  ;;  %v4391_v47 = vld [vmem:[%s7483_s5 + $0x4a0] sm:$0xff] }
 0x340   :  { %1343 = vmatprep.subr.mxu0 %v1270_v49  ;;  %1594 = vmatprep.subr.mxu1 %v4354_v50  ;;  %v4390_v49 = vld [vmem:[%s7483_s5 + $0x498] sm:$0xff]  ;;  %v4389_v50 = vld [vmem:[%s7483_s5 + $0x490] sm:$0xff] }
 0x341   :  { %1344 = vmatpush2.msra.mxu0 %v1269_v52  ;;  %1595 = vmatpush2.msra.mxu1 %v4353_v53  ;;  %v4388_v52 = vld [vmem:[%s7483_s5 + $0x488] sm:$0xff]  ;;  %v4387_v53 = vld [vmem:[%s7483_s5 + $0x480] sm:$0xff] }
 0x342   :  { %1345 = vmatprep.subr.mxu0 %v1268_v54  ;;  %1596 = vmatprep.subr.mxu1 %v4352_v55  ;;  %v4386_v54 = vld [vmem:[%s7483_s5 + $0x478] sm:$0xff]  ;;  %v4385_v55 = vld [vmem:[%s7483_s5 + $0x470] sm:$0xff] }
 0x343   :  { %1346 = vmatpush2.msra.mxu0 %v1267_v56  ;;  %1597 = vmatpush2.msra.mxu1 %v4351_v57  ;;  %v4384_v56 = vld [vmem:[%s7483_s5 + $0x468] sm:$0xff]  ;;  %v4383_v57 = vld [vmem:[%s7483_s5 + $0x460] sm:$0xff] }
 0x344   :  { %1347 = vmatprep.subr.mxu0 %v1266_v58  ;;  %1598 = vmatprep.subr.mxu1 %v4350_v59  ;;  %v4382_v58 = vld [vmem:[%s7483_s5 + $0x458] sm:$0xff]  ;;  %v4381_v59 = vld [vmem:[%s7483_s5 + $0x450] sm:$0xff] }
 0x345   :  { %1348 = vmatpush2.msra.mxu0 %v1265_v2  ;;  %1599 = vmatpush2.msra.mxu1 %v4349_v3  ;;  %v4380_v2 = vld [vmem:[%s7483_s5 + $0x448] sm:$0xff]  ;;  %v4379_v3 = vld [vmem:[%s7483_s5 + $0x440] sm:$0xff] }
 0x346   :  { %1349 = vmatprep.subr.mxu0 %v1264_v4  ;;  %1600 = vmatprep.subr.mxu1 %v4348_v5  ;;  %v4378_v4 = vld [vmem:[%s7483_s5 + $0x438] sm:$0xff]  ;;  %v4377_v5 = vld [vmem:[%s7483_s5 + $0x430] sm:$0xff] }
 0x347   :  { %1350 = vmatpush2.msra.mxu0 %v1263_v6  ;;  %1601 = vmatpush2.msra.mxu1 %v4347_v7  ;;  %v4376_v6 = vld [vmem:[%s7483_s5 + $0x428] sm:$0xff]  ;;  %v4375_v7 = vld [vmem:[%s7483_s5 + $0x420] sm:$0xff] }
 0x348   :  { %1351 = vmatprep.subr.mxu0 %v1262_v8  ;;  %1602 = vmatprep.subr.mxu1 %v4346_v9  ;;  %v4374_v8 = vld [vmem:[%s7483_s5 + $0x418] sm:$0xff]  ;;  %v4373_v9 = vld [vmem:[%s7483_s5 + $0x410] sm:$0xff] }
 0x349   :  { %1352 = vmatpush2.msra.mxu0 %v1261_v10  ;;  %1603 = vmatpush2.msra.mxu1 %v4345_v33  ;;  %v4372_v10 = vld [vmem:[%s7483_s5 + $0x408] sm:$0xff]  ;;  %v4371_v33 = vld [vmem:[%s7483_s5 + $0x400] sm:$0xff] }
 0x34a   :  { %1353 = vmatprep.subr.mxu0 %v1260_v35  ;;  %1604 = vmatprep.subr.mxu1 %v4344_v60  ;;  %v4434_v35 = vld [vmem:[%s7483_s5 + $0x5f8] sm:$0xff]  ;;  %v4433_v60 = vld [vmem:[%s7483_s5 + $0x5f0] sm:$0xff] }
 0x34b   :  { %1354 = vmatpush2.msra.mxu0 %v1259_v61  ;;  %1605 = vmatpush2.msra.mxu1 %v4343_v62  ;;  %v4432_v61 = vld [vmem:[%s7483_s5 + $0x5e8] sm:$0xff]  ;;  %v4431_v62 = vld [vmem:[%s7483_s5 + $0x5e0] sm:$0xff] }
 0x34c   :  { %1674 = vmatprep.subr.mxu0 %v5875_v18  ;;  %1606 = vmatprep.subr.mxu1 %v4342_v29  ;;  %v4336_v18 = vld [vmem:[%s7483_s5 + $0x318] sm:$0xff] }
 0x34d   :  { %1607 = vmatpush2.msra.mxu1 %v4341_v63  ;;  %v4430_v29 = vld [vmem:[%s7483_s5 + $0x5d8] sm:$0xff]  ;;  %v4429_v63 = vld [vmem:[%s7483_s5 + $0x5d0] sm:$0xff] }
 0x34e   :  { %1608 = vmatprep.subr.mxu1 %v4340_v27  ;;  %v4428_v27 = vld [vmem:[%s7483_s5 + $0x5c8] sm:$0xff] }
 0x34f   :  { %1609 = vmatpush2.msra.mxu1 %v4339_v31  ;;  %v4427_v31 = vld [vmem:[%s7483_s5 + $0x5c0] sm:$0xff] }
 0x350   :  { %1610 = vmatprep.subr.mxu1 %v4338_v25  ;;  %v4426_v25 = vld [vmem:[%s7483_s5 + $0x5b8] sm:$0xff] }
 0x351   :  { %1611 = vmatpush2.msra.mxu1 %v4337_v16  ;;  %v4425_v16 = vld [vmem:[%s7483_s5 + $0x5b0] sm:$0xff] }
 0x352   :  { %1612 = vmatprep.subr.mxu1 %v4336_v18  ;;  %v4424_v18 = vld [vmem:[%s7483_s5 + $0x5a8] sm:$0xff] }
 0x353   :  { %1613 = vmatpush2.msra.mxu1 %v4335_v17  ;;  %v4423_v17 = vld [vmem:[%s7483_s5 + $0x5a0] sm:$0xff] }
 0x354   :  { %1614 = vmatprep.subr.mxu1 %v4334_v23  ;;  %v4422_v23 = vld [vmem:[%s7483_s5 + $0x598] sm:$0xff] }
 0x355   :  { %1615 = vmatpush2.msra.mxu1 %v4333_v21  ;;  %v4421_v21 = vld [vmem:[%s7483_s5 + $0x590] sm:$0xff] }
 0x3cc   :  { %v1210_v20 = vpop.f32.mrf.mxu0 }
 0x3ce   :  { %v1212_v22 = vpop.f32.mrf.mxu0  ;;  %v1470_v19 = vpop.f32.mrf.mxu1 }
 0x3cf   :  { %1355 = vmatprep.mubr.f32.mxu0 %v1212_v22  ;;  %v4419_v22 = vld [vmem:[%s7483_s5 + $0x580] sm:$0xff] }
 0x3d0   :  { %v1216_v38 = vpop.f32.mrf.mxu0  ;;  %1356 = vmatmul.mubr.f32.vlgmr.msra.gmra.mxu0 %v1210_v20  ;;  %v1472_v40 = vpop.f32.mrf.mxu1  ;;  %v4420_v20 = vld [vmem:[%s7483_s5 + $0x588] sm:$0xff] }
 0x3d1   :  { %1675 = vmatpush1.msra.mxu0 %v5878_v24  ;;  %1616 = vmatprep.mubr.f32.mxu1 %v1472_v40  ;;  %v4416_v40 = vld [vmem:[%s7483_s5 + $0x568] sm:$0xff] }
 0x3d2   :  { %1676 = vmatprep.subr.mxu0 %v5881_v42  ;;  %v1218_v14 = vpop.f32.mrf.mxu0  ;;  %v1476_v15 = vpop.f32.mrf.mxu1  ;;  %1617 = vmatmul.mubr.f32.vlgmr.msra.gmra.mxu1 %v1470_v19  ;;  %v4418_v19 = vld [vmem:[%s7483_s5 + $0x578] sm:$0xff] }
 0x3d3   :  { %1677 = vmatpush1.msra.mxu0 %v5886_v36  ;;  %1361 = vmatprep.mubr.f32.mxu0 %v1218_v14  ;;  %v4365_v36 = vld [vmem:[%s7482_s4 + $0x30] sm:$0xff]  ;;  %v4415_v14 = vld [vmem:[%s7483_s5 + $0x560] sm:$0xff] }
 0x3d4   :  { %1678 = vmatprep.subr.mxu0 %v5891_v32  ;;  %v1222_v1 = vpop.f32.mrf.mxu0  ;;  %1362 = vmatmul.mubr.f32.gmra.mxu0 %v1216_v38  ;;  %v1478_v12 = vpop.f32.mrf.mxu1  ;;  %v4402_v32 = vld [vmem:[%s7483_s5 + $0x4f8] sm:$0xff]  ;;  %v4417_v38 = vld [vmem:[%s7483_s5 + $0x570] sm:$0xff] }
 0x3d5   :  { %1679 = vmatpush1.msra.mxu0 %v5897_v30  ;;  %1622 = vmatprep.mubr.f32.mxu1 %v1478_v12  ;;  %v4401_v30 = vld [vmem:[%s7483_s5 + $0x4f0] sm:$0xff]  ;;  %v4412_v12 = vld [vmem:[%s7483_s5 + $0x548] sm:$0xff] }
 0x3d6   :  { %1680 = vmatprep.subr.mxu0 %v5902_v28  ;;  %v1224_v24 = vpop.f32.mrf.mxu0  ;;  %v1482_v13 = vpop.f32.mrf.mxu1  ;;  %1623 = vmatmul.mubr.f32.gmra.mxu1 %v1476_v15  ;;  %v4400_v28 = vld [vmem:[%s7483_s5 + $0x4e8] sm:$0xff]  ;;  %v4414_v15 = vld [vmem:[%s7483_s5 + $0x558] sm:$0xff] }
 0x3d7   :  { %1681 = vmatpush1.msra.mxu0 %v5907_v45  ;;  %1367 = vmatprep.mubr.f32.mxu0 %v1224_v24  ;;  %v4399_v45 = vld [vmem:[%s7483_s5 + $0x4e0] sm:$0xff] }
 0x3d8   :  { %1682 = vmatprep.subr.mxu0 %v5911_v26  ;;  %1368 = vmatmul.mubr.f32.gmra.mxu0 %v1222_v1  ;;  %v1484_v42 = vpop.f32.mrf.mxu1  ;;  %v4366_v26 = vld [vmem:[%s7482_s4 + $0x38] sm:$0xff]  ;;  %v4413_v1 = vld [vmem:[%s7483_s5 + $0x550] sm:$0xff]  ;;  %v4411_v24 = vld [vmem:[%s7483_s5 + $0x540] sm:$0xff] }
 0x3d9   :  { %1683 = vmatpush1.msra.mxu0 %v5915_v39  ;;  %1628 = vmatprep.mubr.f32.mxu1 %v1484_v42  ;;  %v4398_v39 = vld [vmem:[%s7483_s5 + $0x4d8] sm:$0xff]  ;;  %v4409_v42 = vld [vmem:[%s7483_s5 + $0x530] sm:$0xff] }
 0x3da   :  { %1684 = vmatprep.subr.mxu0 %v5919_v41  ;;  %1629 = vmatmul.mubr.f32.gmra.mxu1 %v1482_v13  ;;  %v4397_v41 = vld [vmem:[%s7483_s5 + $0x4d0] sm:$0xff]  ;;  %v4410_v13 = vld [vmem:[%s7483_s5 + $0x538] sm:$0xff] }
 0x3db   :  { %1685 = vmatpush1.msra.mxu0 %v5923_v37  ;;  %1718 = vmatprep.mubr.f32.mxu0 %v7501_v0  ;;  %v4396_v37 = vld [vmem:[%s7483_s5 + $0x4c8] sm:$0xff] }
 0x3dc   :  { %4368 = vmatmul.mubr.msk.f32.vlgmr.msra.gmra.mxu0 %vm1134_vm2, %v4365_v36  ;;  %1802 = vmatprep.subr.mxu0 %v4402_v32  ;;  %v4408_v36 = vld [vmem:[%s7483_s5 + $0x528] sm:$0xff]  ;;  %v4407_v32 = vld [vmem:[%s7483_s5 + $0x520] sm:$0xff] }
 0x3dd   :  { %1724 = vmatprep.mubr.f32.mxu0 %v7501_v0  ;;  %1803 = vmatpush1.msra.mxu0 %v4401_v30  ;;  %v4406_v30 = vld [vmem:[%s7483_s5 + $0x518] sm:$0xff] }
 0x3de   :  { %1804 = vmatprep.subr.mxu0 %v4400_v28  ;;  %1971 = vmatprep.mubr.f32.mxu1 %v7501_v0  ;;  %v4405_v28 = vld [vmem:[%s7483_s5 + $0x510] sm:$0xff] }
 0x3df   :  { %1805 = vmatpush1.msra.mxu0 %v4399_v45  ;;  %v4404_v45 = vld [vmem:[%s7483_s5 + $0x508] sm:$0xff] }
 0x3e0   :  { %4369 = vmatmul.mubr.msk.f32.gmra.mxu0 %vm1134_vm2, %v4366_v26  ;;  %1806 = vmatprep.subr.mxu0 %v4398_v39  ;;  %v4403_v26 = vld [vmem:[%s7483_s5 + $0x500] sm:$0xff] }
 0x3e1   :  { %1730 = vmatprep.mubr.f32.mxu0 %v7501_v0  ;;  %1807 = vmatpush1.msra.mxu0 %v4397_v41 }
 0x3e2   :  { %1808 = vmatprep.subr.mxu0 %v4396_v37 }
 0x3e3   :  { %1809 = vmatpush1.msra.mxu0 %v4395_v34 }
 0x3e4   :  { %4370 = vmatmul.mubr.msk.f32.gmra.mxu0 %vm1134_vm2, %v4367_v11  ;;  %1810 = vmatprep.subr.mxu0 %v4394_v44 }
 0x3e5   :  { %1811 = vmatpush1.msra.mxu0 %v4393_v43 }
 0x3e6   :  { %1812 = vmatprep.subr.mxu0 %v4392_v46 }
 0x3e7   :  { %1813 = vmatpush1.msra.mxu0 %v4391_v47 }
 0x3e8   :  { %1814 = vmatprep.subr.mxu0 %v4390_v49 }
 0x3e9   :  { %1815 = vmatpush1.msra.mxu0 %v4389_v50 }
 0x3ea   :  { %1816 = vmatprep.subr.mxu0 %v4388_v52 }
 0x3eb   :  { %1817 = vmatpush1.msra.mxu0 %v4387_v53 }
 0x3ec   :  { %1818 = vmatprep.subr.mxu0 %v4386_v54 }
 0x3ed   :  { %1819 = vmatpush1.msra.mxu0 %v4385_v55 }
 0x3ee   :  { %1820 = vmatprep.subr.mxu0 %v4384_v56 }
 0x3ef   :  { %1821 = vmatpush1.msra.mxu0 %v4383_v57  ;;  %v1130_v57 = vld [vmem:[#allocation5] sm:$0x3] }
 0x3f0   :  { %1822 = vmatprep.subr.mxu0 %v4382_v58 }
 0x3f1   :  { %1823 = vmatpush1.msra.mxu0 %v4381_v59  ;;  %v1378_v59 = vrot.slane %v1130_v57, %v5864_v48 }
 0x3f2   :  { %1824 = vmatprep.subr.mxu0 %v4380_v2 }
 0x3f3   :  { %1825 = vmatpush1.msra.mxu0 %v4379_v3 }
 0x3f4   :  { %1826 = vmatprep.subr.mxu0 %v4378_v4  ;;  %v1382_v4 = vrot.slane %v1130_v57, %v5866_v51  ;;  %v2001_v57 = vld [vmem:[#allocation8 + $0x88] sm:$0xff] }
 0x3f5   :  { %1827 = vmatpush1.msra.mxu0 %v4377_v5 }
 0x3f6   :  { %1828 = vmatprep.subr.mxu0 %v4376_v6 }
 0x3f7   :  { %1829 = vmatpush1.msra.mxu0 %v4375_v7 }
 0x3f8   :  { %1830 = vmatprep.subr.mxu0 %v4374_v8 }
 0x3f9   :  { %1831 = vmatpush1.msra.mxu0 %v4373_v9 }
 0x3fa   :  { %1832 = vmatprep.subr.mxu0 %v4372_v10 }
 0x3fb   :  { %1833 = vmatpush1.msra.mxu0 %v4371_v33 }
 0x3fc   :  { %1834 = vmatprep.subr.mxu0 %v4434_v35 }
 0x3fd   :  { %1835 = vmatpush2.msra.mxu0 %v4433_v60 }
 0x3fe   :  { %1836 = vmatprep.subr.mxu0 %v4432_v61 }
 0x3ff   :  { %1837 = vmatpush2.msra.mxu0 %v4431_v62 }
 0x400   :  { %1838 = vmatprep.subr.mxu0 %v4430_v29 }
 0x401   :  { %1839 = vmatpush2.msra.mxu0 %v4429_v63 }
 0x402   :  { %1840 = vmatprep.subr.mxu0 %v4428_v27 }
 0x403   :  { %1841 = vmatpush2.msra.mxu0 %v4427_v31 }
 0x404   :  { %1842 = vmatprep.subr.mxu0 %v4426_v25 }
 0x405   :  { %1843 = vmatpush2.msra.mxu0 %v4425_v16 }
 0x406   :  { %1844 = vmatprep.subr.mxu0 %v4424_v18 }
 0x407   :  { %1845 = vmatpush2.msra.mxu0 %v4423_v17 }
 0x408   :  { %1846 = vmatprep.subr.mxu0 %v4422_v23 }
 0x409   :  { %1847 = vmatpush2.msra.mxu0 %v4421_v21 }
 0x40a   :  { %1848 = vmatprep.subr.mxu0 %v4420_v20 }
 0x40b   :  { %1849 = vmatpush2.msra.mxu0 %v4419_v22 }
 0x40c   :  { %1850 = vmatprep.subr.mxu0 %v4418_v19 }
 0x40d   :  { %1851 = vmatpush2.msra.mxu0 %v4417_v38 }
 0x40e   :  { %1852 = vmatprep.subr.mxu0 %v4416_v40 }
 0x40f   :  { %1853 = vmatpush2.msra.mxu0 %v4415_v14 }
 0x410   :  { %1854 = vmatprep.subr.mxu0 %v4414_v15 }
 0x411   :  { %1855 = vmatpush2.msra.mxu0 %v4413_v1 }
 0x412   :  { %1856 = vmatprep.subr.mxu0 %v4412_v12  ;;  %v1898_v12 = vld [vmem:[#allocation7] sm:$0xff] }
 0x413   :  { %1857 = vmatpush2.msra.mxu0 %v4411_v24  ;;  %v2015_v24 = vld [vmem:[#allocation8 + $0xf8] sm:$0xff] }
 0x414   :  { %1858 = vmatprep.subr.mxu0 %v4410_v13  ;;  %v2014_v13 = vld [vmem:[#allocation8 + $0xf0] sm:$0xff] }
 0x415   :  { %1859 = vmatpush2.msra.mxu0 %v4409_v42  ;;  %v2013_v42 = vld [vmem:[#allocation8 + $0xe8] sm:$0xff] }
 0x416   :  { %1860 = vmatprep.subr.mxu0 %v4408_v36  ;;  %v2141_v36 = vld [vmem:[#allocation7 + $0x10] sm:$0xff] }
 0x417   :  { %1861 = vmatpush2.msra.mxu0 %v4407_v32  ;;  %v2012_v32 = vld [vmem:[#allocation8 + $0xe0] sm:$0xff] }
 0x418   :  { %1862 = vmatprep.subr.mxu0 %v4406_v30  ;;  %v1899_v30 = vld [vmem:[#allocation7 + $0x8] sm:$0xf] }
 0x419   :  { %1863 = vmatpush2.msra.mxu0 %v4405_v28  ;;  %v2011_v28 = vld [vmem:[#allocation8 + $0xd8] sm:$0xff] }
 0x41a   :  { %1864 = vmatprep.subr.mxu0 %v4404_v45  ;;  %v2010_v45 = vld [vmem:[#allocation8 + $0xd0] sm:$0xff] }
 0x41b   :  { %1865 = vmatpush2.msra.mxu0 %v4403_v26  ;;  %v2258_v26 = vld [vmem:[#allocation8 + $0x2f8] sm:$0xff] }
 0x490   :  { %v1357_v39 = vpop.f32.mrf.mxu0 }
 0x491   :  { %v1385_v60 = vadd.f32 %v1378_v59, %v1357_v39  ;;  %v2009_v39 = vld [vmem:[#allocation8 + $0xc8] sm:$0xff] }
 0x492   :  { %v1359_v41 = vpop.f32.mrf.mxu0  ;;  %v1618_v53 = vpop.f32.mrf.mxu1 }
 0x493   :  { %v1386_v35 = vadd.f32 %v1382_v4, %v1359_v41  ;;  %v1635_v23 = vadd.f32 %v1618_v53, %v1385_v60  ;;  %v2142_v41 = vld [vmem:[#allocation7 + $0x18] sm:$0xf]  ;;  %v2003_v53 = vld [vmem:[#allocation8 + $0x98] sm:$0xff]  ;;  %v1994_v60 = vld [vmem:[#allocation8 + $0x50] sm:$0xff] }
 0x494   :  { %v1363_v37 = vpop.f32.mrf.mxu0  ;;  %v1620_v54 = vpop.f32.mrf.mxu1 }
 0x495   :  { %v1387_v9 = vadd.f32 %v1378_v59, %v1363_v37  ;;  %v1636_v16 = vadd.f32 %v1620_v54, %v1386_v35  ;;  %v2008_v37 = vld [vmem:[#allocation8 + $0xc0] sm:$0xff]  ;;  %v2252_v54 = vld [vmem:[#allocation8 + $0x2c8] sm:$0xff] }
 0x496   :  { %v1365_v34 = vpop.f32.mrf.mxu0  ;;  %v1624_v55 = vpop.f32.mrf.mxu1  ;;  %v2244_v35 = vld [vmem:[#allocation8 + $0x288] sm:$0xff] }
 0x497   :  { %v1388_v7 = vadd.f32 %v1382_v4, %v1365_v34  ;;  %v1637_v27 = vadd.f32 %v1624_v55, %v1387_v9  ;;  %v2257_v34 = vld [vmem:[#allocation8 + $0x2f0] sm:$0xff]  ;;  %v1996_v9 = vld [vmem:[#allocation8 + $0x60] sm:$0xff] }
 0x498   :  { %v1369_v11 = vpop.f32.mrf.mxu0  ;;  %v1626_v56 = vpop.f32.mrf.mxu1  ;;  %v2002_v55 = vld [vmem:[#allocation8 + $0x90] sm:$0xff] }
 0x499   :  { %v1389_v5 = vadd.f32 %v1378_v59, %v1369_v11  ;;  %v1638_v29 = vadd.f32 %v1626_v56, %v1388_v7  ;;  %v2007_v11 = vld [vmem:[#allocation8 + $0xb8] sm:$0xff]  ;;  %v2251_v56 = vld [vmem:[#allocation8 + $0x2c0] sm:$0xff]  ;;  %v1997_v7 = vld [vmem:[#allocation8 + $0x68] sm:$0xff] }
 0x49a   :  { %v1371_v44 = vpop.f32.mrf.mxu0  ;;  %v1630_v2 = vpop.f32.mrf.mxu1  ;;  %v2000_v59 = vld [vmem:[#allocation8 + $0x80] sm:$0xff] }
 0x49b   :  { %v1390_v8 = vadd.f32 %v1382_v4, %v1371_v44  ;;  %v1639_v61 = vadd.f32 %v1630_v2, %v1389_v5  ;;  %v2256_v44 = vld [vmem:[#allocation8 + $0x2e8] sm:$0xff]  ;;  %v2249_v2 = vld [vmem:[#allocation8 + $0x2b0] sm:$0xff] }
 0x49c   :  { %v1720_v43 = vpop.f32.mrf.mxu0  ;;  %v1632_v10 = vpop.f32.mrf.mxu1  ;;  %v2248_v4 = vld [vmem:[#allocation8 + $0x2a8] sm:$0xff]  ;;  %v1998_v5 = vld [vmem:[#allocation8 + $0x70] sm:$0xff] }
 0x49d   :  { %v1640_v63 = vadd.f32 %v1632_v10, %v1390_v8  ;;  %v2246_v8 = vld [vmem:[#allocation8 + $0x298] sm:$0xff]  ;;  %v2245_v10 = vld [vmem:[#allocation8 + $0x290] sm:$0xff] }
 0x49e   :  { %v1722_v46 = vpop.f32.mrf.mxu0 }
 0x49f   :  { %1866 = vmatprep.mubr.f32.mxu0 %v1722_v46  ;;  %v2255_v46 = vld [vmem:[#allocation8 + $0x2e0] sm:$0xff] }
 0x4a0   :  { %v1726_v47 = vpop.f32.mrf.mxu0  ;;  %1867 = vmatmul.mubr.f32.vlgmr.msra.gmra.mxu0 %v1720_v43  ;;  %v2006_v43 = vld [vmem:[#allocation8 + $0xb0] sm:$0xff] }
 0x4a2   :  { %v1728_v49 = vpop.f32.mrf.mxu0 }
 0x4a3   :  { %1872 = vmatprep.mubr.f32.mxu0 %v1728_v49  ;;  %v2254_v49 = vld [vmem:[#allocation8 + $0x2d8] sm:$0xff] }
 0x4a4   :  { %v1732_v50 = vpop.f32.mrf.mxu0  ;;  %1873 = vmatmul.mubr.f32.gmra.mxu0 %v1726_v47  ;;  %v2005_v47 = vld [vmem:[#allocation8 + $0xa8] sm:$0xff] }
 0x4a6   :  { %v1734_v52 = vpop.f32.mrf.mxu0 }
 0x4a7   :  { %1878 = vmatprep.mubr.f32.mxu0 %v1734_v52  ;;  %v2253_v52 = vld [vmem:[#allocation8 + $0x2d0] sm:$0xff] }
 0x4a8   :  { %1879 = vmatmul.mubr.f32.gmra.mxu0 %v1732_v50  ;;  %v2004_v50 = vld [vmem:[#allocation8 + $0xa0] sm:$0xff] }
 0x4a9   :  { %2213 = vmatprep.mubr.f32.mxu0 %v7501_v0 }
 0x560   :  { %v1868_v58 = vpop.f32.mrf.mxu0 }
 0x561   :  { %v1885_v19 = vadd.f32 %v1868_v58, %v1635_v23  ;;  %v2250_v58 = vld [vmem:[#allocation8 + $0x2b8] sm:$0xff] }
 0x562   :  { %v1870_v3 = vpop.f32.mrf.mxu0  ;;  %v2238_v23 = vld [vmem:[#allocation8 + $0x258] sm:$0xff] }
 0x563   :  { %v1886_v20 = vadd.f32 %v1870_v3, %v1636_v16  ;;  %v6582_v1 = vmax.f32 %v1885_v19, 0.0  ;;  %v1999_v3 = vld [vmem:[#allocation8 + $0x78] sm:$0xff]  ;;  %v1990_v16 = vld [vmem:[#allocation8 + $0x30] sm:$0xff] }
 0x564   :  { %v1874_v6 = vpop.f32.mrf.mxu0  ;;  %v1987_v19 = vld [vmem:[#allocation8 + $0x18] sm:$0xff] }
 0x565   :  { %v1887_v21 = vadd.f32 %v1874_v6, %v1637_v27  ;;  %v6578_v15 = vmax.f32 %v1886_v20, 0.0  ;;  %v2247_v6 = vld [vmem:[#allocation8 + $0x2a0] sm:$0xff]  ;;  %v2241_v27 = vld [vmem:[#allocation8 + $0x270] sm:$0xff] }
 0x566   :  { %v1876_v33 = vpop.f32.mrf.mxu0  ;;  %v2237_v20 = vld [vmem:[#allocation8 + $0x250] sm:$0xff] }
 0x567   :  { %v1888_v18 = vadd.f32 %v1876_v33, %v1638_v29  ;;  %v6574_v14 = vmax.f32 %v1887_v21, 0.0  ;;  %v1995_v33 = vld [vmem:[#allocation8 + $0x58] sm:$0xff]  ;;  %v1988_v21 = vld [vmem:[#allocation8 + $0x20] sm:$0xff] }
 0x568   :  { %v1880_v62 = vpop.f32.mrf.mxu0  ;;  %v2242_v29 = vld [vmem:[#allocation8 + $0x278] sm:$0xff] }
 0x569   :  { %v1889_v31 = vadd.f32 %v1880_v62, %v1639_v61  ;;  %v6570_v40 = vmax.f32 %v1888_v18, 0.0  ;;  %v2243_v61 = vld [vmem:[#allocation8 + $0x280] sm:$0xff]  ;;  %v1993_v62 = vld [vmem:[#allocation8 + $0x48] sm:$0xff] }
 0x56a   :  { %v1882_v25 = vpop.f32.mrf.mxu0  ;;  %v2239_v18 = vld [vmem:[#allocation8 + $0x260] sm:$0xff] }
 0x56b   :  { %v1890_v17 = vadd.f32 %v1882_v25, %v1640_v63  ;;  %v6568_v38 = vmax.f32 %v1889_v31, 0.0  ;;  %v1992_v63 = vld [vmem:[#allocation8 + $0x40] sm:$0xff]  ;;  %v1991_v31 = vld [vmem:[#allocation8 + $0x38] sm:$0xff]  ;;  %v2240_v25 = vld [vmem:[#allocation8 + $0x268] sm:$0xff] }
 0x56d   :  { %v6566_v22 = vmax.f32 %v1890_v17, 0.0  ;;  %v1989_v17 = vld [vmem:[#allocation8 + $0x28] sm:$0xff] }
 0x56f   :  { %1933 = vmatprep.subr.mxu1 %v6566_v22  ;;  %2175 = vmatprep.subr.mxu0 %v6566_v22 }
 0x570   :  { %1934 = vmatpush1.msra.mxu1 %v6568_v38  ;;  %2176 = vmatpush1.msra.mxu0 %v6568_v38 }
 0x571   :  { %1935 = vmatprep.subr.mxu1 %v6570_v40  ;;  %2177 = vmatprep.subr.mxu0 %v6570_v40 }
 0x572   :  { %1936 = vmatpush1.msra.mxu1 %v6574_v14  ;;  %2178 = vmatpush1.msra.mxu0 %v6574_v14 }
 0x573   :  { %1937 = vmatprep.subr.mxu1 %v6578_v15  ;;  %2179 = vmatprep.subr.mxu0 %v6578_v15 }
 0x574   :  { %1938 = vmatpush1.msra.mxu1 %v6582_v1  ;;  %2180 = vmatpush1.msra.mxu0 %v6582_v1 }
 0x575   :  { %4435 = vmatmul.mubr.msk.f32.vlgmr.msra.gmra.mxu1 %vm1900_vm3, %v1898_v12  ;;  %2048 = vmatprep.subr.mxu1 %v2015_v24  ;;  %v2236_v12 = vld [vmem:[#allocation8 + $0x248] sm:$0xff]  ;;  %v1986_v24 = vld [vmem:[#allocation8 + $0x10] sm:$0xff] }
 0x576   :  { %2049 = vmatpush1.msra.mxu1 %v2014_v13  ;;  %1977 = vmatprep.mubr.f32.mxu1 %v7501_v0  ;;  %v2235_v13 = vld [vmem:[#allocation8 + $0x240] sm:$0xff] }
 0x577   :  { %2050 = vmatprep.subr.mxu1 %v2013_v42  ;;  %4437 = vmatmul.mubr.msk.f32.vlgmr.msra.gmra.mxu0 %vm1900_vm3, %v2141_v36  ;;  %v1985_v42 = vld [vmem:[#allocation8 + $0x8] sm:$0xff]  ;;  %v2234_v36 = vld [vmem:[#allocation8 + $0x238] sm:$0xff] }
 0x578   :  { %2051 = vmatpush1.msra.mxu1 %v2012_v32  ;;  %2219 = vmatprep.mubr.f32.mxu0 %v7501_v0  ;;  %v1984_v32 = vld [vmem:[#allocation8] sm:$0xff] }
 0x579   :  { %4436 = vmatmul.mubr.msk.f32.gmra.mxu1 %vm1900_vm3, %v1899_v30  ;;  %2052 = vmatprep.subr.mxu1 %v2011_v28  ;;  %v2233_v30 = vld [vmem:[#allocation8 + $0x230] sm:$0xff]  ;;  %v2047_v28 = vld [vmem:[#allocation8 + $0x1f8] sm:$0xff] }
 0x57a   :  { %2053 = vmatpush1.msra.mxu1 %v2010_v45  ;;  %2291 = vmatprep.subr.mxu0 %v2258_v26  ;;  %v2232_v45 = vld [vmem:[#allocation8 + $0x228] sm:$0xff]  ;;  %v2046_v26 = vld [vmem:[#allocation8 + $0x1f0] sm:$0xff] }
 0x57b   :  { %2054 = vmatprep.subr.mxu1 %v2009_v39  ;;  %4438 = vmatmul.mubr.msk.f32.gmra.mxu0 %vm1900_vm3, %v2142_v41  ;;  %v2231_v39 = vld [vmem:[#allocation8 + $0x220] sm:$0xff]  ;;  %v2045_v41 = vld [vmem:[#allocation8 + $0x1e8] sm:$0xff] }
 0x57c   :  { %2055 = vmatpush1.msra.mxu1 %v2008_v37  ;;  %2292 = vmatpush1.msra.mxu0 %v2257_v34  ;;  %v2230_v37 = vld [vmem:[#allocation8 + $0x218] sm:$0xff]  ;;  %v2044_v34 = vld [vmem:[#allocation8 + $0x1e0] sm:$0xff] }
 0x57d   :  { %2056 = vmatprep.subr.mxu1 %v2007_v11  ;;  %2293 = vmatprep.subr.mxu0 %v2256_v44  ;;  %v2229_v11 = vld [vmem:[#allocation8 + $0x210] sm:$0xff]  ;;  %v2043_v44 = vld [vmem:[#allocation8 + $0x1d8] sm:$0xff] }
 0x57e   :  { %2057 = vmatpush1.msra.mxu1 %v2006_v43  ;;  %2294 = vmatpush1.msra.mxu0 %v2255_v46  ;;  %v2228_v43 = vld [vmem:[#allocation8 + $0x208] sm:$0xff]  ;;  %v2042_v46 = vld [vmem:[#allocation8 + $0x1d0] sm:$0xff] }
 0x57f   :  { %2058 = vmatprep.subr.mxu1 %v2005_v47  ;;  %2295 = vmatprep.subr.mxu0 %v2254_v49  ;;  %v2227_v47 = vld [vmem:[#allocation8 + $0x200] sm:$0xff]  ;;  %v2041_v49 = vld [vmem:[#allocation8 + $0x1c8] sm:$0xff] }
 0x580   :  { %2059 = vmatpush1.msra.mxu1 %v2004_v50  ;;  %2296 = vmatpush1.msra.mxu0 %v2253_v52  ;;  %v2290_v50 = vld [vmem:[#allocation8 + $0x3f8] sm:$0xff]  ;;  %v2040_v52 = vld [vmem:[#allocation8 + $0x1c0] sm:$0xff] }
 0x581   :  { %2060 = vmatprep.subr.mxu1 %v2003_v53  ;;  %2297 = vmatprep.subr.mxu0 %v2252_v54  ;;  %v2289_v53 = vld [vmem:[#allocation8 + $0x3f0] sm:$0xff]  ;;  %v2039_v54 = vld [vmem:[#allocation8 + $0x1b8] sm:$0xff] }
 0x582   :  { %2061 = vmatpush1.msra.mxu1 %v2002_v55  ;;  %2298 = vmatpush1.msra.mxu0 %v2251_v56  ;;  %v2288_v55 = vld [vmem:[#allocation8 + $0x3e8] sm:$0xff]  ;;  %v2038_v56 = vld [vmem:[#allocation8 + $0x1b0] sm:$0xff] }
 0x583   :  { %2062 = vmatprep.subr.mxu1 %v2001_v57  ;;  %2299 = vmatprep.subr.mxu0 %v2250_v58  ;;  %v2287_v57 = vld [vmem:[#allocation8 + $0x3e0] sm:$0xff]  ;;  %v2037_v58 = vld [vmem:[#allocation8 + $0x1a8] sm:$0xff] }
 0x584   :  { %2063 = vmatpush1.msra.mxu1 %v2000_v59  ;;  %2300 = vmatpush1.msra.mxu0 %v2249_v2  ;;  %v2286_v59 = vld [vmem:[#allocation8 + $0x3d8] sm:$0xff]  ;;  %v2036_v2 = vld [vmem:[#allocation8 + $0x1a0] sm:$0xff] }
 0x585   :  { %2064 = vmatprep.subr.mxu1 %v1999_v3  ;;  %2301 = vmatprep.subr.mxu0 %v2248_v4  ;;  %v2285_v3 = vld [vmem:[#allocation8 + $0x3d0] sm:$0xff]  ;;  %v2035_v4 = vld [vmem:[#allocation8 + $0x198] sm:$0xff] }
 0x586   :  { %2065 = vmatpush1.msra.mxu1 %v1998_v5  ;;  %2302 = vmatpush1.msra.mxu0 %v2247_v6  ;;  %v2284_v5 = vld [vmem:[#allocation8 + $0x3c8] sm:$0xff]  ;;  %v2034_v6 = vld [vmem:[#allocation8 + $0x190] sm:$0xff] }
 0x587   :  { %2066 = vmatprep.subr.mxu1 %v1997_v7  ;;  %2303 = vmatprep.subr.mxu0 %v2246_v8  ;;  %v2283_v7 = vld [vmem:[#allocation8 + $0x3c0] sm:$0xff]  ;;  %v2033_v8 = vld [vmem:[#allocation8 + $0x188] sm:$0xff] }
 0x588   :  { %2067 = vmatpush1.msra.mxu1 %v1996_v9  ;;  %2304 = vmatpush1.msra.mxu0 %v2245_v10  ;;  %v2282_v9 = vld [vmem:[#allocation8 + $0x3b8] sm:$0xff]  ;;  %v2032_v10 = vld [vmem:[#allocation8 + $0x180] sm:$0xff] }
 0x589   :  { %2068 = vmatprep.subr.mxu1 %v1995_v33  ;;  %2305 = vmatprep.subr.mxu0 %v2244_v35  ;;  %v2281_v33 = vld [vmem:[#allocation8 + $0x3b0] sm:$0xff]  ;;  %v2031_v35 = vld [vmem:[#allocation8 + $0x178] sm:$0xff] }
 0x58a   :  { %2069 = vmatpush1.msra.mxu1 %v1994_v60  ;;  %2306 = vmatpush1.msra.mxu0 %v2243_v61  ;;  %v2280_v60 = vld [vmem:[#allocation8 + $0x3a8] sm:$0xff]  ;;  %v2030_v61 = vld [vmem:[#allocation8 + $0x170] sm:$0xff] }
 0x58b   :  { %2070 = vmatprep.subr.mxu1 %v1993_v62  ;;  %2307 = vmatprep.subr.mxu0 %v2242_v29  ;;  %v2279_v62 = vld [vmem:[#allocation8 + $0x3a0] sm:$0xff]  ;;  %v2029_v29 = vld [vmem:[#allocation8 + $0x168] sm:$0xff] }
 0x58c   :  { %2071 = vmatpush1.msra.mxu1 %v1992_v63  ;;  %2308 = vmatpush1.msra.mxu0 %v2241_v27  ;;  %v2278_v63 = vld [vmem:[#allocation8 + $0x398] sm:$0xff]  ;;  %v2028_v27 = vld [vmem:[#allocation8 + $0x160] sm:$0xff] }
 0x58d   :  { %2072 = vmatprep.subr.mxu1 %v1991_v31  ;;  %2309 = vmatprep.subr.mxu0 %v2240_v25  ;;  %v2277_v31 = vld [vmem:[#allocation8 + $0x390] sm:$0xff]  ;;  %v2027_v25 = vld [vmem:[#allocation8 + $0x158] sm:$0xff] }
 0x58e   :  { %2073 = vmatpush1.msra.mxu1 %v1990_v16  ;;  %2310 = vmatpush1.msra.mxu0 %v2239_v18  ;;  %v2276_v16 = vld [vmem:[#allocation8 + $0x388] sm:$0xff]  ;;  %v2026_v18 = vld [vmem:[#allocation8 + $0x150] sm:$0xff] }
 0x58f   :  { %2074 = vmatprep.subr.mxu1 %v1989_v17  ;;  %2311 = vmatprep.subr.mxu0 %v2238_v23  ;;  %v2275_v17 = vld [vmem:[#allocation8 + $0x380] sm:$0xff]  ;;  %v2025_v23 = vld [vmem:[#allocation8 + $0x148] sm:$0xff] }
 0x590   :  { %2075 = vmatpush1.msra.mxu1 %v1988_v21  ;;  %2312 = vmatpush1.msra.mxu0 %v2237_v20  ;;  %v2274_v21 = vld [vmem:[#allocation8 + $0x378] sm:$0xff]  ;;  %v2024_v20 = vld [vmem:[#allocation8 + $0x140] sm:$0xff] }
 0x591   :  { %2076 = vmatprep.subr.mxu1 %v1987_v19  ;;  %2313 = vmatprep.subr.mxu0 %v2236_v12  ;;  %v2273_v19 = vld [vmem:[#allocation8 + $0x370] sm:$0xff]  ;;  %v2023_v12 = vld [vmem:[#allocation8 + $0x138] sm:$0xff] }
 0x592   :  { %2077 = vmatpush1.msra.mxu1 %v1986_v24  ;;  %2314 = vmatpush1.msra.mxu0 %v2235_v13  ;;  %v2272_v24 = vld [vmem:[#allocation8 + $0x368] sm:$0xff]  ;;  %v2022_v13 = vld [vmem:[#allocation8 + $0x130] sm:$0xff] }
 0x593   :  { %2078 = vmatprep.subr.mxu1 %v1985_v42  ;;  %2315 = vmatprep.subr.mxu0 %v2234_v36  ;;  %v2271_v42 = vld [vmem:[#allocation8 + $0x360] sm:$0xff]  ;;  %v2021_v36 = vld [vmem:[#allocation8 + $0x128] sm:$0xff] }
 0x594   :  { %2079 = vmatpush1.msra.mxu1 %v1984_v32  ;;  %2316 = vmatpush1.msra.mxu0 %v2233_v30  ;;  %v2270_v32 = vld [vmem:[#allocation8 + $0x358] sm:$0xff]  ;;  %v2020_v30 = vld [vmem:[#allocation8 + $0x120] sm:$0xff] }
 0x595   :  { %2080 = vmatprep.subr.mxu1 %v2047_v28  ;;  %2317 = vmatprep.subr.mxu0 %v2232_v45  ;;  %v2269_v28 = vld [vmem:[#allocation8 + $0x350] sm:$0xff]  ;;  %v2019_v45 = vld [vmem:[#allocation8 + $0x118] sm:$0xff] }
 0x596   :  { %2081 = vmatpush2.msra.mxu1 %v2046_v26  ;;  %2318 = vmatpush1.msra.mxu0 %v2231_v39  ;;  %v2268_v26 = vld [vmem:[#allocation8 + $0x348] sm:$0xff]  ;;  %v2018_v39 = vld [vmem:[#allocation8 + $0x110] sm:$0xff] }
 0x597   :  { %2082 = vmatprep.subr.mxu1 %v2045_v41  ;;  %2319 = vmatprep.subr.mxu0 %v2230_v37  ;;  %v2017_v41 = vld [vmem:[#allocation8 + $0x108] sm:$0xff]  ;;  %v2016_v37 = vld [vmem:[#allocation8 + $0x100] sm:$0xff] }
 0x598   :  { %2083 = vmatpush2.msra.mxu1 %v2044_v34  ;;  %2320 = vmatpush1.msra.mxu0 %v2229_v11  ;;  %v2267_v34 = vld [vmem:[#allocation8 + $0x340] sm:$0xff]  ;;  %v2266_v11 = vld [vmem:[#allocation8 + $0x338] sm:$0xff] }
 0x599   :  { %2084 = vmatprep.subr.mxu1 %v2043_v44  ;;  %2321 = vmatprep.subr.mxu0 %v2228_v43  ;;  %v2265_v44 = vld [vmem:[#allocation8 + $0x330] sm:$0xff]  ;;  %v2264_v43 = vld [vmem:[#allocation8 + $0x328] sm:$0xff] }
 0x59a   :  { %2085 = vmatpush2.msra.mxu1 %v2042_v46  ;;  %2322 = vmatpush1.msra.mxu0 %v2227_v47  ;;  %v2263_v46 = vld [vmem:[#allocation8 + $0x320] sm:$0xff]  ;;  %v2262_v47 = vld [vmem:[#allocation8 + $0x318] sm:$0xff] }
 0x59b   :  { %2086 = vmatprep.subr.mxu1 %v2041_v49  ;;  %2323 = vmatprep.subr.mxu0 %v2290_v50  ;;  %v2261_v49 = vld [vmem:[#allocation8 + $0x310] sm:$0xff]  ;;  %v2260_v50 = vld [vmem:[#allocation8 + $0x308] sm:$0xff] }
 0x59c   :  { %2087 = vmatpush2.msra.mxu1 %v2040_v52  ;;  %2324 = vmatpush2.msra.mxu0 %v2289_v53  ;;  %v2259_v52 = vld [vmem:[#allocation8 + $0x300] sm:$0xff] }
 0x59d   :  { %2088 = vmatprep.subr.mxu1 %v2039_v54  ;;  %2325 = vmatprep.subr.mxu0 %v2288_v55 }
 0x59e   :  { %2089 = vmatpush2.msra.mxu1 %v2038_v56  ;;  %2326 = vmatpush2.msra.mxu0 %v2287_v57 }
 0x59f   :  { %2090 = vmatprep.subr.mxu1 %v2037_v58  ;;  %2327 = vmatprep.subr.mxu0 %v2286_v59  ;;  %v2490_v59 = vld [vmem:[#allocation8 + $0x4f8] sm:$0xff] }
 0x5a0   :  { %2091 = vmatpush2.msra.mxu1 %v2036_v2  ;;  %2328 = vmatpush2.msra.mxu0 %v2285_v3  ;;  %v2373_v3 = vld [vmem:[#allocation7 + $0x20] sm:$0xff] }
 0x5a1   :  { %2092 = vmatprep.subr.mxu1 %v2035_v4  ;;  %2329 = vmatprep.subr.mxu0 %v2284_v5  ;;  %v2487_v4 = vld [vmem:[#allocation8 + $0x4e0] sm:$0xff]  ;;  %v2484_v5 = vld [vmem:[#allocation8 + $0x4c8] sm:$0xff] }
 0x5a2   :  { %2093 = vmatpush2.msra.mxu1 %v2034_v6  ;;  %2330 = vmatpush2.msra.mxu0 %v2283_v7  ;;  %v2483_v6 = vld [vmem:[#allocation8 + $0x4c0] sm:$0xff]  ;;  %v2482_v7 = vld [vmem:[#allocation8 + $0x4b8] sm:$0xff] }
 0x5a3   :  { %2094 = vmatprep.subr.mxu1 %v2033_v8  ;;  %2331 = vmatprep.subr.mxu0 %v2282_v9  ;;  %v2481_v8 = vld [vmem:[#allocation8 + $0x4b0] sm:$0xff]  ;;  %v2480_v9 = vld [vmem:[#allocation8 + $0x4a8] sm:$0xff] }
 0x5a4   :  { %2095 = vmatpush2.msra.mxu1 %v2032_v10  ;;  %2332 = vmatpush2.msra.mxu0 %v2281_v33  ;;  %v2479_v10 = vld [vmem:[#allocation8 + $0x4a0] sm:$0xff]  ;;  %v2478_v33 = vld [vmem:[#allocation8 + $0x498] sm:$0xff] }
 0x5a5   :  { %2096 = vmatprep.subr.mxu1 %v2031_v35  ;;  %2333 = vmatprep.subr.mxu0 %v2280_v60  ;;  %v2477_v35 = vld [vmem:[#allocation8 + $0x490] sm:$0xff]  ;;  %v2476_v60 = vld [vmem:[#allocation8 + $0x488] sm:$0xff] }
 0x5a6   :  { %2097 = vmatpush2.msra.mxu1 %v2030_v61  ;;  %2334 = vmatpush2.msra.mxu0 %v2279_v62  ;;  %v2475_v61 = vld [vmem:[#allocation8 + $0x480] sm:$0xff]  ;;  %v2474_v62 = vld [vmem:[#allocation8 + $0x478] sm:$0xff] }
 0x5a7   :  { %2098 = vmatprep.subr.mxu1 %v2029_v29  ;;  %2335 = vmatprep.subr.mxu0 %v2278_v63  ;;  %v2473_v29 = vld [vmem:[#allocation8 + $0x470] sm:$0xff]  ;;  %v2472_v63 = vld [vmem:[#allocation8 + $0x468] sm:$0xff] }
 0x5a8   :  { %2099 = vmatpush2.msra.mxu1 %v2028_v27  ;;  %2336 = vmatpush2.msra.mxu0 %v2277_v31  ;;  %v2471_v27 = vld [vmem:[#allocation8 + $0x460] sm:$0xff]  ;;  %v2470_v31 = vld [vmem:[#allocation8 + $0x458] sm:$0xff] }
 0x5a9   :  { %2100 = vmatprep.subr.mxu1 %v2027_v25  ;;  %2337 = vmatprep.subr.mxu0 %v2276_v16  ;;  %v2469_v25 = vld [vmem:[#allocation8 + $0x450] sm:$0xff]  ;;  %v2468_v16 = vld [vmem:[#allocation8 + $0x448] sm:$0xff] }
 0x5aa   :  { %2101 = vmatpush2.msra.mxu1 %v2026_v18  ;;  %2338 = vmatpush2.msra.mxu0 %v2275_v17  ;;  %v2467_v18 = vld [vmem:[#allocation8 + $0x440] sm:$0xff]  ;;  %v2466_v17 = vld [vmem:[#allocation8 + $0x438] sm:$0xff] }
 0x5ab   :  { %2102 = vmatprep.subr.mxu1 %v2025_v23  ;;  %2339 = vmatprep.subr.mxu0 %v2274_v21  ;;  %v2465_v23 = vld [vmem:[#allocation8 + $0x430] sm:$0xff]  ;;  %v2464_v21 = vld [vmem:[#allocation8 + $0x428] sm:$0xff] }
 0x5ac   :  { %2103 = vmatpush2.msra.mxu1 %v2024_v20  ;;  %2340 = vmatpush2.msra.mxu0 %v2273_v19  ;;  %v2463_v20 = vld [vmem:[#allocation8 + $0x420] sm:$0xff]  ;;  %v2462_v19 = vld [vmem:[#allocation8 + $0x418] sm:$0xff] }
 0x5ad   :  { %2104 = vmatprep.subr.mxu1 %v2023_v12  ;;  %2341 = vmatprep.subr.mxu0 %v2272_v24  ;;  %v2461_v12 = vld [vmem:[#allocation8 + $0x410] sm:$0xff]  ;;  %v2460_v24 = vld [vmem:[#allocation8 + $0x408] sm:$0xff] }
 0x5ae   :  { %2105 = vmatpush2.msra.mxu1 %v2022_v13  ;;  %2342 = vmatpush2.msra.mxu0 %v2271_v42  ;;  %v2459_v13 = vld [vmem:[#allocation8 + $0x400] sm:$0xff]  ;;  %v2522_v42 = vld [vmem:[#allocation8 + $0x5f8] sm:$0xff] }
 0x5af   :  { %2106 = vmatprep.subr.mxu1 %v2021_v36  ;;  %2343 = vmatprep.subr.mxu0 %v2270_v32  ;;  %v2521_v36 = vld [vmem:[#allocation8 + $0x5f0] sm:$0xff]  ;;  %v2520_v32 = vld [vmem:[#allocation8 + $0x5e8] sm:$0xff] }
 0x5b0   :  { %2107 = vmatpush2.msra.mxu1 %v2020_v30  ;;  %2344 = vmatpush2.msra.mxu0 %v2269_v28  ;;  %v2519_v30 = vld [vmem:[#allocation8 + $0x5e0] sm:$0xff]  ;;  %v2518_v28 = vld [vmem:[#allocation8 + $0x5d8] sm:$0xff] }
 0x5b1   :  { %2108 = vmatprep.subr.mxu1 %v2019_v45  ;;  %2345 = vmatprep.subr.mxu0 %v2268_v26  ;;  %v2517_v45 = vld [vmem:[#allocation8 + $0x5d0] sm:$0xff]  ;;  %v2516_v26 = vld [vmem:[#allocation8 + $0x5c8] sm:$0xff] }
 0x5b2   :  { %2109 = vmatpush2.msra.mxu1 %v2018_v39  ;;  %2346 = vmatpush2.msra.mxu0 %v2267_v34  ;;  %v2515_v39 = vld [vmem:[#allocation8 + $0x5c0] sm:$0xff]  ;;  %v2512_v34 = vld [vmem:[#allocation8 + $0x5a8] sm:$0xff] }
 0x5b3   :  { %2110 = vmatprep.subr.mxu1 %v2017_v41  ;;  %2347 = vmatprep.subr.mxu0 %v2266_v11  ;;  %v2514_v41 = vld [vmem:[#allocation8 + $0x5b8] sm:$0xff]  ;;  %v2511_v11 = vld [vmem:[#allocation8 + $0x5a0] sm:$0xff] }
 0x5b4   :  { %2111 = vmatpush2.msra.mxu1 %v2016_v37  ;;  %2348 = vmatpush2.msra.mxu0 %v2265_v44  ;;  %v2513_v37 = vld [vmem:[#allocation8 + $0x5b0] sm:$0xff]  ;;  %v2510_v44 = vld [vmem:[#allocation8 + $0x598] sm:$0xff] }
 0x5b5   :  { %2407 = vmatprep.subr.mxu1 %v6566_v22  ;;  %2349 = vmatprep.subr.mxu0 %v2264_v43  ;;  %v2509_v43 = vld [vmem:[#allocation8 + $0x590] sm:$0xff] }
 0x5b6   :  { %2350 = vmatpush2.msra.mxu0 %v2263_v46  ;;  %v2508_v46 = vld [vmem:[#allocation8 + $0x588] sm:$0xff] }
 0x5b7   :  { %2351 = vmatprep.subr.mxu0 %v2262_v47  ;;  %v2507_v47 = vld [vmem:[#allocation8 + $0x580] sm:$0xff] }
 0x5b8   :  { %2352 = vmatpush2.msra.mxu0 %v2261_v49  ;;  %v2506_v49 = vld [vmem:[#allocation8 + $0x578] sm:$0xff] }
 0x5b9   :  { %2353 = vmatprep.subr.mxu0 %v2260_v50  ;;  %v2505_v50 = vld [vmem:[#allocation8 + $0x570] sm:$0xff] }
 0x5ba   :  { %2354 = vmatpush2.msra.mxu0 %v2259_v52  ;;  %v2504_v52 = vld [vmem:[#allocation8 + $0x568] sm:$0xff] }
 0x635   :  { %v1973_v53 = vpop.f32.mrf.mxu1 }
 0x637   :  { %v1975_v54 = vpop.f32.mrf.mxu1  ;;  %v2215_v55 = vpop.f32.mrf.mxu0 }
 0x638   :  { %2112 = vmatprep.mubr.f32.mxu1 %v1975_v54  ;;  %v2502_v54 = vld [vmem:[#allocation8 + $0x558] sm:$0xff] }
 0x639   :  { %v1979_v56 = vpop.f32.mrf.mxu1  ;;  %2113 = vmatmul.mubr.f32.vlgmr.msra.gmra.mxu1 %v1973_v53  ;;  %v2217_v22 = vpop.f32.mrf.mxu0  ;;  %v2503_v53 = vld [vmem:[#allocation8 + $0x560] sm:$0xff] }
 0x63a   :  { %2408 = vmatpush1.msra.mxu1 %v6568_v38  ;;  %2355 = vmatprep.mubr.f32.mxu0 %v2217_v22  ;;  %v2489_v38 = vld [vmem:[#allocation8 + $0x4f0] sm:$0xff]  ;;  %v2499_v22 = vld [vmem:[#allocation8 + $0x540] sm:$0xff] }
 0x63b   :  { %2409 = vmatprep.subr.mxu1 %v6570_v40  ;;  %v1981_v57 = vpop.f32.mrf.mxu1  ;;  %v2221_v58 = vpop.f32.mrf.mxu0  ;;  %2356 = vmatmul.mubr.f32.vlgmr.msra.gmra.mxu0 %v2215_v55  ;;  %v2488_v40 = vld [vmem:[#allocation8 + $0x4e8] sm:$0xff]  ;;  %v2501_v55 = vld [vmem:[#allocation8 + $0x550] sm:$0xff] }
 0x63c   :  { %2410 = vmatpush1.msra.mxu1 %v6574_v14  ;;  %2118 = vmatprep.mubr.f32.mxu1 %v1981_v57  ;;  %v2374_v14 = vld [vmem:[#allocation7 + $0x28] sm:$0xf] }
 0x63d   :  { %2411 = vmatprep.subr.mxu1 %v6578_v15  ;;  %2119 = vmatmul.mubr.f32.gmra.mxu1 %v1979_v56  ;;  %v2223_v2 = vpop.f32.mrf.mxu0  ;;  %v2486_v15 = vld [vmem:[#allocation8 + $0x4d8] sm:$0xff]  ;;  %v2500_v56 = vld [vmem:[#allocation8 + $0x548] sm:$0xff] }
 0x63e   :  { %2412 = vmatpush1.msra.mxu1 %v6582_v1  ;;  %2445 = vmatprep.mubr.f32.mxu1 %v7501_v0  ;;  %v2485_v1 = vld [vmem:[#allocation8 + $0x4d0] sm:$0xff]  ;;  %v2498_v57 = vld [vmem:[#allocation8 + $0x538] sm:$0xff] }
 0x63f   :  { %2361 = vmatprep.mubr.f32.mxu0 %v2223_v2  ;;  %2523 = vmatprep.subr.mxu1 %v2490_v59  ;;  %v2496_v59 = vld [vmem:[#allocation8 + $0x528] sm:$0xff]  ;;  %v2495_v2 = vld [vmem:[#allocation8 + $0x520] sm:$0xff] }
 0x640   :  { %2362 = vmatmul.mubr.f32.gmra.mxu0 %v2221_v58  ;;  %v2497_v58 = vld [vmem:[#allocation8 + $0x530] sm:$0xff] }
 0x641   :  { %4439 = vmatmul.mubr.msk.f32.vlgmr.msra.gmra.mxu1 %vm1900_vm3, %v2373_v3  ;;  %2685 = vmatprep.mubr.f32.mxu0 %v7501_v0  ;;  %v2494_v3 = vld [vmem:[#allocation8 + $0x518] sm:$0xff] }
 0x642   :  { %2451 = vmatprep.mubr.f32.mxu1 %v7501_v0  ;;  %2524 = vmatpush1.msra.mxu1 %v2489_v38  ;;  %v2493_v38 = vld [vmem:[#allocation8 + $0x510] sm:$0xff] }
 0x643   :  { %2525 = vmatprep.subr.mxu1 %v2488_v40  ;;  %v2492_v40 = vld [vmem:[#allocation8 + $0x508] sm:$0xff] }
 0x644   :  { %2526 = vmatpush1.msra.mxu1 %v2487_v4  ;;  %v2491_v4 = vld [vmem:[#allocation8 + $0x500] sm:$0xff] }
 0x645   :  { %4440 = vmatmul.mubr.msk.f32.gmra.mxu1 %vm1900_vm3, %v2374_v14  ;;  %2527 = vmatprep.subr.mxu1 %v2486_v15 }
 0x646   :  { %2528 = vmatpush1.msra.mxu1 %v2485_v1 }
 0x647   :  { %2529 = vmatprep.subr.mxu1 %v2484_v5 }
 0x648   :  { %2530 = vmatpush1.msra.mxu1 %v2483_v6 }
 0x649   :  { %2531 = vmatprep.subr.mxu1 %v2482_v7 }
 0x64a   :  { %2532 = vmatpush1.msra.mxu1 %v2481_v8 }
 0x64b   :  { %2533 = vmatprep.subr.mxu1 %v2480_v9 }
 0x64c   :  { %2534 = vmatpush1.msra.mxu1 %v2479_v10 }
 0x64d   :  { %2535 = vmatprep.subr.mxu1 %v2478_v33 }
 0x64e   :  { %2536 = vmatpush1.msra.mxu1 %v2477_v35  ;;  %v1897_v35 = vld [vmem:[#allocation10] sm:$0x3] }
 0x64f   :  { %2537 = vmatprep.subr.mxu1 %v2476_v60  ;;  %v2133_v60 = vrot.slane %v1897_v35, %v5866_v51 }
 0x650   :  { %2538 = vmatpush1.msra.mxu1 %v2475_v61  ;;  %v2129_v61 = vrot.slane %v1897_v35, %v5864_v48  ;;  %v2705_v35 = vld [vmem:[#allocation13 + $0x68] sm:$0xff] }
 0x651   :  { %2539 = vmatprep.subr.mxu1 %v2474_v62 }
 0x652   :  { %2540 = vmatpush1.msra.mxu1 %v2473_v29 }
 0x653   :  { %2541 = vmatprep.subr.mxu1 %v2472_v63 }
 0x654   :  { %2542 = vmatpush1.msra.mxu1 %v2471_v27 }
 0x655   :  { %2543 = vmatprep.subr.mxu1 %v2470_v31 }
 0x656   :  { %2544 = vmatpush1.msra.mxu1 %v2469_v25 }
 0x657   :  { %2545 = vmatprep.subr.mxu1 %v2468_v16 }
 0x658   :  { %2546 = vmatpush1.msra.mxu1 %v2467_v18 }
 0x659   :  { %2547 = vmatprep.subr.mxu1 %v2466_v17 }
 0x65a   :  { %2548 = vmatpush1.msra.mxu1 %v2465_v23 }
 0x65b   :  { %2549 = vmatprep.subr.mxu1 %v2464_v21 }
 0x65c   :  { %2550 = vmatpush1.msra.mxu1 %v2463_v20 }
 0x65d   :  { %2551 = vmatprep.subr.mxu1 %v2462_v19 }
 0x65e   :  { %2552 = vmatpush1.msra.mxu1 %v2461_v12 }
 0x65f   :  { %2553 = vmatprep.subr.mxu1 %v2460_v24 }
 0x660   :  { %2554 = vmatpush1.msra.mxu1 %v2459_v13 }
 0x661   :  { %2555 = vmatprep.subr.mxu1 %v2522_v42 }
 0x662   :  { %2556 = vmatpush2.msra.mxu1 %v2521_v36 }
 0x663   :  { %2557 = vmatprep.subr.mxu1 %v2520_v32 }
 0x664   :  { %2558 = vmatpush2.msra.mxu1 %v2519_v30 }
 0x665   :  { %2559 = vmatprep.subr.mxu1 %v2518_v28 }
 0x666   :  { %2560 = vmatpush2.msra.mxu1 %v2517_v45 }
 0x667   :  { %2561 = vmatprep.subr.mxu1 %v2516_v26  ;;  %v2609_v26 = vld [vmem:[#allocation11] sm:$0x3f] }
 0x668   :  { %2562 = vmatpush2.msra.mxu1 %v2515_v39  ;;  %v2723_v39 = vld [vmem:[#allocation13 + $0xf8] sm:$0xff] }
 0x669   :  { %2563 = vmatprep.subr.mxu1 %v2514_v41  ;;  %v2722_v41 = vld [vmem:[#allocation13 + $0xf0] sm:$0xff] }
 0x66a   :  { %2564 = vmatpush2.msra.mxu1 %v2513_v37  ;;  %v2841_v37 = vld [vmem:[#allocation11 + $0x8] sm:$0x3f] }
 0x66b   :  { %2565 = vmatprep.subr.mxu1 %v2512_v34  ;;  %v2721_v34 = vld [vmem:[#allocation13 + $0xe8] sm:$0xff] }
 0x66c   :  { %2566 = vmatpush2.msra.mxu1 %v2511_v11  ;;  %v2948_v11 = vld [vmem:[#allocation13 + $0x2f8] sm:$0xff] }
 0x66d   :  { %2567 = vmatprep.subr.mxu1 %v2510_v44  ;;  %v2720_v44 = vld [vmem:[#allocation13 + $0xe0] sm:$0xff] }
 0x66e   :  { %2568 = vmatpush2.msra.mxu1 %v2509_v43  ;;  %v2947_v43 = vld [vmem:[#allocation13 + $0x2f0] sm:$0xff] }
 0x66f   :  { %2569 = vmatprep.subr.mxu1 %v2508_v46  ;;  %v2719_v46 = vld [vmem:[#allocation13 + $0xd8] sm:$0xff] }
 0x670   :  { %2570 = vmatpush2.msra.mxu1 %v2507_v47  ;;  %v2946_v47 = vld [vmem:[#allocation13 + $0x2e8] sm:$0xff] }
 0x671   :  { %2571 = vmatprep.subr.mxu1 %v2506_v49  ;;  %v2718_v49 = vld [vmem:[#allocation13 + $0xd0] sm:$0xff] }
 0x672   :  { %2572 = vmatpush2.msra.mxu1 %v2505_v50  ;;  %v2945_v50 = vld [vmem:[#allocation13 + $0x2e0] sm:$0xff] }
 0x673   :  { %2573 = vmatprep.subr.mxu1 %v2504_v52  ;;  %v2717_v52 = vld [vmem:[#allocation13 + $0xc8] sm:$0xff] }
 0x674   :  { %2574 = vmatpush2.msra.mxu1 %v2503_v53  ;;  %v2944_v53 = vld [vmem:[#allocation13 + $0x2d8] sm:$0xff] }
 0x675   :  { %2575 = vmatprep.subr.mxu1 %v2502_v54  ;;  %v2716_v54 = vld [vmem:[#allocation13 + $0xc0] sm:$0xff] }
 0x676   :  { %2576 = vmatpush2.msra.mxu1 %v2501_v55  ;;  %v2943_v55 = vld [vmem:[#allocation13 + $0x2d0] sm:$0xff] }
 0x677   :  { %2577 = vmatprep.subr.mxu1 %v2500_v56  ;;  %v2715_v56 = vld [vmem:[#allocation13 + $0xb8] sm:$0xff] }
 0x678   :  { %2578 = vmatpush2.msra.mxu1 %v2499_v22  ;;  %v2942_v22 = vld [vmem:[#allocation13 + $0x2c8] sm:$0xff] }
 0x679   :  { %2579 = vmatprep.subr.mxu1 %v2498_v57  ;;  %v2714_v57 = vld [vmem:[#allocation13 + $0xb0] sm:$0xff] }
 0x67a   :  { %2580 = vmatpush2.msra.mxu1 %v2497_v58  ;;  %v2941_v58 = vld [vmem:[#allocation13 + $0x2c0] sm:$0xff] }
 0x67b   :  { %2581 = vmatprep.subr.mxu1 %v2496_v59  ;;  %v2713_v59 = vld [vmem:[#allocation13 + $0xa8] sm:$0xff] }
 0x67c   :  { %2582 = vmatpush2.msra.mxu1 %v2495_v2  ;;  %v2940_v2 = vld [vmem:[#allocation13 + $0x2b8] sm:$0xff] }
 0x67d   :  { %2583 = vmatprep.subr.mxu1 %v2494_v3  ;;  %v2712_v3 = vld [vmem:[#allocation13 + $0xa0] sm:$0xff] }
 0x67e   :  { %2584 = vmatpush2.msra.mxu1 %v2493_v38  ;;  %v2939_v38 = vld [vmem:[#allocation13 + $0x2b0] sm:$0xff] }
 0x67f   :  { %2585 = vmatprep.subr.mxu1 %v2492_v40  ;;  %v2711_v40 = vld [vmem:[#allocation13 + $0x98] sm:$0xff] }
 0x680   :  { %2586 = vmatpush2.msra.mxu1 %v2491_v4  ;;  %v2938_v4 = vld [vmem:[#allocation13 + $0x2a8] sm:$0xff] }
 0x6f9   :  { %v2114_v14 = vpop.f32.mrf.mxu1 }
 0x6fa   :  { %v2136_v25 = vadd.f32 %v2129_v61, %v2114_v14  ;;  %v2710_v14 = vld [vmem:[#allocation13 + $0x90] sm:$0xff] }
 0x6fb   :  { %v2116_v15 = vpop.f32.mrf.mxu1  ;;  %v2357_v10 = vpop.f32.mrf.mxu0 }
 0x6fc   :  { %v2137_v27 = vadd.f32 %v2133_v60, %v2116_v15  ;;  %v2368_v19 = vadd.f32 %v2357_v10, %v2136_v25  ;;  %v2937_v15 = vld [vmem:[#allocation13 + $0x2a0] sm:$0xff]  ;;  %v2706_v10 = vld [vmem:[#allocation13 + $0x70] sm:$0xff]  ;;  %v2701_v25 = vld [vmem:[#allocation13 + $0x48] sm:$0xff] }
 0x6fd   :  { %v2120_v1 = vpop.f32.mrf.mxu1  ;;  %v2359_v33 = vpop.f32.mrf.mxu0 }
 0x6fe   :  { %v2138_v29 = vadd.f32 %v2129_v61, %v2120_v1  ;;  %v2369_v21 = vadd.f32 %v2359_v33, %v2137_v27  ;;  %v2709_v1 = vld [vmem:[#allocation13 + $0x88] sm:$0xff]  ;;  %v2933_v33 = vld [vmem:[#allocation13 + $0x280] sm:$0xff]  ;;  %v2702_v27 = vld [vmem:[#allocation13 + $0x50] sm:$0xff] }
 0x6ff   :  { %v2122_v5 = vpop.f32.mrf.mxu1  ;;  %v2704_v61 = vld [vmem:[#allocation13 + $0x60] sm:$0xff] }
 0x700   :  { %v2363_v62 = vpop.f32.mrf.mxu0  ;;  %v2139_v31 = vadd.f32 %v2133_v60, %v2122_v5  ;;  %v2936_v5 = vld [vmem:[#allocation13 + $0x298] sm:$0xff] }
 0x701   :  { %v2447_v6 = vpop.f32.mrf.mxu1  ;;  %v2370_v17 = vadd.f32 %v2363_v62, %v2138_v29  ;;  %v2932_v60 = vld [vmem:[#allocation13 + $0x278] sm:$0xff]  ;;  %v2931_v62 = vld [vmem:[#allocation13 + $0x270] sm:$0xff] }
 0x702   :  { %v2365_v16 = vpop.f32.mrf.mxu0  ;;  %v2703_v29 = vld [vmem:[#allocation13 + $0x58] sm:$0xff] }
 0x703   :  { %v2449_v7 = vpop.f32.mrf.mxu1  ;;  %v2371_v20 = vadd.f32 %v2365_v16, %v2139_v31  ;;  %v2929_v31 = vld [vmem:[#allocation13 + $0x260] sm:$0xff]  ;;  %v2928_v16 = vld [vmem:[#allocation13 + $0x258] sm:$0xff] }
 0x704   :  { %2587 = vmatprep.mubr.f32.mxu1 %v2449_v7  ;;  %v2935_v7 = vld [vmem:[#allocation13 + $0x290] sm:$0xff] }
 0x705   :  { %v2453_v8 = vpop.f32.mrf.mxu1  ;;  %2588 = vmatmul.mubr.f32.vlgmr.msra.gmra.mxu1 %v2447_v6  ;;  %v2708_v6 = vld [vmem:[#allocation13 + $0x80] sm:$0xff] }
 0x707   :  { %v2455_v9 = vpop.f32.mrf.mxu1 }
 0x708   :  { %2593 = vmatprep.mubr.f32.mxu1 %v2455_v9  ;;  %v2934_v9 = vld [vmem:[#allocation13 + $0x288] sm:$0xff] }
 0x709   :  { %2594 = vmatmul.mubr.f32.gmra.mxu1 %v2453_v8  ;;  %v2707_v8 = vld [vmem:[#allocation13 + $0x78] sm:$0xff] }
 0x70a   :  { %2909 = vmatprep.mubr.f32.mxu1 %v7501_v0 }
 0x7c5   :  { %v2589_v63 = vpop.f32.mrf.mxu1 }
 0x7c6   :  { %v2600_v36 = vadd.f32 %v2589_v63, %v2368_v19  ;;  %v2930_v63 = vld [vmem:[#allocation13 + $0x268] sm:$0xff]  ;;  %v2925_v19 = vld [vmem:[#allocation13 + $0x240] sm:$0xff] }
 0x7c7   :  { %v2591_v18 = vpop.f32.mrf.mxu1 }
 0x7c8   :  { %v2601_v13 = vadd.f32 %v2591_v18, %v2369_v21  ;;  %v6620_v45 = vmax.f32 %v2600_v36, 0.0  ;;  %v2700_v18 = vld [vmem:[#allocation13 + $0x40] sm:$0xff]  ;;  %v2926_v21 = vld [vmem:[#allocation13 + $0x248] sm:$0xff]  ;;  %v2695_v36 = vld [vmem:[#allocation13 + $0x18] sm:$0xff] }
 0x7c9   :  { %v2595_v23 = vpop.f32.mrf.mxu1 }
 0x7ca   :  { %v2602_v12 = vadd.f32 %v2595_v23, %v2370_v17  ;;  %v6614_v28 = vmax.f32 %v2601_v13, 0.0  ;;  %v2927_v17 = vld [vmem:[#allocation13 + $0x250] sm:$0xff]  ;;  %v2699_v23 = vld [vmem:[#allocation13 + $0x38] sm:$0xff]  ;;  %v2696_v13 = vld [vmem:[#allocation13 + $0x20] sm:$0xff] }
 0x7cb   :  { %v2597_v24 = vpop.f32.mrf.mxu1 }
 0x7cc   :  { %v2603_v42 = vadd.f32 %v2597_v24, %v2371_v20  ;;  %v6612_v30 = vmax.f32 %v2602_v12, 0.0  ;;  %v2698_v20 = vld [vmem:[#allocation13 + $0x30] sm:$0xff]  ;;  %v2697_v12 = vld [vmem:[#allocation13 + $0x28] sm:$0xff]  ;;  %v2924_v24 = vld [vmem:[#allocation13 + $0x238] sm:$0xff] }
 0x7ce   :  { %v6610_v32 = vmax.f32 %v2603_v42, 0.0  ;;  %v2923_v42 = vld [vmem:[#allocation13 + $0x230] sm:$0xff] }
 0x7d0   :  { %4441 = vmatprep.subr.msk.mxu0 %vm2614_vm4, %v6610_v32  ;;  %4444 = vmatprep.subr.msk.mxu1 %vm2614_vm4, %v6610_v32 }
 0x7d1   :  { %4442 = vmatpush1.msk.msra.mxu0 %vm2614_vm4, %v6612_v30  ;;  %4445 = vmatpush1.msk.msra.mxu1 %vm2614_vm4, %v6612_v30 }
 0x7d2   :  { %2651 = vmatprep.subr.mxu0 %v6614_v28  ;;  %2875 = vmatprep.subr.mxu1 %v6614_v28 }
 0x7d3   :  { %2652 = vmatpush1.msra.mxu0 %v6620_v45  ;;  %2876 = vmatpush1.msra.mxu1 %v6620_v45 }
 0x7d4   :  { %4443 = vmatmul.mubr.msk.f32.vlgmr.msra.gmra.mxu0 %vm2610_vm5, %v2609_v26  ;;  %2756 = vmatprep.subr.mxu0 %v2723_v39  ;;  %v2922_v26 = vld [vmem:[#allocation13 + $0x228] sm:$0xff]  ;;  %v2694_v39 = vld [vmem:[#allocation13 + $0x10] sm:$0xff] }
 0x7d5   :  { %2757 = vmatpush1.msra.mxu0 %v2722_v41  ;;  %4446 = vmatmul.mubr.msk.f32.vlgmr.msra.gmra.mxu1 %vm2610_vm5, %v2841_v37  ;;  %v2921_v41 = vld [vmem:[#allocation13 + $0x220] sm:$0xff]  ;;  %v2693_v37 = vld [vmem:[#allocation13 + $0x8] sm:$0xff] }
 0x7d6   :  { %2758 = vmatprep.subr.mxu0 %v2721_v34  ;;  %2981 = vmatprep.subr.mxu1 %v2948_v11  ;;  %v2920_v34 = vld [vmem:[#allocation13 + $0x218] sm:$0xff]  ;;  %v2692_v11 = vld [vmem:[#allocation13] sm:$0xff] }
 0x7d7   :  { %2759 = vmatpush1.msra.mxu0 %v2720_v44  ;;  %2982 = vmatpush1.msra.mxu1 %v2947_v43  ;;  %v2919_v44 = vld [vmem:[#allocation13 + $0x210] sm:$0xff]  ;;  %v2755_v43 = vld [vmem:[#allocation13 + $0x1f8] sm:$0xff] }
 0x7d8   :  { %2760 = vmatprep.subr.mxu0 %v2719_v46  ;;  %2983 = vmatprep.subr.mxu1 %v2946_v47  ;;  %v2918_v46 = vld [vmem:[#allocation13 + $0x208] sm:$0xff]  ;;  %v2754_v47 = vld [vmem:[#allocation13 + $0x1f0] sm:$0xff] }
 0x7d9   :  { %2761 = vmatpush1.msra.mxu0 %v2718_v49  ;;  %2984 = vmatpush1.msra.mxu1 %v2945_v50  ;;  %v2917_v49 = vld [vmem:[#allocation13 + $0x200] sm:$0xff]  ;;  %v2753_v50 = vld [vmem:[#allocation13 + $0x1e8] sm:$0xff] }
 0x7da   :  { %2762 = vmatprep.subr.mxu0 %v2717_v52  ;;  %2985 = vmatprep.subr.mxu1 %v2944_v53  ;;  %v2980_v52 = vld [vmem:[#allocation13 + $0x3f8] sm:$0xff]  ;;  %v2752_v53 = vld [vmem:[#allocation13 + $0x1e0] sm:$0xff] }
 0x7db   :  { %2763 = vmatpush1.msra.mxu0 %v2716_v54  ;;  %2986 = vmatpush1.msra.mxu1 %v2943_v55  ;;  %v2979_v54 = vld [vmem:[#allocation13 + $0x3f0] sm:$0xff]  ;;  %v2751_v55 = vld [vmem:[#allocation13 + $0x1d8] sm:$0xff] }
 0x7dc   :  { %2764 = vmatprep.subr.mxu0 %v2715_v56  ;;  %2987 = vmatprep.subr.mxu1 %v2942_v22  ;;  %v2978_v56 = vld [vmem:[#allocation13 + $0x3e8] sm:$0xff]  ;;  %v2750_v22 = vld [vmem:[#allocation13 + $0x1d0] sm:$0xff] }
 0x7dd   :  { %2765 = vmatpush1.msra.mxu0 %v2714_v57  ;;  %2988 = vmatpush1.msra.mxu1 %v2941_v58  ;;  %v2977_v57 = vld [vmem:[#allocation13 + $0x3e0] sm:$0xff]  ;;  %v2749_v58 = vld [vmem:[#allocation13 + $0x1c8] sm:$0xff] }
 0x7de   :  { %2766 = vmatprep.subr.mxu0 %v2713_v59  ;;  %2989 = vmatprep.subr.mxu1 %v2940_v2  ;;  %v2976_v59 = vld [vmem:[#allocation13 + $0x3d8] sm:$0xff]  ;;  %v2748_v2 = vld [vmem:[#allocation13 + $0x1c0] sm:$0xff] }
 0x7df   :  { %2767 = vmatpush1.msra.mxu0 %v2712_v3  ;;  %2990 = vmatpush1.msra.mxu1 %v2939_v38  ;;  %v2975_v3 = vld [vmem:[#allocation13 + $0x3d0] sm:$0xff]  ;;  %v2747_v38 = vld [vmem:[#allocation13 + $0x1b8] sm:$0xff] }
 0x7e0   :  { %2768 = vmatprep.subr.mxu0 %v2711_v40  ;;  %2991 = vmatprep.subr.mxu1 %v2938_v4  ;;  %v2974_v40 = vld [vmem:[#allocation13 + $0x3c8] sm:$0xff]  ;;  %v2746_v4 = vld [vmem:[#allocation13 + $0x1b0] sm:$0xff] }
 0x7e1   :  { %2769 = vmatpush1.msra.mxu0 %v2710_v14  ;;  %2992 = vmatpush1.msra.mxu1 %v2937_v15  ;;  %v2973_v14 = vld [vmem:[#allocation13 + $0x3c0] sm:$0xff]  ;;  %v2745_v15 = vld [vmem:[#allocation13 + $0x1a8] sm:$0xff] }
 0x7e2   :  { %2770 = vmatprep.subr.mxu0 %v2709_v1  ;;  %2993 = vmatprep.subr.mxu1 %v2936_v5  ;;  %v2972_v1 = vld [vmem:[#allocation13 + $0x3b8] sm:$0xff]  ;;  %v2744_v5 = vld [vmem:[#allocation13 + $0x1a0] sm:$0xff] }
 0x7e3   :  { %2771 = vmatpush1.msra.mxu0 %v2708_v6  ;;  %2994 = vmatpush1.msra.mxu1 %v2935_v7  ;;  %v2971_v6 = vld [vmem:[#allocation13 + $0x3b0] sm:$0xff]  ;;  %v2743_v7 = vld [vmem:[#allocation13 + $0x198] sm:$0xff] }
 0x7e4   :  { %2772 = vmatprep.subr.mxu0 %v2707_v8  ;;  %2995 = vmatprep.subr.mxu1 %v2934_v9  ;;  %v2970_v8 = vld [vmem:[#allocation13 + $0x3a8] sm:$0xff]  ;;  %v2742_v9 = vld [vmem:[#allocation13 + $0x190] sm:$0xff] }
 0x7e5   :  { %2773 = vmatpush1.msra.mxu0 %v2706_v10  ;;  %2996 = vmatpush1.msra.mxu1 %v2933_v33  ;;  %v2969_v10 = vld [vmem:[#allocation13 + $0x3a0] sm:$0xff]  ;;  %v2741_v33 = vld [vmem:[#allocation13 + $0x188] sm:$0xff] }
 0x7e6   :  { %2774 = vmatprep.subr.mxu0 %v2705_v35  ;;  %2997 = vmatprep.subr.mxu1 %v2932_v60  ;;  %v2968_v35 = vld [vmem:[#allocation13 + $0x398] sm:$0xff]  ;;  %v2740_v60 = vld [vmem:[#allocation13 + $0x180] sm:$0xff] }
 0x7e7   :  { %2775 = vmatpush1.msra.mxu0 %v2704_v61  ;;  %2998 = vmatpush1.msra.mxu1 %v2931_v62  ;;  %v2967_v61 = vld [vmem:[#allocation13 + $0x390] sm:$0xff]  ;;  %v2739_v62 = vld [vmem:[#allocation13 + $0x178] sm:$0xff] }
 0x7e8   :  { %2776 = vmatprep.subr.mxu0 %v2703_v29  ;;  %2999 = vmatprep.subr.mxu1 %v2930_v63  ;;  %v2966_v29 = vld [vmem:[#allocation13 + $0x388] sm:$0xff]  ;;  %v2738_v63 = vld [vmem:[#allocation13 + $0x170] sm:$0xff] }
 0x7e9   :  { %2777 = vmatpush1.msra.mxu0 %v2702_v27  ;;  %3000 = vmatpush1.msra.mxu1 %v2929_v31  ;;  %v2965_v27 = vld [vmem:[#allocation13 + $0x380] sm:$0xff]  ;;  %v2737_v31 = vld [vmem:[#allocation13 + $0x168] sm:$0xff] }
 0x7ea   :  { %2778 = vmatprep.subr.mxu0 %v2701_v25  ;;  %3001 = vmatprep.subr.mxu1 %v2928_v16  ;;  %v2964_v25 = vld [vmem:[#allocation13 + $0x378] sm:$0xff]  ;;  %v2736_v16 = vld [vmem:[#allocation13 + $0x160] sm:$0xff] }
 0x7eb   :  { %2779 = vmatpush1.msra.mxu0 %v2700_v18  ;;  %3002 = vmatpush1.msra.mxu1 %v2927_v17  ;;  %v2963_v18 = vld [vmem:[#allocation13 + $0x370] sm:$0xff]  ;;  %v2735_v17 = vld [vmem:[#allocation13 + $0x158] sm:$0xff] }
 0x7ec   :  { %2780 = vmatprep.subr.mxu0 %v2699_v23  ;;  %3003 = vmatprep.subr.mxu1 %v2926_v21  ;;  %v2734_v23 = vld [vmem:[#allocation13 + $0x150] sm:$0xff]  ;;  %v2733_v21 = vld [vmem:[#allocation13 + $0x148] sm:$0xff] }
 0x7ed   :  { %2781 = vmatpush1.msra.mxu0 %v2698_v20  ;;  %3004 = vmatpush1.msra.mxu1 %v2925_v19  ;;  %v2732_v20 = vld [vmem:[#allocation13 + $0x140] sm:$0xff]  ;;  %v2731_v19 = vld [vmem:[#allocation13 + $0x138] sm:$0xff] }
 0x7ee   :  { %2782 = vmatprep.subr.mxu0 %v2697_v12  ;;  %3005 = vmatprep.subr.mxu1 %v2924_v24  ;;  %v2730_v12 = vld [vmem:[#allocation13 + $0x130] sm:$0xff]  ;;  %v2729_v24 = vld [vmem:[#allocation13 + $0x128] sm:$0xff] }
 0x7ef   :  { %2783 = vmatpush1.msra.mxu0 %v2696_v13  ;;  %3006 = vmatpush1.msra.mxu1 %v2923_v42  ;;  %v2728_v13 = vld [vmem:[#allocation13 + $0x120] sm:$0xff]  ;;  %v2962_v42 = vld [vmem:[#allocation13 + $0x368] sm:$0xff] }
 0x7f0   :  { %2784 = vmatprep.subr.mxu0 %v2695_v36  ;;  %3007 = vmatprep.subr.mxu1 %v2922_v26  ;;  %v2727_v36 = vld [vmem:[#allocation13 + $0x118] sm:$0xff]  ;;  %v2961_v26 = vld [vmem:[#allocation13 + $0x360] sm:$0xff] }
 0x7f1   :  { %2785 = vmatpush1.msra.mxu0 %v2694_v39  ;;  %3008 = vmatpush1.msra.mxu1 %v2921_v41  ;;  %v2726_v39 = vld [vmem:[#allocation13 + $0x110] sm:$0xff]  ;;  %v2960_v41 = vld [vmem:[#allocation13 + $0x358] sm:$0xff] }
 0x7f2   :  { %2786 = vmatprep.subr.mxu0 %v2693_v37  ;;  %3009 = vmatprep.subr.mxu1 %v2920_v34  ;;  %v2725_v37 = vld [vmem:[#allocation13 + $0x108] sm:$0xff]  ;;  %v2959_v34 = vld [vmem:[#allocation13 + $0x350] sm:$0xff] }
 0x7f3   :  { %2787 = vmatpush1.msra.mxu0 %v2692_v11  ;;  %3010 = vmatpush1.msra.mxu1 %v2919_v44  ;;  %v2724_v11 = vld [vmem:[#allocation13 + $0x100] sm:$0xff]  ;;  %v2958_v44 = vld [vmem:[#allocation13 + $0x348] sm:$0xff] }
 0x7f4   :  { %2788 = vmatprep.subr.mxu0 %v2755_v43  ;;  %3011 = vmatprep.subr.mxu1 %v2918_v46  ;;  %v2957_v43 = vld [vmem:[#allocation13 + $0x340] sm:$0xff]  ;;  %v2956_v46 = vld [vmem:[#allocation13 + $0x338] sm:$0xff] }
 0x7f5   :  { %2789 = vmatpush2.msra.mxu0 %v2754_v47  ;;  %3012 = vmatpush1.msra.mxu1 %v2917_v49  ;;  %v2955_v47 = vld [vmem:[#allocation13 + $0x330] sm:$0xff]  ;;  %v2954_v49 = vld [vmem:[#allocation13 + $0x328] sm:$0xff] }
 0x7f6   :  { %2790 = vmatprep.subr.mxu0 %v2753_v50  ;;  %3013 = vmatprep.subr.mxu1 %v2980_v52  ;;  %v2953_v50 = vld [vmem:[#allocation13 + $0x320] sm:$0xff]  ;;  %v2952_v52 = vld [vmem:[#allocation13 + $0x318] sm:$0xff] }
 0x7f7   :  { %2791 = vmatpush2.msra.mxu0 %v2752_v53  ;;  %3014 = vmatpush2.msra.mxu1 %v2979_v54  ;;  %v2951_v53 = vld [vmem:[#allocation13 + $0x310] sm:$0xff]  ;;  %v2950_v54 = vld [vmem:[#allocation13 + $0x308] sm:$0xff] }
 0x7f8   :  { %2792 = vmatprep.subr.mxu0 %v2751_v55  ;;  %3015 = vmatprep.subr.mxu1 %v2978_v56  ;;  %v2949_v55 = vld [vmem:[#allocation13 + $0x300] sm:$0xff] }
 0x7f9   :  { %2793 = vmatpush2.msra.mxu0 %v2750_v22  ;;  %3016 = vmatpush2.msra.mxu1 %v2977_v57 }
 0x7fa   :  { %2794 = vmatprep.subr.mxu0 %v2749_v58  ;;  %3017 = vmatprep.subr.mxu1 %v2976_v59  ;;  %v3162_v59 = vld [vmem:[#allocation13 + $0x4f8] sm:$0xff] }
 0x7fb   :  { %2795 = vmatpush2.msra.mxu0 %v2748_v2  ;;  %3018 = vmatpush2.msra.mxu1 %v2975_v3  ;;  %v3161_v2 = vld [vmem:[#allocation13 + $0x4f0] sm:$0xff]  ;;  %v3160_v3 = vld [vmem:[#allocation13 + $0x4e8] sm:$0xff] }
 0x7fc   :  { %2796 = vmatprep.subr.mxu0 %v2747_v38  ;;  %3019 = vmatprep.subr.mxu1 %v2974_v40  ;;  %v3159_v38 = vld [vmem:[#allocation13 + $0x4e0] sm:$0xff]  ;;  %v3158_v40 = vld [vmem:[#allocation13 + $0x4d8] sm:$0xff] }
 0x7fd   :  { %2797 = vmatpush2.msra.mxu0 %v2746_v4  ;;  %3020 = vmatpush2.msra.mxu1 %v2973_v14  ;;  %v3157_v4 = vld [vmem:[#allocation13 + $0x4d0] sm:$0xff]  ;;  %v3155_v14 = vld [vmem:[#allocation13 + $0x4c0] sm:$0xff] }
 0x7fe   :  { %2798 = vmatprep.subr.mxu0 %v2745_v15  ;;  %3021 = vmatprep.subr.mxu1 %v2972_v1  ;;  %v3154_v15 = vld [vmem:[#allocation13 + $0x4b8] sm:$0xff]  ;;  %v3152_v1 = vld [vmem:[#allocation13 + $0x4a8] sm:$0xff] }
 0x7ff   :  { %2799 = vmatpush2.msra.mxu0 %v2744_v5  ;;  %3022 = vmatpush2.msra.mxu1 %v2971_v6  ;;  %v3150_v5 = vld [vmem:[#allocation13 + $0x498] sm:$0xff]  ;;  %v3149_v6 = vld [vmem:[#allocation13 + $0x490] sm:$0xff] }
 0x800   :  { %2800 = vmatprep.subr.mxu0 %v2743_v7  ;;  %3023 = vmatprep.subr.mxu1 %v2970_v8  ;;  %v3148_v7 = vld [vmem:[#allocation13 + $0x488] sm:$0xff]  ;;  %v3147_v8 = vld [vmem:[#allocation13 + $0x480] sm:$0xff] }
 0x801   :  { %2801 = vmatpush2.msra.mxu0 %v2742_v9  ;;  %3024 = vmatpush2.msra.mxu1 %v2969_v10  ;;  %v3146_v9 = vld [vmem:[#allocation13 + $0x478] sm:$0xff]  ;;  %v3145_v10 = vld [vmem:[#allocation13 + $0x470] sm:$0xff] }
 0x802   :  { %2802 = vmatprep.subr.mxu0 %v2741_v33  ;;  %3025 = vmatprep.subr.mxu1 %v2968_v35  ;;  %v3144_v33 = vld [vmem:[#allocation13 + $0x468] sm:$0xff]  ;;  %v3143_v35 = vld [vmem:[#allocation13 + $0x460] sm:$0xff] }
 0x803   :  { %2803 = vmatpush2.msra.mxu0 %v2740_v60  ;;  %3026 = vmatpush2.msra.mxu1 %v2967_v61  ;;  %v3142_v60 = vld [vmem:[#allocation13 + $0x458] sm:$0xff]  ;;  %v3141_v61 = vld [vmem:[#allocation13 + $0x450] sm:$0xff] }
 0x804   :  { %2804 = vmatprep.subr.mxu0 %v2739_v62  ;;  %3027 = vmatprep.subr.mxu1 %v2966_v29  ;;  %v3140_v62 = vld [vmem:[#allocation13 + $0x448] sm:$0xff]  ;;  %v3139_v29 = vld [vmem:[#allocation13 + $0x440] sm:$0xff] }
 0x805   :  { %2805 = vmatpush2.msra.mxu0 %v2738_v63  ;;  %3028 = vmatpush2.msra.mxu1 %v2965_v27  ;;  %v3138_v63 = vld [vmem:[#allocation13 + $0x438] sm:$0xff]  ;;  %v3137_v27 = vld [vmem:[#allocation13 + $0x430] sm:$0xff] }
 0x806   :  { %2806 = vmatprep.subr.mxu0 %v2737_v31  ;;  %3029 = vmatprep.subr.mxu1 %v2964_v25  ;;  %v3136_v31 = vld [vmem:[#allocation13 + $0x428] sm:$0xff]  ;;  %v3135_v25 = vld [vmem:[#allocation13 + $0x420] sm:$0xff] }
 0x807   :  { %2807 = vmatpush2.msra.mxu0 %v2736_v16  ;;  %3030 = vmatpush2.msra.mxu1 %v2963_v18  ;;  %v3134_v16 = vld [vmem:[#allocation13 + $0x418] sm:$0xff]  ;;  %v3133_v18 = vld [vmem:[#allocation13 + $0x410] sm:$0xff] }
 0x808   :  { %2808 = vmatprep.subr.mxu0 %v2735_v17  ;;  %3031 = vmatprep.subr.mxu1 %v2962_v42  ;;  %v3132_v17 = vld [vmem:[#allocation13 + $0x408] sm:$0xff] }
 0x809   :  { %2809 = vmatpush2.msra.mxu0 %v2734_v23  ;;  %3032 = vmatpush2.msra.mxu1 %v2961_v26  ;;  %v3131_v23 = vld [vmem:[#allocation13 + $0x400] sm:$0xff]  ;;  %v3188_v42 = vld [vmem:[#allocation13 + $0x5c8] sm:$0xff]  ;;  %v3186_v26 = vld [vmem:[#allocation13 + $0x5b8] sm:$0xff] }
 0x80a   :  { %2810 = vmatprep.subr.mxu0 %v2733_v21  ;;  %3033 = vmatprep.subr.mxu1 %v2960_v41  ;;  %v3194_v21 = vld [vmem:[#allocation13 + $0x5f8] sm:$0xff]  ;;  %v3184_v41 = vld [vmem:[#allocation13 + $0x5a8] sm:$0xff] }
 0x80b   :  { %2811 = vmatpush2.msra.mxu0 %v2732_v20  ;;  %3034 = vmatpush2.msra.mxu1 %v2959_v34  ;;  %v3193_v20 = vld [vmem:[#allocation13 + $0x5f0] sm:$0xff]  ;;  %v3182_v34 = vld [vmem:[#allocation13 + $0x598] sm:$0xff] }
 0x80c   :  { %2812 = vmatprep.subr.mxu0 %v2731_v19  ;;  %3035 = vmatprep.subr.mxu1 %v2958_v44  ;;  %v3192_v19 = vld [vmem:[#allocation13 + $0x5e8] sm:$0xff] }
 0x80d   :  { %2813 = vmatpush2.msra.mxu0 %v2730_v12  ;;  %3036 = vmatpush2.msra.mxu1 %v2957_v43  ;;  %v3191_v12 = vld [vmem:[#allocation13 + $0x5e0] sm:$0xff]  ;;  %v3180_v44 = vld [vmem:[#allocation13 + $0x588] sm:$0xff] }
 0x80e   :  { %2814 = vmatprep.subr.mxu0 %v2729_v24  ;;  %3037 = vmatprep.subr.mxu1 %v2956_v46  ;;  %v3190_v24 = vld [vmem:[#allocation13 + $0x5d8] sm:$0xff]  ;;  %v3179_v43 = vld [vmem:[#allocation13 + $0x580] sm:$0xff] }
 0x80f   :  { %2815 = vmatpush2.msra.mxu0 %v2728_v13  ;;  %3038 = vmatpush2.msra.mxu1 %v2955_v47  ;;  %v3189_v13 = vld [vmem:[#allocation13 + $0x5d0] sm:$0xff]  ;;  %v3178_v46 = vld [vmem:[#allocation13 + $0x578] sm:$0xff] }
 0x810   :  { %2816 = vmatprep.subr.mxu0 %v2727_v36  ;;  %3039 = vmatprep.subr.mxu1 %v2954_v49  ;;  %v3187_v36 = vld [vmem:[#allocation13 + $0x5c0] sm:$0xff]  ;;  %v3177_v47 = vld [vmem:[#allocation13 + $0x570] sm:$0xff]  ;;  %v3176_v49 = vld [vmem:[#allocation13 + $0x568] sm:$0xff] }
 0x811   :  { %2817 = vmatpush2.msra.mxu0 %v2726_v39  ;;  %3040 = vmatpush2.msra.mxu1 %v2953_v50  ;;  %v3185_v39 = vld [vmem:[#allocation13 + $0x5b0] sm:$0xff]  ;;  %v3175_v50 = vld [vmem:[#allocation13 + $0x560] sm:$0xff] }
 0x812   :  { %2818 = vmatprep.subr.mxu0 %v2725_v37  ;;  %3041 = vmatprep.subr.mxu1 %v2952_v52  ;;  %v3183_v37 = vld [vmem:[#allocation13 + $0x5a0] sm:$0xff]  ;;  %v3174_v52 = vld [vmem:[#allocation13 + $0x558] sm:$0xff] }
 0x813   :  { %2819 = vmatpush2.msra.mxu0 %v2724_v11  ;;  %3042 = vmatpush2.msra.mxu1 %v2951_v53  ;;  %v3181_v11 = vld [vmem:[#allocation13 + $0x590] sm:$0xff] }
 0x814   :  { %4447 = vmatprep.subr.msk.mxu0 %vm2614_vm4, %v6610_v32  ;;  %3043 = vmatprep.subr.mxu1 %v2950_v54  ;;  %v3055_v32 = vld [vmem:[#allocation11 + $0x10] sm:$0x3f]  ;;  %v3173_v53 = vld [vmem:[#allocation13 + $0x550] sm:$0xff]  ;;  %v3172_v54 = vld [vmem:[#allocation13 + $0x548] sm:$0xff] }
 0x815   :  { %3044 = vmatpush2.msra.mxu1 %v2949_v55  ;;  %v3171_v55 = vld [vmem:[#allocation13 + $0x540] sm:$0xff] }
 0x894   :  { %v2687_v56 = vpop.f32.mrf.mxu0 }
 0x895   :  { %v2911_v22 = vpop.f32.mrf.mxu1 }
 0x896   :  { %v2689_v57 = vpop.f32.mrf.mxu0 }
 0x897   :  { %2820 = vmatprep.mubr.f32.mxu0 %v2689_v57  ;;  %v2913_v58 = vpop.f32.mrf.mxu1  ;;  %v3168_v57 = vld [vmem:[#allocation13 + $0x528] sm:$0xff] }
 0x898   :  { %2821 = vmatmul.mubr.f32.vlgmr.msra.gmra.mxu0 %v2687_v56  ;;  %3045 = vmatprep.mubr.f32.mxu1 %v2913_v58  ;;  %v3170_v56 = vld [vmem:[#allocation13 + $0x538] sm:$0xff]  ;;  %v3167_v58 = vld [vmem:[#allocation13 + $0x520] sm:$0xff] }
 0x899   :  { %4448 = vmatpush1.msk.msra.mxu0 %vm2614_vm4, %v6612_v30  ;;  %3123 = vmatprep.mubr.f32.mxu0 %v7501_v0  ;;  %v3156_v30 = vld [vmem:[#allocation13 + $0x4c8] sm:$0xff]  ;;  %v6999_v0 = vld [vmem:[%s7491_s13] sm:$0xff] }
 0x89a   :  { %3089 = vmatprep.subr.mxu0 %v6614_v28  ;;  %3046 = vmatmul.mubr.f32.vlgmr.msra.gmra.mxu1 %v2911_v22  ;;  %v3153_v28 = vld [vmem:[#allocation13 + $0x4b0] sm:$0xff] }
 0x89b   :  { %3090 = vmatpush1.msra.mxu0 %v6620_v45  ;;  %v3151_v45 = vld [vmem:[#allocation13 + $0x4a0] sm:$0xff]  ;;  %v3169_v22 = vld [vmem:[#allocation13 + $0x530] sm:$0xff] }
 0x89c   :  { %4449 = vmatmul.mubr.msk.f32.vlgmr.msra.gmra.mxu0 %vm2610_vm5, %v3055_v32  ;;  %3195 = vmatprep.subr.mxu0 %v3162_v59  ;;  %v3166_v32 = vld [vmem:[#allocation13 + $0x518] sm:$0xff]  ;;  %v3165_v59 = vld [vmem:[#allocation13 + $0x510] sm:$0xff] }
 0x89d   :  { %3196 = vmatpush1.msra.mxu0 %v3161_v2  ;;  %v3164_v2 = vld [vmem:[#allocation13 + $0x508] sm:$0xff] }
 0x89e   :  { %3197 = vmatprep.subr.mxu0 %v3160_v3  ;;  %v3163_v3 = vld [vmem:[#allocation13 + $0x500] sm:$0xff] }
 0x89f   :  { %3198 = vmatpush1.msra.mxu0 %v3159_v38  ;;  %v6643_v38 = vld [vmem:[%s7491_s13 + $0xf8] sm:$0xff] }
 0x8a0   :  { %3199 = vmatprep.subr.mxu0 %v3158_v40  ;;  %v6648_v40 = vld [vmem:[%s7491_s13 + $0x78] sm:$0xff]  ;;  %4454 = vmatprep.subr.mxu1 %v6643_v38 }
 0x8a1   :  { %3200 = vmatpush1.msra.mxu0 %v3157_v4  ;;  %v6653_v4 = vld [vmem:[%s7491_s13 + $0xf0] sm:$0xff]  ;;  %4455 = vmatpush3.msra.mxu1 %v6648_v40 }
 0x8a2   :  { %3201 = vmatprep.subr.mxu0 %v3156_v30  ;;  %v6659_v30 = vld [vmem:[%s7491_s13 + $0x70] sm:$0xff]  ;;  %4456 = vmatprep.subr.mxu1 %v6653_v4 }
 0x8a3   :  { %3202 = vmatpush1.msra.mxu0 %v3155_v14  ;;  %v6664_v14 = vld [vmem:[%s7491_s13 + $0x2f8] sm:$0xff]  ;;  %4457 = vmatpush3.msra.mxu1 %v6659_v30 }
 0x8a4   :  { %3203 = vmatprep.subr.mxu0 %v3154_v15  ;;  %v6671_v15 = vld [vmem:[%s7491_s13 + $0xe8] sm:$0xff] }
 0x8a5   :  { %3204 = vmatpush1.msra.mxu0 %v3153_v28  ;;  %v6677_v28 = vld [vmem:[%s7491_s13 + $0x68] sm:$0xff]  ;;  %4458 = vmatprep.subr.mxu1 %v6671_v15 }
 0x8a6   :  { %3205 = vmatprep.subr.mxu0 %v3152_v1  ;;  %v6683_v1 = vld [vmem:[%s7491_s13 + $0xe0] sm:$0xff]  ;;  %4459 = vmatpush3.msra.mxu1 %v6677_v28 }
 0x8a7   :  { %3206 = vmatpush1.msra.mxu0 %v3151_v45  ;;  %v6689_v45 = vld [vmem:[%s7491_s13 + $0x60] sm:$0xff]  ;;  %4460 = vmatprep.subr.mxu1 %v6683_v1 }
 0x8a8   :  { %3207 = vmatprep.subr.mxu0 %v3150_v5  ;;  %v6695_v5 = vld [vmem:[%s7491_s13 + $0xd8] sm:$0xff]  ;;  %4461 = vmatpush3.msra.mxu1 %v6689_v45 }
 0x8a9   :  { %3208 = vmatpush1.msra.mxu0 %v3149_v6  ;;  %v6701_v6 = vld [vmem:[%s7491_s13 + $0x58] sm:$0xff]  ;;  %4462 = vmatprep.subr.mxu1 %v6695_v5 }
 0x8aa   :  { %3209 = vmatprep.subr.mxu0 %v3148_v7  ;;  %v6707_v7 = vld [vmem:[%s7491_s13 + $0xd0] sm:$0xff]  ;;  %4463 = vmatpush3.msra.mxu1 %v6701_v6 }
 0x8ab   :  { %3210 = vmatpush1.msra.mxu0 %v3147_v8  ;;  %v6713_v8 = vld [vmem:[%s7491_s13 + $0x50] sm:$0xff]  ;;  %4464 = vmatprep.subr.mxu1 %v6707_v7 }
 0x8ac   :  { %3211 = vmatprep.subr.mxu0 %v3146_v9  ;;  %v6719_v9 = vld [vmem:[%s7491_s13 + $0xc8] sm:$0xff]  ;;  %4465 = vmatpush3.msra.mxu1 %v6713_v8 }
 0x8ad   :  { %3212 = vmatpush1.msra.mxu0 %v3145_v10  ;;  %v6725_v10 = vld [vmem:[%s7491_s13 + $0x48] sm:$0xff]  ;;  %4466 = vmatprep.subr.mxu1 %v6719_v9 }
 0x8ae   :  { %3213 = vmatprep.subr.mxu0 %v3144_v33  ;;  %v6731_v33 = vld [vmem:[%s7491_s13 + $0xc0] sm:$0xff]  ;;  %4467 = vmatpush3.msra.mxu1 %v6725_v10 }
 0x8af   :  { %3214 = vmatpush1.msra.mxu0 %v3143_v35  ;;  %v6737_v35 = vld [vmem:[%s7491_s13 + $0x40] sm:$0xff]  ;;  %4468 = vmatprep.subr.mxu1 %v6731_v33 }
 0x8b0   :  { %3215 = vmatprep.subr.mxu0 %v3142_v60  ;;  %v6743_v60 = vld [vmem:[%s7491_s13 + $0xb8] sm:$0xff]  ;;  %4469 = vmatpush3.msra.mxu1 %v6737_v35 }
 0x8b1   :  { %3216 = vmatpush1.msra.mxu0 %v3141_v61  ;;  %v6749_v61 = vld [vmem:[%s7491_s13 + $0x38] sm:$0xff]  ;;  %4470 = vmatprep.subr.mxu1 %v6743_v60 }
 0x8b2   :  { %3217 = vmatprep.subr.mxu0 %v3140_v62  ;;  %v6755_v62 = vld [vmem:[%s7491_s13 + $0xb0] sm:$0xff]  ;;  %4471 = vmatpush3.msra.mxu1 %v6749_v61 }
 0x8b3   :  { %3218 = vmatpush1.msra.mxu0 %v3139_v29  ;;  %v6761_v29 = vld [vmem:[%s7491_s13 + $0x30] sm:$0xff]  ;;  %4472 = vmatprep.subr.mxu1 %v6755_v62 }
 0x8b4   :  { %3219 = vmatprep.subr.mxu0 %v3138_v63  ;;  %v6767_v63 = vld [vmem:[%s7491_s13 + $0xa8] sm:$0xff]  ;;  %4473 = vmatpush3.msra.mxu1 %v6761_v29 }
 0x8b5   :  { %3220 = vmatpush1.msra.mxu0 %v3137_v27  ;;  %v6773_v27 = vld [vmem:[%s7491_s13 + $0x28] sm:$0xff]  ;;  %4474 = vmatprep.subr.mxu1 %v6767_v63 }
 0x8b6   :  { %3221 = vmatprep.subr.mxu0 %v3136_v31  ;;  %v6779_v31 = vld [vmem:[%s7491_s13 + $0xa0] sm:$0xff]  ;;  %4475 = vmatpush3.msra.mxu1 %v6773_v27 }
 0x8b7   :  { %3222 = vmatpush1.msra.mxu0 %v3135_v25  ;;  %v6785_v25 = vld [vmem:[%s7491_s13 + $0x20] sm:$0xff]  ;;  %4476 = vmatprep.subr.mxu1 %v6779_v31 }
 0x8b8   :  { %3223 = vmatprep.subr.mxu0 %v3134_v16  ;;  %v6791_v16 = vld [vmem:[%s7491_s13 + $0x98] sm:$0xff]  ;;  %4477 = vmatpush3.msra.mxu1 %v6785_v25 }
 0x8b9   :  { %3224 = vmatpush1.msra.mxu0 %v3133_v18  ;;  %4478 = vmatprep.subr.mxu1 %v6791_v16 }
 0x8ba   :  { %3225 = vmatprep.subr.mxu0 %v3132_v17 }
 0x8bb   :  { %3226 = vmatpush1.msra.mxu0 %v3131_v23 }
 0x8bc   :  { %3227 = vmatprep.subr.mxu0 %v3194_v21 }
 0x8bd   :  { %3228 = vmatpush2.msra.mxu0 %v3193_v20  ;;  %v6803_v20 = vld [vmem:[%s7491_s13 + $0x278] sm:$0xff] }
 0x8be   :  { %3229 = vmatprep.subr.mxu0 %v3192_v19  ;;  %v6808_v19 = vld [vmem:[%s7491_s13 + $0x2f0] sm:$0xff] }
 0x8bf   :  { %3230 = vmatpush2.msra.mxu0 %v3191_v12  ;;  %v6813_v12 = vld [vmem:[%s7491_s13 + $0x270] sm:$0xff] }
 0x8c0   :  { %3231 = vmatprep.subr.mxu0 %v3190_v24  ;;  %v6819_v24 = vld [vmem:[%s7491_s13 + $0x2e8] sm:$0xff] }
 0x8c1   :  { %3232 = vmatpush2.msra.mxu0 %v3189_v13  ;;  %v6825_v13 = vld [vmem:[%s7491_s13 + $0x268] sm:$0xff] }
 0x8c2   :  { %3233 = vmatprep.subr.mxu0 %v3188_v42  ;;  %v6831_v42 = vld [vmem:[%s7491_s13 + $0x2e0] sm:$0xff] }
 0x8c3   :  { %3234 = vmatpush2.msra.mxu0 %v3187_v36  ;;  %v6837_v36 = vld [vmem:[%s7491_s13 + $0x260] sm:$0xff] }
 0x8c4   :  { %3235 = vmatprep.subr.mxu0 %v3186_v26  ;;  %v6843_v26 = vld [vmem:[%s7491_s13 + $0x2d8] sm:$0xff] }
 0x8c5   :  { %3236 = vmatpush2.msra.mxu0 %v3185_v39  ;;  %v6849_v39 = vld [vmem:[%s7491_s13 + $0x258] sm:$0xff] }
 0x8c6   :  { %3237 = vmatprep.subr.mxu0 %v3184_v41  ;;  %v6855_v41 = vld [vmem:[%s7491_s13 + $0x2d0] sm:$0xff] }
 0x8c7   :  { %3238 = vmatpush2.msra.mxu0 %v3183_v37  ;;  %v6861_v37 = vld [vmem:[%s7491_s13 + $0x250] sm:$0xff] }
 0x8c8   :  { %3239 = vmatprep.subr.mxu0 %v3182_v34  ;;  %v6867_v34 = vld [vmem:[%s7491_s13 + $0x2c8] sm:$0xff] }
 0x8c9   :  { %3240 = vmatpush2.msra.mxu0 %v3181_v11  ;;  %7570 = vst [vmem:[#allocation23_spill] sm:$0xff] %v6867_v34  ;;  %v6873_v11 = vld [vmem:[%s7491_s13 + $0x248] sm:$0xff] }
 0x8ca   :  { %3241 = vmatprep.subr.mxu0 %v3180_v44  ;;  %7571 = vst [vmem:[#allocation24_spill] sm:$0xff] %v6873_v11  ;;  %v6879_v44 = vld [vmem:[%s7491_s13 + $0x2c0] sm:$0xff] }
 0x8cb   :  { %3242 = vmatpush2.msra.mxu0 %v3179_v43  ;;  %7572 = vst [vmem:[#allocation25_spill] sm:$0xff] %v6879_v44  ;;  %v6885_v43 = vld [vmem:[%s7491_s13 + $0x240] sm:$0xff] }
 0x8cc   :  { %3243 = vmatprep.subr.mxu0 %v3178_v46  ;;  %7573 = vst [vmem:[#allocation26_spill] sm:$0xff] %v6885_v43  ;;  %v6891_v46 = vld [vmem:[%s7491_s13 + $0x2b8] sm:$0xff] }
 0x8cd   :  { %3244 = vmatpush2.msra.mxu0 %v3177_v47  ;;  %7574 = vst [vmem:[#allocation27_spill] sm:$0xff] %v6891_v46  ;;  %v6897_v47 = vld [vmem:[%s7491_s13 + $0x238] sm:$0xff] }
 0x8ce   :  { %3245 = vmatprep.subr.mxu0 %v3176_v49  ;;  %7575 = vst [vmem:[#allocation28_spill] sm:$0xff] %v6897_v47  ;;  %v6903_v49 = vld [vmem:[%s7491_s13 + $0x2b0] sm:$0xff] }
 0x8cf   :  { %3246 = vmatpush2.msra.mxu0 %v3175_v50  ;;  %7576 = vst [vmem:[#allocation29_spill] sm:$0xff] %v6903_v49  ;;  %v6909_v50 = vld [vmem:[%s7491_s13 + $0x230] sm:$0xff] }
 0x8d0   :  { %3247 = vmatprep.subr.mxu0 %v3174_v52  ;;  %7577 = vst [vmem:[#allocation30_spill] sm:$0xff] %v6909_v50  ;;  %v6915_v52 = vld [vmem:[%s7491_s13 + $0x2a8] sm:$0xff] }
 0x8d1   :  { %3248 = vmatpush2.msra.mxu0 %v3173_v53  ;;  %7578 = vst [vmem:[#allocation31_spill] sm:$0xff] %v6915_v52  ;;  %v6921_v53 = vld [vmem:[%s7491_s13 + $0x228] sm:$0xff] }
 0x8d2   :  { %3249 = vmatprep.subr.mxu0 %v3172_v54  ;;  %7579 = vst [vmem:[#allocation32_spill] sm:$0xff] %v6921_v53  ;;  %v6929_v54 = vld [vmem:[%s7491_s13 + $0x18] sm:$0xff] }
 0x8d3   :  { %3250 = vmatpush2.msra.mxu0 %v3171_v55  ;;  %v6934_v55 = vld [vmem:[%s7491_s13 + $0x2a0] sm:$0xff]  ;;  %4479 = vmatpush3.msra.mxu1 %v6929_v54 }
 0x8d4   :  { %3251 = vmatprep.subr.mxu0 %v3170_v56  ;;  %7580 = vst [vmem:[#allocation33_spill] sm:$0xff] %v6934_v55  ;;  %v6941_v56 = vld [vmem:[%s7491_s13 + $0x90] sm:$0xff] }
 0x8d5   :  { %3252 = vmatpush2.msra.mxu0 %v3169_v22  ;;  %v6946_v22 = vld [vmem:[%s7491_s13 + $0x220] sm:$0xff]  ;;  %4480 = vmatprep.subr.mxu1 %v6941_v56 }
 0x8d6   :  { %3253 = vmatprep.subr.mxu0 %v3168_v57  ;;  %7581 = vst [vmem:[#allocation34_spill] sm:$0xff] %v6946_v22  ;;  %v6953_v57 = vld [vmem:[%s7491_s13 + $0x10] sm:$0xff] }
 0x8d7   :  { %3254 = vmatpush2.msra.mxu0 %v3167_v58  ;;  %v6958_v58 = vld [vmem:[%s7491_s13 + $0x298] sm:$0xff]  ;;  %4481 = vmatpush3.msra.mxu1 %v6953_v57 }
 0x8d8   :  { %3255 = vmatprep.subr.mxu0 %v3166_v32  ;;  %7582 = vst [vmem:[#allocation35_spill] sm:$0xff] %v6958_v58  ;;  %v6965_v32 = vld [vmem:[%s7491_s13 + $0x88] sm:$0xff] }
 0x8d9   :  { %3256 = vmatpush2.msra.mxu0 %v3165_v59  ;;  %v6970_v59 = vld [vmem:[%s7491_s13 + $0x218] sm:$0xff]  ;;  %4482 = vmatprep.subr.mxu1 %v6965_v32 }
 0x8da   :  { %3257 = vmatprep.subr.mxu0 %v3164_v2  ;;  %7583 = vst [vmem:[#allocation36_spill] sm:$0xff] %v6970_v59  ;;  %v6977_v2 = vld [vmem:[%s7491_s13 + $0x8] sm:$0xff] }
 0x8db   :  { %3258 = vmatpush2.msra.mxu0 %v3163_v3  ;;  %v6982_v3 = vld [vmem:[%s7491_s13 + $0x290] sm:$0xff]  ;;  %4483 = vmatpush3.msra.mxu1 %v6977_v2 }
 0x8dc   :  { %4524 = vmatprep.subr.mxu0 %v6664_v14  ;;  %7584 = vst [vmem:[#allocation37_spill] sm:$0xff] %v6982_v3 }
 0x958   :  { %v6796_v18 = vpop.f32.mrf.mxu0 }
 0x95a   :  { %v6798_v17 = vpop.f32.mrf.mxu0 }
 0x95c   :  { %v3125_v23 = vpop.f32.mrf.mxu0 }
 0x95e   :  { %v3127_v21 = vpop.f32.mrf.mxu0 }
 0x95f   :  { %3259 = vmatprep.mubr.f32.mxu0 %v3127_v21  ;;  %v6994_v21 = vld [vmem:[%s7491_s13 + $0x210] sm:$0xff] }
 0x960   :  { %3260 = vmatmul.mubr.f32.vlgmr.msra.gmra.mxu0 %v3125_v23  ;;  %v6989_v23 = vld [vmem:[%s7491_s13 + $0x80] sm:$0xff]  ;;  %7585 = vst [vmem:[#allocation38_spill] sm:$0xff] %v6994_v21 }
 0x961   :  { %4525 = vmatpush3.msra.mxu0 %v6803_v20  ;;  %4484 = vmatprep.subr.mxu1 %v6989_v23 }
 0x962   :  { %4526 = vmatprep.subr.mxu0 %v6808_v19  ;;  %4485 = vmatpush3.msra.mxu1 %v6999_v0 }
 0x963   :  { %4527 = vmatpush3.msra.mxu0 %v6813_v12 }
 0x964   :  { %4528 = vmatprep.subr.mxu0 %v6819_v24 }
 0x965   :  { %4529 = vmatpush3.msra.mxu0 %v6825_v13 }
 0x966   :  { %4530 = vmatprep.subr.mxu0 %v6831_v42 }
 0x967   :  { %4531 = vmatpush3.msra.mxu0 %v6837_v36 }
 0x968   :  { %4532 = vmatprep.subr.mxu0 %v6843_v26 }
 0x969   :  { %4533 = vmatpush3.msra.mxu0 %v6849_v39 }
 0x96a   :  { %4534 = vmatprep.subr.mxu0 %v6855_v41 }
 0x96b   :  { %4535 = vmatpush3.msra.mxu0 %v6861_v37 }
 0x96c   :  { %4536 = vmatprep.subr.mxu0 %v6867_v34 }
 0x96d   :  { %4537 = vmatpush3.msra.mxu0 %v6873_v11 }
 0x96e   :  { %4538 = vmatprep.subr.mxu0 %v6879_v44 }
 0x96f   :  { %4539 = vmatpush3.msra.mxu0 %v6885_v43 }
 0x970   :  { %4540 = vmatprep.subr.mxu0 %v6891_v46 }
 0x971   :  { %4541 = vmatpush3.msra.mxu0 %v6897_v47 }
 0x972   :  { %4542 = vmatprep.subr.mxu0 %v6903_v49 }
 0x973   :  { %4543 = vmatpush3.msra.mxu0 %v6909_v50 }
 0x974   :  { %4544 = vmatprep.subr.mxu0 %v6915_v52 }
 0x975   :  { %4545 = vmatpush3.msra.mxu0 %v6921_v53  ;;  %v3047_v53 = vpop.f32.mrf.mxu1 }
 0x976   :  { %4546 = vmatprep.subr.mxu0 %v6934_v55  ;;  %v2608_v55 = vld [vmem:[#allocation14] sm:$0x3] }
 0x977   :  { %4547 = vmatpush3.msra.mxu0 %v6946_v22  ;;  %v7591_v22 = vmov 0.0  }
 0x978   :  { %4548 = vmatprep.subr.mxu0 %v6958_v58  ;;  %v7018_v58 = vld [vmem:[%s7491_s13 + $0x208] sm:$0xff] }
 0x979   :  { %4549 = vmatpush3.msra.mxu0 %v6970_v59  ;;  %v7013_v59 = vld [vmem:[%s7491_s13 + $0x1f8] sm:$0xff]  ;;  %7588 = vst [vmem:[#allocation41_spill] sm:$0xff] %v7018_v58 }
 0x97a   :  { %4550 = vmatprep.subr.mxu0 %v6982_v3  ;;  %v7006_v3 = vld [vmem:[%s7491_s13 + $0x288] sm:$0xff]  ;;  %7587 = vst [vmem:[#allocation40_spill] sm:$0xff] %v7013_v59  ;;  %4489 = vmatprep.subr.mxu1 %v7013_v59  ;;  %v2831_v59 = vrot.slane %v2608_v55, %v5864_v48  ;;  %v7046_v48 = vld [vmem:[%s7491_s13 + $0x178] sm:$0xff] }
 0x97b   :  { %4551 = vmatpush3.msra.mxu0 %v6994_v21  ;;  %7586 = vst [vmem:[#allocation39_spill] sm:$0xff] %v7006_v3  ;;  %v7025_v21 = vld [vmem:[%s7491_s13 + $0x280] sm:$0xff] }
 0x97c   :  { %4552 = vmatprep.subr.mxu0 %v7006_v3  ;;  %7589 = vst [vmem:[#allocation42_spill] sm:$0xff] %v7025_v21  ;;  %v7031_v3 = vld [vmem:[%s7491_s13 + $0x200] sm:$0xff]  ;;  %v2838_v52 = vadd.f32 %v2831_v59, %v6796_v18  ;;  %v7121_v59 = vld [vmem:[%s7491_s13 + $0x148] sm:$0xff] }
 0x97d   :  { %4553 = vmatpush3.msra.mxu0 %v7018_v58  ;;  %7590 = vst [vmem:[#allocation43_spill] sm:$0xff] %v7031_v3  ;;  %v2835_v58 = vrot.slane %v2608_v55, %v5866_v51  ;;  %v7052_v51 = vld [vmem:[%s7491_s13 + $0x1f0] sm:$0xff]  ;;  %7601 = vst [vmem:[#allocation53_spill] sm:$0xff] %v7121_v59 }
 0x97e   :  { %4554 = vmatprep.subr.mxu0 %v7025_v21  ;;  %v3049_v21 = vpop.f32.mrf.mxu1  ;;  %v3052_v49 = vadd.f32 %v3047_v53, %v2838_v52  ;;  %v7097_v52 = vld [vmem:[%s7491_s13 + $0x158] sm:$0xff]  ;;  %v7103_v53 = vld [vmem:[%s7491_s13 + $0x1d0] sm:$0xff] }
 0x97f   :  { %4555 = vmatpush3.msra.mxu0 %v7031_v3  ;;  %v2839_v50 = vadd.f32 %v2835_v58, %v6798_v17  ;;  %7597 = vst [vmem:[#allocation49_spill] sm:$0xff] %v7097_v52  ;;  %7598 = vst [vmem:[#allocation50_spill] sm:$0xff] %v7103_v53  ;;  %v7109_v55 = vld [vmem:[%s7491_s13 + $0x150] sm:$0xff]  ;;  %v7115_v58 = vld [vmem:[%s7491_s13 + $0x1c8] sm:$0xff] }
 0x980   :  { %4711 = vmatprep.subr.mxu0 %v7591_v22  ;;  %7599 = vst [vmem:[#allocation51_spill] sm:$0xff] %v7109_v55  ;;  %7600 = vst [vmem:[#allocation52_spill] sm:$0xff] %v7115_v58 }
 0x981   :  { %v3053_v46 = vadd.f32 %v3049_v21, %v2839_v50  ;;  %v7091_v50 = vld [vmem:[%s7491_s13 + $0x1d8] sm:$0xff]  ;;  %v7127_v21 = vld [vmem:[%s7491_s13 + $0x1c0] sm:$0xff] }
 0x982   :  { %7596 = vst [vmem:[#allocation48_spill] sm:$0xff] %v7091_v50  ;;  %7602 = vst [vmem:[#allocation54_spill] sm:$0xff] %v7127_v21 }
 0xa20   :  { %v3261_v47 = vpop.f32.mrf.mxu0 }
 0xa21   :  { %v3266_v43 = vadd.f32 %v3261_v47, %v3052_v49  ;;  %v7079_v47 = vld [vmem:[%s7491_s13 + $0x1e0] sm:$0xff] }
 0xa22   :  { %v3263_v44 = vpop.f32.mrf.mxu0  ;;  %7594 = vst [vmem:[#allocation46_spill] sm:$0xff] %v7079_v47  ;;  %v7085_v49 = vld [vmem:[%s7491_s13 + $0x160] sm:$0xff] }
 0xa23   :  { %v3267_v11 = vadd.f32 %v3263_v44, %v3053_v46  ;;  %v7039_v3 = vmax.f32 %v3266_v43, 0.0  ;;  %v7067_v43 = vld [vmem:[%s7491_s13 + $0x1e8] sm:$0xff]  ;;  %7595 = vst [vmem:[#allocation47_spill] sm:$0xff] %v7085_v49 }
 0xa24   :  { %7592 = vst [vmem:[#allocation44_spill] sm:$0xff] %v7067_v43  ;;  %v7073_v46 = vld [vmem:[%s7491_s13 + $0x168] sm:$0xff] }
 0xa25   :  { %v7041_v34 = vmax.f32 %v3267_v11, 0.0  ;;  %v7060_v11 = vld [vmem:[%s7491_s13 + $0x170] sm:$0xff]  ;;  %v3529_v44 = vrot.slane %v7039_v3, 2  ;;  %7593 = vst [vmem:[#allocation45_spill] sm:$0xff] %v7073_v46 }
 0xa27   :  { %3445 = vmatprep.mubr.f32.mxu1 %v7041_v34  ;;  %v3455_v18 = vrot.slane %v7041_v34, 1  ;;  %v3530_v17 = vrot.slane %v7041_v34, 2 }
 0xa28   :  { %3446 = vmatmul.mubr.f32.vlgmr.msra.gmra.mxu1 %v7039_v3 }
 0xa29   :  { %4490 = vmatpush3.msra.mxu1 %v7046_v48  ;;  %3522 = vmatprep.mubr.f32.mxu1 %v3455_v18  ;;  %v7133_v18 = vld [vmem:[%s7491_s13 + $0x140] sm:$0xff] }
 0xa2a   :  { %4491 = vmatprep.subr.mxu1 %v7052_v51  ;;  %3597 = vmatprep.mubr.f32.mxu0 %v3530_v17  ;;  %7603 = vst [vmem:[#allocation55_spill] sm:$0xff] %v7133_v18  ;;  %v7139_v17 = vld [vmem:[%s7491_s13 + $0x1b8] sm:$0xff] }
 0xa2b   :  { %4492 = vmatpush3.msra.mxu1 %v7060_v11  ;;  %3598 = vmatmul.mubr.f32.vlgmr.msra.gmra.mxu0 %v3529_v44  ;;  %7604 = vst [vmem:[#allocation56_spill] sm:$0xff] %v7139_v17  ;;  %v7145_v44 = vld [vmem:[%s7491_s13 + $0x138] sm:$0xff] }
 0xa2c   :  { %4493 = vmatprep.subr.mxu1 %v7067_v43  ;;  %7605 = vst [vmem:[#allocation57_spill] sm:$0xff] %v7145_v44  ;;  %4719 = vmatprep.mubr.msk.f32.mxu0 %vm4972_vm6, %v7591_v22  ;;  %v3756_v43 = vrot.slane %v7041_v34, 3 }
 0xa2d   :  { %4494 = vmatpush3.msra.mxu1 %v7073_v46 }
 0xa2e   :  { %4495 = vmatprep.subr.mxu1 %v7079_v47 }
 0xa2f   :  { %4496 = vmatpush3.msra.mxu1 %v7085_v49 }
 0xa30   :  { %4497 = vmatprep.subr.mxu1 %v7091_v50 }
 0xa31   :  { %4498 = vmatpush3.msra.mxu1 %v7097_v52 }
 0xa32   :  { %4499 = vmatprep.subr.mxu1 %v7103_v53 }
 0xa33   :  { %4500 = vmatpush3.msra.mxu1 %v7109_v55 }
 0xa34   :  { %4501 = vmatprep.subr.mxu1 %v7115_v58  ;;  %v7151_v58 = vld [vmem:[%s7491_s13 + $0x1b0] sm:$0xff] }
 0xa35   :  { %4502 = vmatpush3.msra.mxu1 %v7121_v59  ;;  %7606 = vst [vmem:[#allocation58_spill] sm:$0xff] %v7151_v58  ;;  %v7157_v59 = vld [vmem:[%s7491_s13 + $0x130] sm:$0xff] }
 0xa36   :  { %4503 = vmatprep.subr.mxu1 %v7127_v21  ;;  %7607 = vst [vmem:[#allocation59_spill] sm:$0xff] %v7157_v59  ;;  %v7163_v21 = vld [vmem:[%s7491_s13 + $0x1a8] sm:$0xff] }
 0xa37   :  { %4504 = vmatpush3.msra.mxu1 %v7133_v18  ;;  %7608 = vst [vmem:[#allocation60_spill] sm:$0xff] %v7163_v21  ;;  %v7169_v18 = vld [vmem:[%s7491_s13 + $0x128] sm:$0xff] }
 0xa38   :  { %4505 = vmatprep.subr.mxu1 %v7139_v17  ;;  %7609 = vst [vmem:[#allocation61_spill] sm:$0xff] %v7169_v18  ;;  %v7175_v17 = vld [vmem:[%s7491_s13 + $0x1a0] sm:$0xff] }
 0xa39   :  { %4506 = vmatpush3.msra.mxu1 %v7145_v44  ;;  %7610 = vst [vmem:[#allocation62_spill] sm:$0xff] %v7175_v17  ;;  %v7181_v44 = vld [vmem:[%s7491_s13 + $0x120] sm:$0xff] }
 0xa3a   :  { %4507 = vmatprep.subr.mxu1 %v7151_v58  ;;  %7611 = vst [vmem:[#allocation63_spill] sm:$0xff] %v7181_v44  ;;  %v7187_v58 = vld [vmem:[%s7491_s13 + $0x198] sm:$0xff] }
 0xa3b   :  { %4508 = vmatpush3.msra.mxu1 %v7157_v59  ;;  %7612 = vst [vmem:[#allocation64_spill] sm:$0xff] %v7187_v58  ;;  %v7193_v59 = vld [vmem:[%s7491_s13 + $0x118] sm:$0xff] }
 0xa3c   :  { %4509 = vmatprep.subr.mxu1 %v7163_v21  ;;  %7613 = vst [vmem:[#allocation65_spill] sm:$0xff] %v7193_v59  ;;  %v7199_v21 = vld [vmem:[%s7491_s13 + $0x190] sm:$0xff] }
 0xa3d   :  { %4510 = vmatpush3.msra.mxu1 %v7169_v18  ;;  %7614 = vst [vmem:[#allocation66_spill] sm:$0xff] %v7199_v21  ;;  %v7205_v18 = vld [vmem:[%s7491_s13 + $0x110] sm:$0xff] }
 0xa3e   :  { %4511 = vmatprep.subr.mxu1 %v7175_v17  ;;  %7615 = vst [vmem:[#allocation67_spill] sm:$0xff] %v7205_v18  ;;  %v7211_v17 = vld [vmem:[%s7491_s13 + $0x188] sm:$0xff] }
 0xa3f   :  { %4512 = vmatpush3.msra.mxu1 %v7181_v44  ;;  %7616 = vst [vmem:[#allocation68_spill] sm:$0xff] %v7211_v17  ;;  %v7217_v44 = vld [vmem:[%s7491_s13 + $0x108] sm:$0xff] }
 0xa40   :  { %4513 = vmatprep.subr.mxu1 %v7187_v58  ;;  %7617 = vst [vmem:[#allocation69_spill] sm:$0xff] %v7217_v44  ;;  %v7223_v58 = vld [vmem:[%s7491_s13 + $0x180] sm:$0xff] }
 0xa41   :  { %4514 = vmatpush3.msra.mxu1 %v7193_v59  ;;  %7618 = vst [vmem:[#allocation70_spill] sm:$0xff] %v7223_v58  ;;  %v7229_v59 = vld [vmem:[%s7491_s13 + $0x100] sm:$0xff] }
 0xa42   :  { %4515 = vmatprep.subr.mxu1 %v7199_v21  ;;  %7619 = vst [vmem:[#allocation71_spill] sm:$0xff] %v7229_v59  ;;  %v3454_v21 = vrot.slane %v7039_v3, 1 }
 0xa43   :  { %4516 = vmatpush3.msra.mxu1 %v7205_v18  ;;  %v7244_v18 = vld [vmem:[%s7493_s15 + $0x30] sm:$0xff] }
 0xa44   :  { %4517 = vmatprep.subr.mxu1 %v7211_v17  ;;  %v7239_v17 = vld [vmem:[%s7493_s15 + $0x38] sm:$0xff]  ;;  %7621 = vst [vmem:[#allocation73_spill] sm:$0xff] %v7244_v18 }
 0xa45   :  { %4518 = vmatpush3.msra.mxu1 %v7217_v44  ;;  %7620 = vst [vmem:[#allocation72_spill] sm:$0xff] %v7239_v17  ;;  %v7313_v44 = vld [vmem:[%s7492_s14] sm:$0x1] }
 0xa46   :  { %4519 = vmatprep.subr.mxu1 %v7223_v58 }
 0xa47   :  { %4520 = vmatpush3.msra.mxu1 %v7229_v59  ;;  %v7260_v59 = vld [vmem:[%s7493_s15 + $0x20] sm:$0xff] }
 0xa48   :  { %3523 = vmatmul.mubr.f32.vlgmr.msra.gmra.mxu1 %v3454_v21  ;;  %4692 = vmatprep.subr.mxu1 %v7591_v22  ;;  %v7251_v21 = vld [vmem:[%s7493_s15 + $0x28] sm:$0xff]  ;;  %7623 = vst [vmem:[#allocation75_spill] sm:$0xff] %v7260_v59 }
 0xa49   :  { %4693 = vmatpush3.msra.mxu1 %v7239_v17  ;;  %7622 = vst [vmem:[#allocation74_spill] sm:$0xff] %v7251_v21  ;;  %v7267_v17 = vld [vmem:[%s7493_s15 + $0x18] sm:$0xff]  ;;  %4708 = vmatprep.mubr.msk.f32.mxu1 %vm4972_vm6, %v7591_v22 }
 0xa4a   :  { %4694 = vmatprep.subr.mxu1 %v7591_v22  ;;  %7624 = vst [vmem:[#allocation76_spill] sm:$0xff] %v7267_v17 }
 0xa4b   :  { %4695 = vmatpush3.msra.mxu1 %v7244_v18 }
 0xa4c   :  { %4696 = vmatprep.subr.mxu1 %v7591_v22 }
 0xa4d   :  { %4697 = vmatpush3.msra.mxu1 %v7251_v21  ;;  %v7274_v21 = vld [vmem:[%s7493_s15 + $0x10] sm:$0xff] }
 0xa4e   :  { %4698 = vmatprep.subr.mxu1 %v7591_v22  ;;  %7625 = vst [vmem:[#allocation77_spill] sm:$0xff] %v7274_v21 }
 0xa4f   :  { %4699 = vmatpush3.msra.mxu1 %v7260_v59  ;;  %v7281_v59 = vld [vmem:[%s7493_s15 + $0x8] sm:$0xff] }
 0xa50   :  { %4700 = vmatprep.subr.mxu1 %v7591_v22  ;;  %7626 = vst [vmem:[#allocation78_spill] sm:$0xff] %v7281_v59 }
 0xa51   :  { %4701 = vmatpush3.msra.mxu1 %v7267_v17  ;;  %v7288_v17 = vld [vmem:[%s7493_s15] sm:$0xff] }
 0xa52   :  { %4702 = vmatprep.subr.mxu1 %v7591_v22  ;;  %7627 = vst [vmem:[#allocation79_spill] sm:$0xff] %v7288_v17 }
 0xa53   :  { %4703 = vmatpush3.msra.mxu1 %v7274_v21  ;;  %v7304_v21 = vld [vmem:[%s7495_s17 + $0x10] sm:$0xff] }
 0xa54   :  { %4704 = vmatprep.subr.mxu1 %v7591_v22  ;;  %7629 = vst [vmem:[#allocation81_spill] sm:$0xff] %v7304_v21 }
 0xa55   :  { %4705 = vmatpush3.msra.mxu1 %v7281_v59  ;;  %v7299_v59 = vld [vmem:[%s7495_s17 + $0x18] sm:$0xff] }
 0xa56   :  { %4706 = vmatprep.subr.mxu1 %v7591_v22  ;;  %7628 = vst [vmem:[#allocation80_spill] sm:$0xff] %v7299_v59  ;;  %4712 = vmatpush3.msra.mxu0 %v7299_v59 }
 0xa57   :  { %4707 = vmatpush3.msra.mxu1 %v7288_v17  ;;  %4713 = vmatprep.subr.mxu0 %v7591_v22 }
 0xa58   :  { %4573 = vmatprep.subr.mxu1 %v6643_v38  ;;  %4714 = vmatpush3.msra.mxu0 %v7304_v21 }
 0xa59   :  { %4715 = vmatprep.subr.mxu0 %v7591_v22 }
 0xae8   :  { %v4486_v38 = vpop.f32.mrf.mxu1 }
 0xaea   :  { %v4487_v17 = vpop.f32.mrf.mxu1 }
 0xaeb   :  { %v4556_v18 = vpop.f32.mrf.mxu0  ;;  %v4488_v58 = vadd.f32 %v4487_v17, %v4486_v38  ;;  %v7677_v17 = vld [vmem:[#allocation70_spill] sm:$0xff]  ;;  %v7678_v38 = vld [vmem:[#allocation71_spill] sm:$0xff] }
 0xaed   :  { %v4557_v53 = vpop.f32.mrf.mxu0  ;;  %v3451_v59 = vadd.f32 %v4488_v58, %v7313_v44  ;;  %v7674_v58 = vld [vmem:[#allocation67_spill] sm:$0xff] }
 0xaee   :  { %v4558_v49 = vadd.f32 %v4557_v53, %v4556_v18  ;;  %v7672_v53 = vld [vmem:[#allocation65_spill] sm:$0xff] }
 0xaef   :  { %v7676_v18 = vld [vmem:[#allocation69_spill] sm:$0xff] }
 0xb08   :  { %v4521_v55 = vpop.f32.mrf.mxu1 }
 0xb0a   :  { %v4522_v52 = vpop.f32.mrf.mxu1 }
 0xb0b   :  { %v4523_v50 = vadd.f32 %v4522_v52, %v4521_v55  ;;  %v7671_v52 = vld [vmem:[#allocation64_spill] sm:$0xff]  ;;  %v7673_v55 = vld [vmem:[#allocation66_spill] sm:$0xff] }
 0xb0d   :  { %v3528_v47 = vadd.f32 %v4523_v50, %v3451_v59  ;;  %v7670_v50 = vld [vmem:[#allocation63_spill] sm:$0xff]  ;;  %v7675_v59 = vld [vmem:[#allocation68_spill] sm:$0xff] }
 0xb0f   :  { %v3603_v21 = vadd.f32 %v4558_v49, %v3528_v47  ;;  %v7668_v47 = vld [vmem:[#allocation61_spill] sm:$0xff]  ;;  %v7669_v49 = vld [vmem:[#allocation62_spill] sm:$0xff] }
 0xb11   :  { %v3604_v46 = vmax.f32 %v3603_v21, 0.0  ;;  %v3830_v21 = vrot.slane %v7039_v3, 4 }
 0xb13   :  { %4709 = vmatmul.mubr.msk.f32.vlgmr.msra.gmra.mxu1 %vm363_vm1, %v3604_v46  ;;  %v7667_v46 = vld [vmem:[#allocation60_spill] sm:$0xff] }
 0xb14   :  { %4574 = vmatpush3.msra.mxu1 %v6648_v40  ;;  %3823 = vmatprep.mubr.f32.mxu1 %v3756_v43  ;;  %v3755_v40 = vrot.slane %v7039_v3, 3  ;;  %v7666_v43 = vld [vmem:[#allocation59_spill] sm:$0xff] }
 0xb15   :  { %4575 = vmatprep.subr.mxu1 %v6653_v4  ;;  %v3906_v4 = vrot.slane %v7041_v34, 5 }
 0xb16   :  { %4576 = vmatpush3.msra.mxu1 %v6659_v30  ;;  %v7631_v30 = vld [vmem:[#allocation24_spill] sm:$0xff] }
 0xb17   :  { %4577 = vmatprep.subr.mxu1 %v6671_v15  ;;  %v7633_v15 = vld [vmem:[#allocation26_spill] sm:$0xff] }
 0xb18   :  { %4578 = vmatpush3.msra.mxu1 %v6677_v28  ;;  %v7634_v28 = vld [vmem:[#allocation27_spill] sm:$0xff] }
 0xb19   :  { %4579 = vmatprep.subr.mxu1 %v6683_v1  ;;  %v7635_v1 = vld [vmem:[#allocation28_spill] sm:$0xff] }
 0xb1a   :  { %4580 = vmatpush3.msra.mxu1 %v6689_v45  ;;  %v7636_v45 = vld [vmem:[#allocation29_spill] sm:$0xff] }
 0xb1b   :  { %4581 = vmatprep.subr.mxu1 %v6695_v5  ;;  %v7637_v5 = vld [vmem:[#allocation30_spill] sm:$0xff] }
 0xb1c   :  { %4582 = vmatpush3.msra.mxu1 %v6701_v6  ;;  %v7638_v6 = vld [vmem:[#allocation31_spill] sm:$0xff] }
 0xb1d   :  { %4583 = vmatprep.subr.mxu1 %v6707_v7  ;;  %v7639_v7 = vld [vmem:[#allocation32_spill] sm:$0xff] }
 0xb1e   :  { %4584 = vmatpush3.msra.mxu1 %v6713_v8  ;;  %v7640_v8 = vld [vmem:[#allocation33_spill] sm:$0xff] }
 0xb1f   :  { %4585 = vmatprep.subr.mxu1 %v6719_v9  ;;  %v7641_v9 = vld [vmem:[#allocation34_spill] sm:$0xff] }
 0xb20   :  { %4586 = vmatpush3.msra.mxu1 %v6725_v10  ;;  %v7642_v10 = vld [vmem:[#allocation35_spill] sm:$0xff] }
 0xb21   :  { %4587 = vmatprep.subr.mxu1 %v6731_v33  ;;  %v7643_v33 = vld [vmem:[#allocation36_spill] sm:$0xff] }
 0xb22   :  { %4588 = vmatpush3.msra.mxu1 %v6737_v35  ;;  %v7644_v35 = vld [vmem:[#allocation37_spill] sm:$0xff] }
 0xb23   :  { %4589 = vmatprep.subr.mxu1 %v6743_v60  ;;  %v7645_v60 = vld [vmem:[#allocation38_spill] sm:$0xff] }
 0xb24   :  { %4590 = vmatpush3.msra.mxu1 %v6749_v61  ;;  %v7646_v61 = vld [vmem:[#allocation39_spill] sm:$0xff] }
 0xb25   :  { %4591 = vmatprep.subr.mxu1 %v6755_v62  ;;  %v7647_v62 = vld [vmem:[#allocation41_spill] sm:$0xff] }
 0xb26   :  { %4592 = vmatpush3.msra.mxu1 %v6761_v29  ;;  %v7648_v29 = vld [vmem:[#allocation42_spill] sm:$0xff] }
 0xb27   :  { %4593 = vmatprep.subr.mxu1 %v6767_v63  ;;  %v3905_v63 = vrot.slane %v7039_v3, 5  ;;  %v7682_v3 = vld [vmem:[#allocation75_spill] sm:$0xff] }
 0xb28   :  { %4594 = vmatpush3.msra.mxu1 %v6773_v27  ;;  %v7649_v27 = vld [vmem:[#allocation43_spill] sm:$0xff] }
 0xb29   :  { %4595 = vmatprep.subr.mxu1 %v6779_v31  ;;  %v7387_v31 = vld [vmem:[%s7495_s17 + $0x8] sm:$0xff] }
 0xb2a   :  { %4596 = vmatpush3.msra.mxu1 %v6785_v25  ;;  %4716 = vmatpush3.msra.mxu0 %v7387_v31  ;;  %v7394_v25 = vld [vmem:[%s7495_s17] sm:$0xff] }
 0xb2b   :  { %4597 = vmatprep.subr.mxu1 %v6791_v16  ;;  %4717 = vmatprep.subr.mxu0 %v7591_v22  ;;  %v7650_v16 = vld [vmem:[#allocation40_spill] sm:$0xff] }
 0xb2c   :  { %4598 = vmatpush3.msra.mxu1 %v6929_v54  ;;  %4718 = vmatpush3.msra.mxu0 %v7394_v25  ;;  %v7657_v54 = vld [vmem:[#allocation50_spill] sm:$0xff] }
 0xb2d   :  { %4599 = vmatprep.subr.mxu1 %v6941_v56  ;;  %4608 = vmatprep.subr.mxu0 %v7650_v16  ;;  %v7658_v56 = vld [vmem:[#allocation51_spill] sm:$0xff] }
 0xb2e   :  { %4600 = vmatpush3.msra.mxu1 %v6953_v57  ;;  %v7659_v57 = vld [vmem:[#allocation52_spill] sm:$0xff] }
 0xb2f   :  { %4601 = vmatprep.subr.mxu1 %v6965_v32  ;;  %v7660_v32 = vld [vmem:[#allocation53_spill] sm:$0xff] }
 0xb30   :  { %4602 = vmatpush3.msra.mxu1 %v6977_v2  ;;  %v7661_v2 = vld [vmem:[#allocation54_spill] sm:$0xff] }
 0xb31   :  { %4603 = vmatprep.subr.mxu1 %v6989_v23  ;;  %v7662_v23 = vld [vmem:[#allocation55_spill] sm:$0xff] }
 0xb32   :  { %4604 = vmatpush3.msra.mxu1 %v6999_v0  ;;  %v7630_v0 = vld [vmem:[#allocation23_spill] sm:$0xff] }
 0xb33   :  { %3824 = vmatmul.mubr.f32.vlgmr.msra.gmra.mxu1 %v3755_v40  ;;  %4643 = vmatprep.subr.mxu1 %v6664_v14  ;;  %v7632_v14 = vld [vmem:[#allocation25_spill] sm:$0xff]  ;;  %v7679_v40 = vld [vmem:[#allocation72_spill] sm:$0xff] }
 0xb34   :  { %4644 = vmatpush3.msra.mxu1 %v6803_v20  ;;  %3973 = vmatprep.mubr.f32.mxu1 %v3906_v4  ;;  %v7401_v20 = vld [vmem:[%s7494_s16] sm:$0x1]  ;;  %v7680_v4 = vld [vmem:[#allocation73_spill] sm:$0xff] }
 0xb35   :  { %4645 = vmatprep.subr.mxu1 %v6808_v19 }
 0xb36   :  { %4646 = vmatpush3.msra.mxu1 %v6813_v12 }
 0xb37   :  { %4647 = vmatprep.subr.mxu1 %v6819_v24 }
 0xb38   :  { %4648 = vmatpush3.msra.mxu1 %v6825_v13 }
 0xb39   :  { %4649 = vmatprep.subr.mxu1 %v6831_v42  ;;  %v3831_v42 = vrot.slane %v7041_v34, 4  ;;  %v7656_v34 = vld [vmem:[#allocation49_spill] sm:$0xff] }
 0xb3a   :  { %4650 = vmatpush3.msra.mxu1 %v6837_v36  ;;  %v7651_v36 = vld [vmem:[#allocation44_spill] sm:$0xff] }
 0xb3b   :  { %4651 = vmatprep.subr.mxu1 %v6843_v26  ;;  %v7652_v26 = vld [vmem:[#allocation45_spill] sm:$0xff] }
 0xb3c   :  { %4652 = vmatpush3.msra.mxu1 %v6849_v39  ;;  %v7653_v39 = vld [vmem:[#allocation46_spill] sm:$0xff] }
 0xb3d   :  { %4653 = vmatprep.subr.mxu1 %v6855_v41  ;;  %v7654_v41 = vld [vmem:[#allocation47_spill] sm:$0xff] }
 0xb3e   :  { %4654 = vmatpush3.msra.mxu1 %v6861_v37  ;;  %v7655_v37 = vld [vmem:[#allocation48_spill] sm:$0xff] }
 0xb3f   :  { %4655 = vmatprep.subr.mxu1 %v7630_v0  ;;  %v7681_v0 = vld [vmem:[#allocation74_spill] sm:$0xff] }
 0xb40   :  { %4656 = vmatpush3.msra.mxu1 %v7631_v30  ;;  %v7683_v30 = vld [vmem:[#allocation76_spill] sm:$0xff] }
 0xb41   :  { %4657 = vmatprep.subr.mxu1 %v7632_v14  ;;  %v7684_v14 = vld [vmem:[#allocation77_spill] sm:$0xff] }
 0xb42   :  { %4658 = vmatpush3.msra.mxu1 %v7633_v15  ;;  %v7685_v15 = vld [vmem:[#allocation78_spill] sm:$0xff] }
 0xb43   :  { %4659 = vmatprep.subr.mxu1 %v7634_v28  ;;  %v7686_v28 = vld [vmem:[#allocation79_spill] sm:$0xff] }
 0xb44   :  { %4660 = vmatpush3.msra.mxu1 %v7635_v1  ;;  %v3380_v1 = vld [vmem:[%s7496_s18] sm:$0x1]  ;;  %s4973_s18 = smov [#allocation16]  }
 0xb45   :  { %4661 = vmatprep.subr.mxu1 %v7636_v45  ;;  %s4135_s1 = sshll.u32 %s4973_s18, 4  ;;  %s4136_s1 = int_to_ptr.vmem [resolvable:$true] %s4135_s1 }
 0xb46   :  { %4662 = vmatpush3.msra.mxu1 %v7637_v5  ;;  %s4927_s6 = scalar_lea.vmem %s4136_s1, 32  ;;  %p4932_p13 = scmp.lt.s32.totalorder %s4136_s1, %s4136_s1 }
 0xb47   :  { %4663 = vmatprep.subr.mxu1 %v7638_v6  ;;  %p4928_p12 = scmp.ne.s32.totalorder %s4136_s1, %s4927_s6  ;;  %p4933_p0 = scmp.lt.s32.totalorder %s4927_s6, %s4927_s6 }
 0xb48   :  { %4664 = vmatpush3.msra.mxu1 %v7639_v7 }
 0xb49   :  { %4665 = vmatprep.subr.mxu1 %v7640_v8  ;;  %p4934_p1 = por %p4933_p0, %p4932_p13 }
 0xb4a   :  { %4666 = vmatpush3.msra.mxu1 %v7641_v9 }
 0xb4b   :  { %4667 = vmatprep.subr.mxu1 %v7642_v10  ;;  %p4935_p2 = pnand %p4934_p1, %p4928_p12 }
 0xb4c   :  { %4668 = vmatpush3.msra.mxu1 %v7643_v33 }
 0xb4d   :  { %4669 = vmatprep.subr.mxu1 %v7644_v35 }
 0xb4e   :  { %4670 = vmatpush3.msra.mxu1 %v7645_v60 }
 0xb4f   :  { %4671 = vmatprep.subr.mxu1 %v7646_v61 }
 0xb50   :  { %4672 = vmatpush3.msra.mxu1 %v7647_v62 }
 0xb51   :  { %4673 = vmatprep.subr.mxu1 %v7648_v29 }
 0xb52   :  { %4674 = vmatpush3.msra.mxu1 %v7649_v27 }
 0xb53   :  { %3974 = vmatmul.mubr.f32.vlgmr.msra.gmra.mxu1 %v3905_v63 }
 0xbd3   :  { %v3674_v19 = vpop.f32.mrf.mxu1 }
 0xbd4   :  { %v3675_v12 = vadd.f32 %v3674_v19, %v7401_v20  ;;  %v7687_v19 = vld [vmem:[#allocation80_spill] sm:$0xff] }
 0xbd5   :  { %v4710_v24 = vpop.f32.mrf.mxu1 }
 0xbd6   :  { %v3678_v13 = vmax.f32 %v3675_v12, 0.0  ;;  %v7688_v12 = vld [vmem:[#allocation81_spill] sm:$0xff] }
 0xbd8   :  { %4720 = vmatmul.mubr.msk.f32.vlgmr.msra.gmra.mxu0 %vm3679_vm7, %v3678_v13 }
 0xbd9   :  { %4609 = vmatpush3.msra.mxu0 %v7046_v48  ;;  %3898 = vmatprep.mubr.f32.mxu0 %v3831_v42  ;;  %v7663_v48 = vld [vmem:[#allocation56_spill] sm:$0xff] }
 0xbda   :  { %4610 = vmatprep.subr.mxu0 %v7052_v51  ;;  %v7664_v51 = vld [vmem:[#allocation57_spill] sm:$0xff] }
 0xbdb   :  { %4611 = vmatpush3.msra.mxu0 %v7060_v11  ;;  %v7665_v11 = vld [vmem:[#allocation58_spill] sm:$0xff] }
 0xbdc   :  { %4612 = vmatprep.subr.mxu0 %v7651_v36 }
 0xbdd   :  { %4613 = vmatpush3.msra.mxu0 %v7652_v26 }
 0xbde   :  { %4614 = vmatprep.subr.mxu0 %v7653_v39 }
 0xbdf   :  { %4615 = vmatpush3.msra.mxu0 %v7654_v41 }
 0xbe0   :  { %4616 = vmatprep.subr.mxu0 %v7655_v37 }
 0xbe1   :  { %4617 = vmatpush3.msra.mxu0 %v7656_v34 }
 0xbe2   :  { %4618 = vmatprep.subr.mxu0 %v7657_v54 }
 0xbe3   :  { %4619 = vmatpush3.msra.mxu0 %v7658_v56 }
 0xbe4   :  { %4620 = vmatprep.subr.mxu0 %v7659_v57 }
 0xbe5   :  { %4621 = vmatpush3.msra.mxu0 %v7660_v32 }
 0xbe6   :  { %4622 = vmatprep.subr.mxu0 %v7661_v2 }
 0xbe7   :  { %4623 = vmatpush3.msra.mxu0 %v7662_v23 }
 0xbe8   :  { %4624 = vmatprep.subr.mxu0 %v7663_v48 }
 0xbe9   :  { %4625 = vmatpush3.msra.mxu0 %v7664_v51 }
 0xbea   :  { %4626 = vmatprep.subr.mxu0 %v7665_v11 }
 0xbeb   :  { %4627 = vmatpush3.msra.mxu0 %v7666_v43 }
 0xbec   :  { %4628 = vmatprep.subr.mxu0 %v7667_v46 }
 0xbed   :  { %4629 = vmatpush3.msra.mxu0 %v7668_v47 }
 0xbee   :  { %4630 = vmatprep.subr.mxu0 %v7669_v49 }
 0xbef   :  { %4631 = vmatpush3.msra.mxu0 %v7670_v50 }
 0xbf0   :  { %4632 = vmatprep.subr.mxu0 %v7671_v52 }
 0xbf1   :  { %4633 = vmatpush3.msra.mxu0 %v7672_v53 }
 0xbf2   :  { %4634 = vmatprep.subr.mxu0 %v7673_v55 }
 0xbf3   :  { %4635 = vmatpush3.msra.mxu0 %v7674_v58  ;;  %v4605_v7 = vpop.f32.mrf.mxu1 }
 0xbf4   :  { %4636 = vmatprep.subr.mxu0 %v7675_v59 }
 0xbf5   :  { %4637 = vmatpush3.msra.mxu0 %v7676_v18  ;;  %v4606_v8 = vpop.f32.mrf.mxu1 }
 0xbf6   :  { %4638 = vmatprep.subr.mxu0 %v7677_v17  ;;  %v4607_v10 = vadd.f32 %v4606_v8, %v4605_v7 }
 0xbf7   :  { %4639 = vmatpush3.msra.mxu0 %v7678_v38 }
 0xbf8   :  { %3899 = vmatmul.mubr.f32.vlgmr.msra.gmra.mxu0 %v3830_v21  ;;  %4722 = vmatprep.subr.mxu0 %v7591_v22  ;;  %v3829_v61 = vadd.f32 %v4607_v10, %v7313_v44 }
 0xbf9   :  { %4723 = vmatpush3.msra.mxu0 %v7679_v40  ;;  %4738 = vmatprep.mubr.msk.f32.mxu0 %vm4972_vm6, %v7591_v22 }
 0xbfa   :  { %4724 = vmatprep.subr.mxu0 %v7591_v22 }
 0xbfb   :  { %4725 = vmatpush3.msra.mxu0 %v7680_v4 }
 0xbfc   :  { %4726 = vmatprep.subr.mxu0 %v7591_v22 }
 0xbfd   :  { %4727 = vmatpush3.msra.mxu0 %v7681_v0 }
 0xbfe   :  { %4728 = vmatprep.subr.mxu0 %v7591_v22 }
 0xbff   :  { %4729 = vmatpush3.msra.mxu0 %v7682_v3 }
 0xc00   :  { %4730 = vmatprep.subr.mxu0 %v7591_v22 }
 0xc01   :  { %4731 = vmatpush3.msra.mxu0 %v7683_v30 }
 0xc02   :  { %4732 = vmatprep.subr.mxu0 %v7591_v22 }
 0xc03   :  { %4733 = vmatpush3.msra.mxu0 %v7684_v14 }
 0xc04   :  { %4734 = vmatprep.subr.mxu0 %v7591_v22 }
 0xc05   :  { %4735 = vmatpush3.msra.mxu0 %v7685_v15 }
 0xc06   :  { %4736 = vmatprep.subr.mxu0 %v7591_v22 }
 0xc07   :  { %4737 = vmatpush3.msra.mxu0 %v7686_v28 }
 0xc08   :  { %4741 = vmatprep.subr.mxu0 %v7591_v22 }
 0xc13   :  { %v4675_v9 = vpop.f32.mrf.mxu1 }
 0xc15   :  { %v4676_v35 = vpop.f32.mrf.mxu1 }
 0xc16   :  { %v4677_v29 = vadd.f32 %v4676_v35, %v4675_v9 }
 0xc98   :  { %v3749_v45 = vpop.f32.mrf.mxu0 }
 0xc99   :  { %v3750_v5 = vadd.f32 %v3749_v45, %v3380_v1 }
 0xc9a   :  { %v4721_v6 = vpop.f32.mrf.mxu0 }
 0xc9b   :  { %3754 = vst.msk [vmem:[#allocation16] sm:$0x1] %vm3753_vm8, %v3750_v5 }
 0xcb8   :  { %v4640_v33 = vpop.f32.mrf.mxu0 }
 0xcba   :  { %v4641_v60 = vpop.f32.mrf.mxu0 }
 0xcbb   :  { %v4642_v62 = vadd.f32 %v4641_v60, %v4640_v33 }
 0xcbd   :  { %v3904_v63 = vadd.f32 %v4642_v62, %v3829_v61 }
 0xcbf   :  { %v3979_v27 = vadd.f32 %v4677_v29, %v3904_v63 }
 0xcc1   :  { %v3980_v16 = vmax.f32 %v3979_v27, 0.0 }
 0xcc3   :  { %4739 = vmatmul.mubr.msk.f32.vlgmr.msra.gmra.mxu0 %vm363_vm1, %v3980_v16 }
 0xcc4   :  { %4742 = vmatpush3.msra.mxu0 %v7687_v19  ;;  %4749 = vmatprep.mubr.msk.f32.mxu0 %vm4972_vm6, %v7591_v22 }
 0xcc5   :  { %4743 = vmatprep.subr.mxu0 %v7591_v22 }
 0xcc6   :  { %4744 = vmatpush3.msra.mxu0 %v7688_v12 }
 0xcc7   :  { %4745 = vmatprep.subr.mxu0 %v7591_v22 }
 0xcc8   :  { %4746 = vmatpush3.msra.mxu0 %v7387_v31 }
 0xcc9   :  { %4747 = vmatprep.subr.mxu0 %v7591_v22 }
 0xcca   :  { %4748 = vmatpush3.msra.mxu0 %v7394_v25 }
 0xd83   :  { %v4050_v44 = vpop.f32.mrf.mxu0 }
 0xd84   :  { %v4051_v24 = vadd.f32 %v4050_v44, %v7401_v20 }
 0xd85   :  { %v4740_v13 = vpop.f32.mrf.mxu0 }
 0xd86   :  { %v4054_v42 = vmax.f32 %v4051_v24, 0.0 }
 0xd88   :  { %4750 = vmatmul.mubr.msk.f32.vlgmr.msra.gmra.mxu0 %vm3679_vm7, %v4054_v42 }
 0xe48   :  { %v4124_v36 = vpop.f32.mrf.mxu0 }
 0xe49   :  { %v4125_v26 = vadd.f32 %v4124_v36, %v3380_v1 }
 0xe4a   :  { %v4751_v39 = vpop.f32.mrf.mxu0 }
 0xe4b   :  { %4128 = vst.msk [vmem:[#allocation16 + $0x1] sm:$0x1] %vm3753_vm8, %v4125_v26 }
 0xe4c   :  { %4938 = shalt.err (!%p4935_p2)
}
 0xe4d   :  { %4138 = dma.vmem_to_hbm [thread:$0]  %s4136_s1, 32, %s7497_s19, [#allocation4]  }
 0xe4e   :  { %4957 = dma.done.wait [#allocation4], 32  }
 0xe4f   :  { %4958 = vsyncadd [#allocation4], 4294967264 }
 0xe50   :  { %4142 = vsyncpa [#allocation3], 1 }
 0xe51   :  { %4143 = vsyncpa [#allocation6], 1 }
 0xe52   :  { %4144 = vsyncpa [#allocation9], 1 }
 0xe53   :  { %4145 = vsyncpa [#allocation12], 1 }
 0xe54   :  { %4146 = vsyncpa [#allocation15], 1 }
 0xe55   :  { %4147 = vsyncpa [#allocation4], 1 }

</bundles_post_ra>
